<compile_context>
chip_gen: v6e
topology: v6e:2x2x1
jax: 0.10.0
libtpu: 0.0.40
codegen_flags: <defaults>
</compile_context>

<pallas_src>
import functools

import jax
import jax.numpy as jnp
from jax.experimental import pallas as pl
from jax.experimental.pallas import tpu as pltpu


def _spatial_attention_kernel(x_ref, w_ref, o_ref, sum_ref, max_ref, pad_ref,
                              *, C, c_block, H, W, KH, KW, pad_h, pad_w):
    """Fused channel mean/max reduce + 7x7 conv + sigmoid.

    Grid: (B, n_cblk) with B "parallel", C tiles "arbitrary" (trailing).

    x_ref   : (1, c_block, H, W)   input C-tile of one batch element
    w_ref   : (2*KH*KW,) f32       flattened conv weight in SMEM (scalar reads)
    o_ref   : (1, 1, H, W)         sigmoid(conv([avg, max])) written at last C tile
    sum_ref : (H, W) f32           running channel sum   (VMEM scratch)
    max_ref : (H, W) f32           running channel max   (VMEM scratch)
    pad_ref : (2, Hp, Wp) f32      zero-padded [avg, max] map (VMEM scratch)
    """
    c_idx = pl.program_id(1)
    n_c = pl.num_programs(1)

    @pl.when(c_idx == 0)
    def _init():
        sum_ref[...] = jnp.zeros_like(sum_ref)
        max_ref[...] = jnp.full_like(max_ref, -jnp.inf)

    def _accumulate(x_sum, x_max):
        # Reduce in the input dtype; only the (H, W) accumulators are f32.
        sum_ref[...] += jnp.sum(x_sum, axis=0, dtype=jnp.float32)
        max_ref[...] = jnp.maximum(
            max_ref[...], jnp.max(x_max, axis=0).astype(jnp.float32))

    if C % c_block == 0:
        xb = x_ref[0]                                   # (c_block, H, W)
        _accumulate(xb, xb)
    else:
        # Only the last C tile contains out-of-range channels: gate the masking
        # there so all other tiles accumulate at full rate.
        @pl.when(c_idx < n_c - 1)
        def _full_tile():
            xb = x_ref[0]
            _accumulate(xb, xb)

        @pl.when(c_idx == n_c - 1)
        def _masked_tile():
            xb = x_ref[0]
            ch = (jax.lax.broadcasted_iota(jnp.int32, xb.shape, 0)
                  + c_idx * c_block)
            valid = ch < C          # select-based mask: garbage rows discarded
            _accumulate(jnp.where(valid, xb, jnp.zeros((), xb.dtype)),
                        jnp.where(valid, xb, jnp.array(-jnp.inf, xb.dtype)))

    @pl.when(c_idx == n_c - 1)
    def _finalize():
        # In-kernel zero padding: channel 0 = avg, channel 1 = max.
        pad_ref[...] = jnp.zeros_like(pad_ref)
        pad_ref[0, pad_h:pad_h + H, pad_w:pad_w + W] = sum_ref[...] * (1.0 / C)
        pad_ref[1, pad_h:pad_h + H, pad_w:pad_w + W] = max_ref[...]

        avg_p = pad_ref[0]                              # (Hp, Wp)
        max_p = pad_ref[1]
        acc = jnp.zeros((H, W), jnp.float32)
        for kj in range(KW):                            # one lane shift per kj
            a_kj = avg_p[:, kj:kj + W]                  # (Hp, W)
            m_kj = max_p[:, kj:kj + W]
            for ki in range(KH):                        # sublane-only slices
                w_a = w_ref[ki * KW + kj]               # scalars from SMEM
                w_m = w_ref[KH * KW + ki * KW + kj]
                acc = acc + w_a * a_kj[ki:ki + H, :] + w_m * m_kj[ki:ki + H, :]
        o_ref[0, 0] = jax.nn.sigmoid(acc).astype(o_ref.dtype)


def spatial_attention(x, weight):
    """x: (B, C, H, W); weight: (2, KH, KW) or (1, 2, KH, KW) -> (B, 1, H, W)."""
    B, C, H, W = x.shape
    if weight.ndim == 4:
        weight = weight[0]
    _, KH, KW = weight.shape
    pad_h, pad_w = (KH - 1) // 2, (KW - 1) // 2
    Hp, Wp = H + 2 * pad_h, W + 2 * pad_w

    # ---- generation-aware VMEM budgeting -----------------------------------
    try:
        vmem_cap = int(pltpu.get_tpu_info().vmem_capacity_bytes)
    except Exception:
        vmem_cap = 64 * 1024 * 1024              # v7x-safe fallback
    block_budget = min(16 * 1024 * 1024, vmem_cap // 8)   # per input block
    vmem_limit = min(64 * 1024 * 1024, vmem_cap // 2)     # scoped limit

    # VMEM footprint of one (H, W) channel slab including (sublane, lane) tile
    # padding; packed sub-32-bit dtypes use taller sublane tiles (16/32 rows).
    itemsize = x.dtype.itemsize
    sublane = 8 * (4 // itemsize)                # 8 (f32) / 16 (bf16) / 32 (i8)
    vmem_per_channel = pl.cdiv(H, sublane) * pl.cdiv(W, 128) * 4096
    c_block = min(C, max(1, block_budget // vmem_per_channel))
    if c_block < C:
        c_block = max(1, (c_block // 8) * 8)     # tidy alignment when tiling C
    n_cblk = pl.cdiv(C, c_block)

    w_flat = weight.reshape(-1).astype(jnp.float32)       # (2*KH*KW,)

    kernel = functools.partial(
        _spatial_attention_kernel, C=C, c_block=c_block, H=H, W=W,
        KH=KH, KW=KW, pad_h=pad_h, pad_w=pad_w)

    return pl.pallas_call(
        kernel,
        out_shape=jax.ShapeDtypeStruct((B, 1, H, W), x.dtype),
        grid_spec=pltpu.PrefetchScalarGridSpec(
            num_scalar_prefetch=0,
            grid=(B, n_cblk),                    # B parallel, C-tiles arbitrary
            in_specs=[
                pl.BlockSpec((1, c_block, H, W), lambda b, c: (b, c, 0, 0)),
                pl.BlockSpec(memory_space=pltpu.MemorySpace.SMEM),
            ],
            out_specs=pl.BlockSpec((1, 1, H, W), lambda b, c: (b, 0, 0, 0)),
            scratch_shapes=[
                pltpu.VMEM((H, W), jnp.float32),         # running sum
                pltpu.VMEM((H, W), jnp.float32),         # running max
                pltpu.VMEM((2, Hp, Wp), jnp.float32),    # padded [avg, max]
            ],
        ),
        compiler_params=pltpu.CompilerParams(
            dimension_semantics=("parallel", "arbitrary"),
            vmem_limit_bytes=vmem_limit),
    )(x, w_flat)


def _reference(x, weight):
    # Plain-JAX reference of the PyTorch forward (for correctness check).
    avg = jnp.mean(x, axis=1, keepdims=True)
    mx = jnp.max(x, axis=1, keepdims=True)
    feat = jnp.concatenate([avg, mx], axis=1)            # (B, 2, H, W)
    if weight.ndim == 3:
        weight = weight[None]                            # (1, 2, KH, KW) OIHW
    KH, KW = weight.shape[2], weight.shape[3]
    pad_h, pad_w = (KH - 1) // 2, (KW - 1) // 2
    y = jax.lax.conv_general_dilated(
        feat, weight, window_strides=(1, 1),
        padding=((pad_h, pad_h), (pad_w, pad_w)),
        dimension_numbers=("NCHW", "OIHW", "NCHW"))
    return jax.nn.sigmoid(y)


if __name__ == "__main__":
    key = jax.random.PRNGKey(0)
    kx, kw = jax.random.split(key)

    B, C, H, W = 2, 4, 16, 16
    kernel_size = 7

    x = jax.random.normal(kx, (B, C, H, W), dtype=jnp.float32)
    # Shape matches nn.Conv2d(2, 1, 7, bias=False) weight (out dim squeezed):
    weight = (jax.random.normal(kw, (2, kernel_size, kernel_size),
                                dtype=jnp.float32) * 0.1)

    out = spatial_attention(x, weight)
    out = jax.block_until_ready(out)

    ref = _reference(x, weight)
    assert out.shape == (B, 1, H, W)
    assert jnp.allclose(out, ref, atol=1e-5, rtol=1e-5), "mismatch vs reference"

    print("KERNEL_OK")
</pallas_src>

<mosaic_0001>
module attributes {stable_mosaic.version = 11 : i64} {
  func.func @_spatial_attention_kernel(%arg0: i32, %arg1: i32, %arg2: memref<1x4x16x16xf32, #tpu.memory_space<vmem>>, %arg3: memref<98xf32, #tpu.memory_space<smem>>, %arg4: memref<1x1x16x16xf32, #tpu.memory_space<vmem>>, %arg5: memref<16x16xf32, #tpu.memory_space<vmem>>, %arg6: memref<16x16xf32, #tpu.memory_space<vmem>>, %arg7: memref<2x22x22xf32, #tpu.memory_space<vmem>>) attributes {dimension_semantics = [#tpu.dimension_semantics<parallel>, #tpu.dimension_semantics<arbitrary>], iteration_bounds = array<i64: 2, 1>, scalar_prefetch = 0 : i64, scratch_operands = 3 : i64, tpu.core_type = #tpu.core_type<tc>, window_params = [{transform_indices = @transform_0, window_bounds = array<i64: 1, 4, 16, 16>}, {transform_indices = @transform_1, window_bounds = array<i64: 98>}, {transform_indices = @transform_2, window_bounds = array<i64: 1, 1, 16, 16>}]} {
    %c0_i32 = arith.constant 0 : i32
    %0 = arith.cmpi eq, %arg1, %c0_i32 : i32
    %1 = arith.extui %0 : i1 to i32
    %c0_i32_0 = arith.constant 0 : i32
    %2 = arith.cmpi ne, %1, %c0_i32_0 : i32
    scf.if %2 {
      %cst_15 = arith.constant 0.000000e+00 : f32
      %16 = vector.broadcast %cst_15 : f32 to vector<16x16xf32>
      %c0_16 = arith.constant 0 : index
      %c0_17 = arith.constant 0 : index
      %17 = vector.load %arg5[%c0_16, %c0_17] : memref<16x16xf32, #tpu.memory_space<vmem>>, vector<16x16xf32>
      tpu.vector_store %arg5[%c0_16, %c0_17], %16 {strides = array<i32>} : memref<16x16xf32, #tpu.memory_space<vmem>>, vector<16x16xf32>,
      %cst_18 = arith.constant 0xFF800000 : f32
      %18 = vector.broadcast %cst_18 : f32 to vector<16x16xf32>
      %c0_19 = arith.constant 0 : index
      %c0_20 = arith.constant 0 : index
      %19 = vector.load %arg6[%c0_19, %c0_20] : memref<16x16xf32, #tpu.memory_space<vmem>>, vector<16x16xf32>
      tpu.vector_store %arg6[%c0_19, %c0_20], %18 {strides = array<i32>} : memref<16x16xf32, #tpu.memory_space<vmem>>, vector<16x16xf32>,
    } else {
    }
    %c0 = arith.constant 0 : index
    %c0_1 = arith.constant 0 : index
    %c0_2 = arith.constant 0 : index
    %c0_3 = arith.constant 0 : index
    %3 = vector.load %arg2[%c0, %c0_1, %c0_2, %c0_3] : memref<1x4x16x16xf32, #tpu.memory_space<vmem>>, vector<1x4x16x16xf32>
    %4 = vector.shape_cast %3 : vector<1x4x16x16xf32> to vector<4x16x16xf32>
    %c0_4 = arith.constant 0 : index
    %c0_5 = arith.constant 0 : index
    %5 = vector.load %arg5[%c0_4, %c0_5] : memref<16x16xf32, #tpu.memory_space<vmem>>, vector<16x16xf32>
    %cst = arith.constant dense<0.000000e+00> : vector<16x16xf32>
    %6 = vector.multi_reduction <add>, %4, %cst [0] : vector<4x16x16xf32> to vector<16x16xf32>
    %7 = arith.addf %5, %6 : vector<16x16xf32>
    %c0_6 = arith.constant 0 : index
    %c0_7 = arith.constant 0 : index
    %8 = vector.load %arg5[%c0_6, %c0_7] : memref<16x16xf32, #tpu.memory_space<vmem>>, vector<16x16xf32>
    tpu.vector_store %arg5[%c0_6, %c0_7], %7 {strides = array<i32>} : memref<16x16xf32, #tpu.memory_space<vmem>>, vector<16x16xf32>,
    %c0_8 = arith.constant 0 : index
    %c0_9 = arith.constant 0 : index
    %9 = vector.load %arg6[%c0_8, %c0_9] : memref<16x16xf32, #tpu.memory_space<vmem>>, vector<16x16xf32>
    %cst_10 = arith.constant dense<0xFF800000> : vector<16x16xf32>
    %10 = vector.multi_reduction <maximumf>, %4, %cst_10 [0] : vector<4x16x16xf32> to vector<16x16xf32>
    %11 = arith.maximumf %9, %10 : vector<16x16xf32>
    %c0_11 = arith.constant 0 : index
    %c0_12 = arith.constant 0 : index
    %12 = vector.load %arg6[%c0_11, %c0_12] : memref<16x16xf32, #tpu.memory_space<vmem>>, vector<16x16xf32>
    tpu.vector_store %arg6[%c0_11, %c0_12], %11 {strides = array<i32>} : memref<16x16xf32, #tpu.memory_space<vmem>>, vector<16x16xf32>,
    %c0_i32_13 = arith.constant 0 : i32
    %13 = arith.cmpi eq, %arg1, %c0_i32_13 : i32
    %14 = arith.extui %13 : i1 to i32
    %c0_i32_14 = arith.constant 0 : i32
    %15 = arith.cmpi ne, %14, %c0_i32_14 : i32
    scf.if %15 {
      %cst_15 = arith.constant 0.000000e+00 : f32
      %16 = vector.broadcast %cst_15 : f32 to vector<2x22x22xf32>
      %c0_16 = arith.constant 0 : index
      %c0_17 = arith.constant 0 : index
      %c0_18 = arith.constant 0 : index
      %17 = vector.load %arg7[%c0_16, %c0_17, %c0_18] : memref<2x22x22xf32, #tpu.memory_space<vmem>>, vector<2x22x22xf32>
      tpu.vector_store %arg7[%c0_16, %c0_17, %c0_18], %16 {strides = array<i32>} : memref<2x22x22xf32, #tpu.memory_space<vmem>>, vector<2x22x22xf32>,
      %c0_19 = arith.constant 0 : index
      %c0_20 = arith.constant 0 : index
      %18 = vector.load %arg5[%c0_19, %c0_20] : memref<16x16xf32, #tpu.memory_space<vmem>>, vector<16x16xf32>
      %cst_21 = arith.constant 2.500000e-01 : f32
      %19 = vector.broadcast %cst_21 : f32 to vector<16x16xf32>
      %20 = arith.mulf %18, %19 : vector<16x16xf32>
      %c0_22 = arith.constant 0 : index
      %c3 = arith.constant 3 : index
      %c3_23 = arith.constant 3 : index
      %21 = vector.load %arg7[%c0_22, %c3, %c3_23] : memref<2x22x22xf32, #tpu.memory_space<vmem>>, vector<1x16x16xf32>
      %22 = vector.shape_cast %21 : vector<1x16x16xf32> to vector<16x16xf32>
      %23 = vector.shape_cast %20 : vector<16x16xf32> to vector<1x16x16xf32>
      tpu.vector_store %arg7[%c0_22, %c3, %c3_23], %23 {strides = array<i32>} : memref<2x22x22xf32, #tpu.memory_space<vmem>>, vector<1x16x16xf32>,
      %c0_24 = arith.constant 0 : index
      %c0_25 = arith.constant 0 : index
      %24 = vector.load %arg6[%c0_24, %c0_25] : memref<16x16xf32, #tpu.memory_space<vmem>>, vector<16x16xf32>
      %c1 = arith.constant 1 : index
      %c3_26 = arith.constant 3 : index
      %c3_27 = arith.constant 3 : index
      %25 = vector.load %arg7[%c1, %c3_26, %c3_27] : memref<2x22x22xf32, #tpu.memory_space<vmem>>, vector<1x16x16xf32>
      %26 = vector.shape_cast %25 : vector<1x16x16xf32> to vector<16x16xf32>
      %27 = vector.shape_cast %24 : vector<16x16xf32> to vector<1x16x16xf32>
      tpu.vector_store %arg7[%c1, %c3_26, %c3_27], %27 {strides = array<i32>} : memref<2x22x22xf32, #tpu.memory_space<vmem>>, vector<1x16x16xf32>,
      %c0_28 = arith.constant 0 : index
      %c0_29 = arith.constant 0 : index
      %c0_30 = arith.constant 0 : index
      %28 = vector.load %arg7[%c0_28, %c0_29, %c0_30] : memref<2x22x22xf32, #tpu.memory_space<vmem>>, vector<1x22x22xf32>
      %29 = vector.shape_cast %28 : vector<1x22x22xf32> to vector<22x22xf32>
      %c1_31 = arith.constant 1 : index
      %c0_32 = arith.constant 0 : index
      %c0_33 = arith.constant 0 : index
      %30 = vector.load %arg7[%c1_31, %c0_32, %c0_33] : memref<2x22x22xf32, #tpu.memory_space<vmem>>, vector<1x22x22xf32>
      %31 = vector.shape_cast %30 : vector<1x22x22xf32> to vector<22x22xf32>
      %cst_34 = arith.constant 0.000000e+00 : f32
      %32 = vector.broadcast %cst_34 : f32 to vector<16x16xf32>
      %33 = vector.extract_strided_slice %29 {offsets = [0, 0], sizes = [22, 16], strides = [1, 1]} : vector<22x22xf32> to vector<22x16xf32>
      %34 = vector.extract_strided_slice %31 {offsets = [0, 0], sizes = [22, 16], strides = [1, 1]} : vector<22x22xf32> to vector<22x16xf32>
      %c0_35 = arith.constant 0 : index
      %35 = memref.load %arg3[%c0_35] : memref<98xf32, #tpu.memory_space<smem>>
      %c49 = arith.constant 49 : index
      %36 = memref.load %arg3[%c49] : memref<98xf32, #tpu.memory_space<smem>>
      %37 = vector.extract_strided_slice %33 {offsets = [0, 0], sizes = [16, 16], strides = [1, 1]} : vector<22x16xf32> to vector<16x16xf32>
      %38 = vector.broadcast %35 : f32 to vector<16x16xf32>
      %39 = arith.mulf %38, %37 : vector<16x16xf32>
      %40 = arith.addf %32, %39 : vector<16x16xf32>
      %41 = vector.extract_strided_slice %34 {offsets = [0, 0], sizes = [16, 16], strides = [1, 1]} : vector<22x16xf32> to vector<16x16xf32>
      %42 = vector.broadcast %36 : f32 to vector<16x16xf32>
      %43 = arith.mulf %42, %41 : vector<16x16xf32>
      %44 = arith.addf %40, %43 : vector<16x16xf32>
      %c7 = arith.constant 7 : index
      %45 = memref.load %arg3[%c7] : memref<98xf32, #tpu.memory_space<smem>>
      %c56 = arith.constant 56 : index
      %46 = memref.load %arg3[%c56] : memref<98xf32, #tpu.memory_space<smem>>
      %47 = vector.extract_strided_slice %33 {offsets = [1, 0], sizes = [16, 16], strides = [1, 1]} : vector<22x16xf32> to vector<16x16xf32>
      %48 = vector.broadcast %45 : f32 to vector<16x16xf32>
      %49 = arith.mulf %48, %47 : vector<16x16xf32>
      %50 = arith.addf %44, %49 : vector<16x16xf32>
      %51 = vector.extract_strided_slice %34 {offsets = [1, 0], sizes = [16, 16], strides = [1, 1]} : vector<22x16xf32> to vector<16x16xf32>
      %52 = vector.broadcast %46 : f32 to vector<16x16xf32>
      %53 = arith.mulf %52, %51 : vector<16x16xf32>
      %54 = arith.addf %50, %53 : vector<16x16xf32>
      %c14 = arith.constant 14 : index
      %55 = memref.load %arg3[%c14] : memref<98xf32, #tpu.memory_space<smem>>
      %c63 = arith.constant 63 : index
      %56 = memref.load %arg3[%c63] : memref<98xf32, #tpu.memory_space<smem>>
      %57 = vector.extract_strided_slice %33 {offsets = [2, 0], sizes = [16, 16], strides = [1, 1]} : vector<22x16xf32> to vector<16x16xf32>
      %58 = vector.broadcast %55 : f32 to vector<16x16xf32>
      %59 = arith.mulf %58, %57 : vector<16x16xf32>
      %60 = arith.addf %54, %59 : vector<16x16xf32>
      %61 = vector.extract_strided_slice %34 {offsets = [2, 0], sizes = [16, 16], strides = [1, 1]} : vector<22x16xf32> to vector<16x16xf32>
      %62 = vector.broadcast %56 : f32 to vector<16x16xf32>
      %63 = arith.mulf %62, %61 : vector<16x16xf32>
      %64 = arith.addf %60, %63 : vector<16x16xf32>
      %c21 = arith.constant 21 : index
      %65 = memref.load %arg3[%c21] : memref<98xf32, #tpu.memory_space<smem>>
      %c70 = arith.constant 70 : index
      %66 = memref.load %arg3[%c70] : memref<98xf32, #tpu.memory_space<smem>>
      %67 = vector.extract_strided_slice %33 {offsets = [3, 0], sizes = [16, 16], strides = [1, 1]} : vector<22x16xf32> to vector<16x16xf32>
      %68 = vector.broadcast %65 : f32 to vector<16x16xf32>
      %69 = arith.mulf %68, %67 : vector<16x16xf32>
      %70 = arith.addf %64, %69 : vector<16x16xf32>
      %71 = vector.extract_strided_slice %34 {offsets = [3, 0], sizes = [16, 16], strides = [1, 1]} : vector<22x16xf32> to vector<16x16xf32>
      %72 = vector.broadcast %66 : f32 to vector<16x16xf32>
      %73 = arith.mulf %72, %71 : vector<16x16xf32>
      %74 = arith.addf %70, %73 : vector<16x16xf32>
      %c28 = arith.constant 28 : index
      %75 = memref.load %arg3[%c28] : memref<98xf32, #tpu.memory_space<smem>>
      %c77 = arith.constant 77 : index
      %76 = memref.load %arg3[%c77] : memref<98xf32, #tpu.memory_space<smem>>
      %77 = vector.extract_strided_slice %33 {offsets = [4, 0], sizes = [16, 16], strides = [1, 1]} : vector<22x16xf32> to vector<16x16xf32>
      %78 = vector.broadcast %75 : f32 to vector<16x16xf32>
      %79 = arith.mulf %78, %77 : vector<16x16xf32>
      %80 = arith.addf %74, %79 : vector<16x16xf32>
      %81 = vector.extract_strided_slice %34 {offsets = [4, 0], sizes = [16, 16], strides = [1, 1]} : vector<22x16xf32> to vector<16x16xf32>
      %82 = vector.broadcast %76 : f32 to vector<16x16xf32>
      %83 = arith.mulf %82, %81 : vector<16x16xf32>
      %84 = arith.addf %80, %83 : vector<16x16xf32>
      %c35 = arith.constant 35 : index
      %85 = memref.load %arg3[%c35] : memref<98xf32, #tpu.memory_space<smem>>
      %c84 = arith.constant 84 : index
      %86 = memref.load %arg3[%c84] : memref<98xf32, #tpu.memory_space<smem>>
      %87 = vector.extract_strided_slice %33 {offsets = [5, 0], sizes = [16, 16], strides = [1, 1]} : vector<22x16xf32> to vector<16x16xf32>
      %88 = vector.broadcast %85 : f32 to vector<16x16xf32>
      %89 = arith.mulf %88, %87 : vector<16x16xf32>
      %90 = arith.addf %84, %89 : vector<16x16xf32>
      %91 = vector.extract_strided_slice %34 {offsets = [5, 0], sizes = [16, 16], strides = [1, 1]} : vector<22x16xf32> to vector<16x16xf32>
      %92 = vector.broadcast %86 : f32 to vector<16x16xf32>
      %93 = arith.mulf %92, %91 : vector<16x16xf32>
      %94 = arith.addf %90, %93 : vector<16x16xf32>
      %c42 = arith.constant 42 : index
      %95 = memref.load %arg3[%c42] : memref<98xf32, #tpu.memory_space<smem>>
      %c91 = arith.constant 91 : index
      %96 = memref.load %arg3[%c91] : memref<98xf32, #tpu.memory_space<smem>>
      %97 = vector.extract_strided_slice %33 {offsets = [6, 0], sizes = [16, 16], strides = [1, 1]} : vector<22x16xf32> to vector<16x16xf32>
      %98 = vector.broadcast %95 : f32 to vector<16x16xf32>
      %99 = arith.mulf %98, %97 : vector<16x16xf32>
      %100 = arith.addf %94, %99 : vector<16x16xf32>
      %101 = vector.extract_strided_slice %34 {offsets = [6, 0], sizes = [16, 16], strides = [1, 1]} : vector<22x16xf32> to vector<16x16xf32>
      %102 = vector.broadcast %96 : f32 to vector<16x16xf32>
      %103 = arith.mulf %102, %101 : vector<16x16xf32>
      %104 = arith.addf %100, %103 : vector<16x16xf32>
      %105 = vector.extract_strided_slice %29 {offsets = [0, 1], sizes = [22, 16], strides = [1, 1]} : vector<22x22xf32> to vector<22x16xf32>
      %106 = vector.extract_strided_slice %31 {offsets = [0, 1], sizes = [22, 16], strides = [1, 1]} : vector<22x22xf32> to vector<22x16xf32>
      %c1_36 = arith.constant 1 : index
      %107 = memref.load %arg3[%c1_36] : memref<98xf32, #tpu.memory_space<smem>>
      %c50 = arith.constant 50 : index
      %108 = memref.load %arg3[%c50] : memref<98xf32, #tpu.memory_space<smem>>
      %109 = vector.extract_strided_slice %105 {offsets = [0, 0], sizes = [16, 16], strides = [1, 1]} : vector<22x16xf32> to vector<16x16xf32>
      %110 = vector.broadcast %107 : f32 to vector<16x16xf32>
      %111 = arith.mulf %110, %109 : vector<16x16xf32>
      %112 = arith.addf %104, %111 : vector<16x16xf32>
      %113 = vector.extract_strided_slice %106 {offsets = [0, 0], sizes = [16, 16], strides = [1, 1]} : vector<22x16xf32> to vector<16x16xf32>
      %114 = vector.broadcast %108 : f32 to vector<16x16xf32>
      %115 = arith.mulf %114, %113 : vector<16x16xf32>
      %116 = arith.addf %112, %115 : vector<16x16xf32>
      %c8 = arith.constant 8 : index
      %117 = memref.load %arg3[%c8] : memref<98xf32, #tpu.memory_space<smem>>
      %c57 = arith.constant 57 : index
      %118 = memref.load %arg3[%c57] : memref<98xf32, #tpu.memory_space<smem>>
      %119 = vector.extract_strided_slice %105 {offsets = [1, 0], sizes = [16, 16], strides = [1, 1]} : vector<22x16xf32> to vector<16x16xf32>
      %120 = vector.broadcast %117 : f32 to vector<16x16xf32>
      %121 = arith.mulf %120, %119 : vector<16x16xf32>
      %122 = arith.addf %116, %121 : vector<16x16xf32>
      %123 = vector.extract_strided_slice %106 {offsets = [1, 0], sizes = [16, 16], strides = [1, 1]} : vector<22x16xf32> to vector<16x16xf32>
      %124 = vector.broadcast %118 : f32 to vector<16x16xf32>
      %125 = arith.mulf %124, %123 : vector<16x16xf32>
      %126 = arith.addf %122, %125 : vector<16x16xf32>
      %c15 = arith.constant 15 : index
      %127 = memref.load %arg3[%c15] : memref<98xf32, #tpu.memory_space<smem>>
      %c64 = arith.constant 64 : index
      %128 = memref.load %arg3[%c64] : memref<98xf32, #tpu.memory_space<smem>>
      %129 = vector.extract_strided_slice %105 {offsets = [2, 0], sizes = [16, 16], strides = [1, 1]} : vector<22x16xf32> to vector<16x16xf32>
      %130 = vector.broadcast %127 : f32 to vector<16x16xf32>
      %131 = arith.mulf %130, %129 : vector<16x16xf32>
      %132 = arith.addf %126, %131 : vector<16x16xf32>
      %133 = vector.extract_strided_slice %106 {offsets = [2, 0], sizes = [16, 16], strides = [1, 1]} : vector<22x16xf32> to vector<16x16xf32>
      %134 = vector.broadcast %128 : f32 to vector<16x16xf32>
      %135 = arith.mulf %134, %133 : vector<16x16xf32>
      %136 = arith.addf %132, %135 : vector<16x16xf32>
      %c22 = arith.constant 22 : index
      %137 = memref.load %arg3[%c22] : memref<98xf32, #tpu.memory_space<smem>>
      %c71 = arith.constant 71 : index
      %138 = memref.load %arg3[%c71] : memref<98xf32, #tpu.memory_space<smem>>
      %139 = vector.extract_strided_slice %105 {offsets = [3, 0], sizes = [16, 16], strides = [1, 1]} : vector<22x16xf32> to vector<16x16xf32>
      %140 = vector.broadcast %137 : f32 to vector<16x16xf32>
      %141 = arith.mulf %140, %139 : vector<16x16xf32>
      %142 = arith.addf %136, %141 : vector<16x16xf32>
      %143 = vector.extract_strided_slice %106 {offsets = [3, 0], sizes = [16, 16], strides = [1, 1]} : vector<22x16xf32> to vector<16x16xf32>
      %144 = vector.broadcast %138 : f32 to vector<16x16xf32>
      %145 = arith.mulf %144, %143 : vector<16x16xf32>
      %146 = arith.addf %142, %145 : vector<16x16xf32>
      %c29 = arith.constant 29 : index
      %147 = memref.load %arg3[%c29] : memref<98xf32, #tpu.memory_space<smem>>
      %c78 = arith.constant 78 : index
      %148 = memref.load %arg3[%c78] : memref<98xf32, #tpu.memory_space<smem>>
      %149 = vector.extract_strided_slice %105 {offsets = [4, 0], sizes = [16, 16], strides = [1, 1]} : vector<22x16xf32> to vector<16x16xf32>
      %150 = vector.broadcast %147 : f32 to vector<16x16xf32>
      %151 = arith.mulf %150, %149 : vector<16x16xf32>
      %152 = arith.addf %146, %151 : vector<16x16xf32>
      %153 = vector.extract_strided_slice %106 {offsets = [4, 0], sizes = [16, 16], strides = [1, 1]} : vector<22x16xf32> to vector<16x16xf32>
      %154 = vector.broadcast %148 : f32 to vector<16x16xf32>
      %155 = arith.mulf %154, %153 : vector<16x16xf32>
      %156 = arith.addf %152, %155 : vector<16x16xf32>
      %c36 = arith.constant 36 : index
      %157 = memref.load %arg3[%c36] : memref<98xf32, #tpu.memory_space<smem>>
      %c85 = arith.constant 85 : index
      %158 = memref.load %arg3[%c85] : memref<98xf32, #tpu.memory_space<smem>>
      %159 = vector.extract_strided_slice %105 {offsets = [5, 0], sizes = [16, 16], strides = [1, 1]} : vector<22x16xf32> to vector<16x16xf32>
      %160 = vector.broadcast %157 : f32 to vector<16x16xf32>
      %161 = arith.mulf %160, %159 : vector<16x16xf32>
      %162 = arith.addf %156, %161 : vector<16x16xf32>
      %163 = vector.extract_strided_slice %106 {offsets = [5, 0], sizes = [16, 16], strides = [1, 1]} : vector<22x16xf32> to vector<16x16xf32>
      %164 = vector.broadcast %158 : f32 to vector<16x16xf32>
      %165 = arith.mulf %164, %163 : vector<16x16xf32>
      %166 = arith.addf %162, %165 : vector<16x16xf32>
      %c43 = arith.constant 43 : index
      %167 = memref.load %arg3[%c43] : memref<98xf32, #tpu.memory_space<smem>>
      %c92 = arith.constant 92 : index
      %168 = memref.load %arg3[%c92] : memref<98xf32, #tpu.memory_space<smem>>
      %169 = vector.extract_strided_slice %105 {offsets = [6, 0], sizes = [16, 16], strides = [1, 1]} : vector<22x16xf32> to vector<16x16xf32>
      %170 = vector.broadcast %167 : f32 to vector<16x16xf32>
      %171 = arith.mulf %170, %169 : vector<16x16xf32>
      %172 = arith.addf %166, %171 : vector<16x16xf32>
      %173 = vector.extract_strided_slice %106 {offsets = [6, 0], sizes = [16, 16], strides = [1, 1]} : vector<22x16xf32> to vector<16x16xf32>
      %174 = vector.broadcast %168 : f32 to vector<16x16xf32>
      %175 = arith.mulf %174, %173 : vector<16x16xf32>
      %176 = arith.addf %172, %175 : vector<16x16xf32>
      %177 = vector.extract_strided_slice %29 {offsets = [0, 2], sizes = [22, 16], strides = [1, 1]} : vector<22x22xf32> to vector<22x16xf32>
      %178 = vector.extract_strided_slice %31 {offsets = [0, 2], sizes = [22, 16], strides = [1, 1]} : vector<22x22xf32> to vector<22x16xf32>
      %c2 = arith.constant 2 : index
      %179 = memref.load %arg3[%c2] : memref<98xf32, #tpu.memory_space<smem>>
      %c51 = arith.constant 51 : index
      %180 = memref.load %arg3[%c51] : memref<98xf32, #tpu.memory_space<smem>>
      %181 = vector.extract_strided_slice %177 {offsets = [0, 0], sizes = [16, 16], strides = [1, 1]} : vector<22x16xf32> to vector<16x16xf32>
      %182 = vector.broadcast %179 : f32 to vector<16x16xf32>
      %183 = arith.mulf %182, %181 : vector<16x16xf32>
      %184 = arith.addf %176, %183 : vector<16x16xf32>
      %185 = vector.extract_strided_slice %178 {offsets = [0, 0], sizes = [16, 16], strides = [1, 1]} : vector<22x16xf32> to vector<16x16xf32>
      %186 = vector.broadcast %180 : f32 to vector<16x16xf32>
      %187 = arith.mulf %186, %185 : vector<16x16xf32>
      %188 = arith.addf %184, %187 : vector<16x16xf32>
      %c9 = arith.constant 9 : index
      %189 = memref.load %arg3[%c9] : memref<98xf32, #tpu.memory_space<smem>>
      %c58 = arith.constant 58 : index
      %190 = memref.load %arg3[%c58] : memref<98xf32, #tpu.memory_space<smem>>
      %191 = vector.extract_strided_slice %177 {offsets = [1, 0], sizes = [16, 16], strides = [1, 1]} : vector<22x16xf32> to vector<16x16xf32>
      %192 = vector.broadcast %189 : f32 to vector<16x16xf32>
      %193 = arith.mulf %192, %191 : vector<16x16xf32>
      %194 = arith.addf %188, %193 : vector<16x16xf32>
      %195 = vector.extract_strided_slice %178 {offsets = [1, 0], sizes = [16, 16], strides = [1, 1]} : vector<22x16xf32> to vector<16x16xf32>
      %196 = vector.broadcast %190 : f32 to vector<16x16xf32>
      %197 = arith.mulf %196, %195 : vector<16x16xf32>
      %198 = arith.addf %194, %197 : vector<16x16xf32>
      %c16 = arith.constant 16 : index
      %199 = memref.load %arg3[%c16] : memref<98xf32, #tpu.memory_space<smem>>
      %c65 = arith.constant 65 : index
      %200 = memref.load %arg3[%c65] : memref<98xf32, #tpu.memory_space<smem>>
      %201 = vector.extract_strided_slice %177 {offsets = [2, 0], sizes = [16, 16], strides = [1, 1]} : vector<22x16xf32> to vector<16x16xf32>
      %202 = vector.broadcast %199 : f32 to vector<16x16xf32>
      %203 = arith.mulf %202, %201 : vector<16x16xf32>
      %204 = arith.addf %198, %203 : vector<16x16xf32>
      %205 = vector.extract_strided_slice %178 {offsets = [2, 0], sizes = [16, 16], strides = [1, 1]} : vector<22x16xf32> to vector<16x16xf32>
      %206 = vector.broadcast %200 : f32 to vector<16x16xf32>
      %207 = arith.mulf %206, %205 : vector<16x16xf32>
      %208 = arith.addf %204, %207 : vector<16x16xf32>
      %c23 = arith.constant 23 : index
      %209 = memref.load %arg3[%c23] : memref<98xf32, #tpu.memory_space<smem>>
      %c72 = arith.constant 72 : index
      %210 = memref.load %arg3[%c72] : memref<98xf32, #tpu.memory_space<smem>>
      %211 = vector.extract_strided_slice %177 {offsets = [3, 0], sizes = [16, 16], strides = [1, 1]} : vector<22x16xf32> to vector<16x16xf32>
      %212 = vector.broadcast %209 : f32 to vector<16x16xf32>
      %213 = arith.mulf %212, %211 : vector<16x16xf32>
      %214 = arith.addf %208, %213 : vector<16x16xf32>
      %215 = vector.extract_strided_slice %178 {offsets = [3, 0], sizes = [16, 16], strides = [1, 1]} : vector<22x16xf32> to vector<16x16xf32>
      %216 = vector.broadcast %210 : f32 to vector<16x16xf32>
      %217 = arith.mulf %216, %215 : vector<16x16xf32>
      %218 = arith.addf %214, %217 : vector<16x16xf32>
      %c30 = arith.constant 30 : index
      %219 = memref.load %arg3[%c30] : memref<98xf32, #tpu.memory_space<smem>>
      %c79 = arith.constant 79 : index
      %220 = memref.load %arg3[%c79] : memref<98xf32, #tpu.memory_space<smem>>
      %221 = vector.extract_strided_slice %177 {offsets = [4, 0], sizes = [16, 16], strides = [1, 1]} : vector<22x16xf32> to vector<16x16xf32>
      %222 = vector.broadcast %219 : f32 to vector<16x16xf32>
      %223 = arith.mulf %222, %221 : vector<16x16xf32>
      %224 = arith.addf %218, %223 : vector<16x16xf32>
      %225 = vector.extract_strided_slice %178 {offsets = [4, 0], sizes = [16, 16], strides = [1, 1]} : vector<22x16xf32> to vector<16x16xf32>
      %226 = vector.broadcast %220 : f32 to vector<16x16xf32>
      %227 = arith.mulf %226, %225 : vector<16x16xf32>
      %228 = arith.addf %224, %227 : vector<16x16xf32>
      %c37 = arith.constant 37 : index
      %229 = memref.load %arg3[%c37] : memref<98xf32, #tpu.memory_space<smem>>
      %c86 = arith.constant 86 : index
      %230 = memref.load %arg3[%c86] : memref<98xf32, #tpu.memory_space<smem>>
      %231 = vector.extract_strided_slice %177 {offsets = [5, 0], sizes = [16, 16], strides = [1, 1]} : vector<22x16xf32> to vector<16x16xf32>
      %232 = vector.broadcast %229 : f32 to vector<16x16xf32>
      %233 = arith.mulf %232, %231 : vector<16x16xf32>
      %234 = arith.addf %228, %233 : vector<16x16xf32>
      %235 = vector.extract_strided_slice %178 {offsets = [5, 0], sizes = [16, 16], strides = [1, 1]} : vector<22x16xf32> to vector<16x16xf32>
      %236 = vector.broadcast %230 : f32 to vector<16x16xf32>
      %237 = arith.mulf %236, %235 : vector<16x16xf32>
      %238 = arith.addf %234, %237 : vector<16x16xf32>
      %c44 = arith.constant 44 : index
      %239 = memref.load %arg3[%c44] : memref<98xf32, #tpu.memory_space<smem>>
      %c93 = arith.constant 93 : index
      %240 = memref.load %arg3[%c93] : memref<98xf32, #tpu.memory_space<smem>>
      %241 = vector.extract_strided_slice %177 {offsets = [6, 0], sizes = [16, 16], strides = [1, 1]} : vector<22x16xf32> to vector<16x16xf32>
      %242 = vector.broadcast %239 : f32 to vector<16x16xf32>
      %243 = arith.mulf %242, %241 : vector<16x16xf32>
      %244 = arith.addf %238, %243 : vector<16x16xf32>
      %245 = vector.extract_strided_slice %178 {offsets = [6, 0], sizes = [16, 16], strides = [1, 1]} : vector<22x16xf32> to vector<16x16xf32>
      %246 = vector.broadcast %240 : f32 to vector<16x16xf32>
      %247 = arith.mulf %246, %245 : vector<16x16xf32>
      %248 = arith.addf %244, %247 : vector<16x16xf32>
      %249 = vector.extract_strided_slice %29 {offsets = [0, 3], sizes = [22, 16], strides = [1, 1]} : vector<22x22xf32> to vector<22x16xf32>
      %250 = vector.extract_strided_slice %31 {offsets = [0, 3], sizes = [22, 16], strides = [1, 1]} : vector<22x22xf32> to vector<22x16xf32>
      %c3_37 = arith.constant 3 : index
      %251 = memref.load %arg3[%c3_37] : memref<98xf32, #tpu.memory_space<smem>>
      %c52 = arith.constant 52 : index
      %252 = memref.load %arg3[%c52] : memref<98xf32, #tpu.memory_space<smem>>
      %253 = vector.extract_strided_slice %249 {offsets = [0, 0], sizes = [16, 16], strides = [1, 1]} : vector<22x16xf32> to vector<16x16xf32>
      %254 = vector.broadcast %251 : f32 to vector<16x16xf32>
      %255 = arith.mulf %254, %253 : vector<16x16xf32>
      %256 = arith.addf %248, %255 : vector<16x16xf32>
      %257 = vector.extract_strided_slice %250 {offsets = [0, 0], sizes = [16, 16], strides = [1, 1]} : vector<22x16xf32> to vector<16x16xf32>
      %258 = vector.broadcast %252 : f32 to vector<16x16xf32>
      %259 = arith.mulf %258, %257 : vector<16x16xf32>
      %260 = arith.addf %256, %259 : vector<16x16xf32>
      %c10 = arith.constant 10 : index
      %261 = memref.load %arg3[%c10] : memref<98xf32, #tpu.memory_space<smem>>
      %c59 = arith.constant 59 : index
      %262 = memref.load %arg3[%c59] : memref<98xf32, #tpu.memory_space<smem>>
      %263 = vector.extract_strided_slice %249 {offsets = [1, 0], sizes = [16, 16], strides = [1, 1]} : vector<22x16xf32> to vector<16x16xf32>
      %264 = vector.broadcast %261 : f32 to vector<16x16xf32>
      %265 = arith.mulf %264, %263 : vector<16x16xf32>
      %266 = arith.addf %260, %265 : vector<16x16xf32>
      %267 = vector.extract_strided_slice %250 {offsets = [1, 0], sizes = [16, 16], strides = [1, 1]} : vector<22x16xf32> to vector<16x16xf32>
      %268 = vector.broadcast %262 : f32 to vector<16x16xf32>
      %269 = arith.mulf %268, %267 : vector<16x16xf32>
      %270 = arith.addf %266, %269 : vector<16x16xf32>
      %c17 = arith.constant 17 : index
      %271 = memref.load %arg3[%c17] : memref<98xf32, #tpu.memory_space<smem>>
      %c66 = arith.constant 66 : index
      %272 = memref.load %arg3[%c66] : memref<98xf32, #tpu.memory_space<smem>>
      %273 = vector.extract_strided_slice %249 {offsets = [2, 0], sizes = [16, 16], strides = [1, 1]} : vector<22x16xf32> to vector<16x16xf32>
      %274 = vector.broadcast %271 : f32 to vector<16x16xf32>
      %275 = arith.mulf %274, %273 : vector<16x16xf32>
      %276 = arith.addf %270, %275 : vector<16x16xf32>
      %277 = vector.extract_strided_slice %250 {offsets = [2, 0], sizes = [16, 16], strides = [1, 1]} : vector<22x16xf32> to vector<16x16xf32>
      %278 = vector.broadcast %272 : f32 to vector<16x16xf32>
      %279 = arith.mulf %278, %277 : vector<16x16xf32>
      %280 = arith.addf %276, %279 : vector<16x16xf32>
      %c24 = arith.constant 24 : index
      %281 = memref.load %arg3[%c24] : memref<98xf32, #tpu.memory_space<smem>>
      %c73 = arith.constant 73 : index
      %282 = memref.load %arg3[%c73] : memref<98xf32, #tpu.memory_space<smem>>
      %283 = vector.extract_strided_slice %249 {offsets = [3, 0], sizes = [16, 16], strides = [1, 1]} : vector<22x16xf32> to vector<16x16xf32>
      %284 = vector.broadcast %281 : f32 to vector<16x16xf32>
      %285 = arith.mulf %284, %283 : vector<16x16xf32>
      %286 = arith.addf %280, %285 : vector<16x16xf32>
      %287 = vector.extract_strided_slice %250 {offsets = [3, 0], sizes = [16, 16], strides = [1, 1]} : vector<22x16xf32> to vector<16x16xf32>
      %288 = vector.broadcast %282 : f32 to vector<16x16xf32>
      %289 = arith.mulf %288, %287 : vector<16x16xf32>
      %290 = arith.addf %286, %289 : vector<16x16xf32>
      %c31 = arith.constant 31 : index
      %291 = memref.load %arg3[%c31] : memref<98xf32, #tpu.memory_space<smem>>
      %c80 = arith.constant 80 : index
      %292 = memref.load %arg3[%c80] : memref<98xf32, #tpu.memory_space<smem>>
      %293 = vector.extract_strided_slice %249 {offsets = [4, 0], sizes = [16, 16], strides = [1, 1]} : vector<22x16xf32> to vector<16x16xf32>
      %294 = vector.broadcast %291 : f32 to vector<16x16xf32>
      %295 = arith.mulf %294, %293 : vector<16x16xf32>
      %296 = arith.addf %290, %295 : vector<16x16xf32>
      %297 = vector.extract_strided_slice %250 {offsets = [4, 0], sizes = [16, 16], strides = [1, 1]} : vector<22x16xf32> to vector<16x16xf32>
      %298 = vector.broadcast %292 : f32 to vector<16x16xf32>
      %299 = arith.mulf %298, %297 : vector<16x16xf32>
      %300 = arith.addf %296, %299 : vector<16x16xf32>
      %c38 = arith.constant 38 : index
      %301 = memref.load %arg3[%c38] : memref<98xf32, #tpu.memory_space<smem>>
      %c87 = arith.constant 87 : index
      %302 = memref.load %arg3[%c87] : memref<98xf32, #tpu.memory_space<smem>>
      %303 = vector.extract_strided_slice %249 {offsets = [5, 0], sizes = [16, 16], strides = [1, 1]} : vector<22x16xf32> to vector<16x16xf32>
      %304 = vector.broadcast %301 : f32 to vector<16x16xf32>
      %305 = arith.mulf %304, %303 : vector<16x16xf32>
      %306 = arith.addf %300, %305 : vector<16x16xf32>
      %307 = vector.extract_strided_slice %250 {offsets = [5, 0], sizes = [16, 16], strides = [1, 1]} : vector<22x16xf32> to vector<16x16xf32>
      %308 = vector.broadcast %302 : f32 to vector<16x16xf32>
      %309 = arith.mulf %308, %307 : vector<16x16xf32>
      %310 = arith.addf %306, %309 : vector<16x16xf32>
      %c45 = arith.constant 45 : index
      %311 = memref.load %arg3[%c45] : memref<98xf32, #tpu.memory_space<smem>>
      %c94 = arith.constant 94 : index
      %312 = memref.load %arg3[%c94] : memref<98xf32, #tpu.memory_space<smem>>
      %313 = vector.extract_strided_slice %249 {offsets = [6, 0], sizes = [16, 16], strides = [1, 1]} : vector<22x16xf32> to vector<16x16xf32>
      %314 = vector.broadcast %311 : f32 to vector<16x16xf32>
      %315 = arith.mulf %314, %313 : vector<16x16xf32>
      %316 = arith.addf %310, %315 : vector<16x16xf32>
      %317 = vector.extract_strided_slice %250 {offsets = [6, 0], sizes = [16, 16], strides = [1, 1]} : vector<22x16xf32> to vector<16x16xf32>
      %318 = vector.broadcast %312 : f32 to vector<16x16xf32>
      %319 = arith.mulf %318, %317 : vector<16x16xf32>
      %320 = arith.addf %316, %319 : vector<16x16xf32>
      %321 = vector.extract_strided_slice %29 {offsets = [0, 4], sizes = [22, 16], strides = [1, 1]} : vector<22x22xf32> to vector<22x16xf32>
      %322 = vector.extract_strided_slice %31 {offsets = [0, 4], sizes = [22, 16], strides = [1, 1]} : vector<22x22xf32> to vector<22x16xf32>
      %c4 = arith.constant 4 : index
      %323 = memref.load %arg3[%c4] : memref<98xf32, #tpu.memory_space<smem>>
      %c53 = arith.constant 53 : index
      %324 = memref.load %arg3[%c53] : memref<98xf32, #tpu.memory_space<smem>>
      %325 = vector.extract_strided_slice %321 {offsets = [0, 0], sizes = [16, 16], strides = [1, 1]} : vector<22x16xf32> to vector<16x16xf32>
      %326 = vector.broadcast %323 : f32 to vector<16x16xf32>
      %327 = arith.mulf %326, %325 : vector<16x16xf32>
      %328 = arith.addf %320, %327 : vector<16x16xf32>
      %329 = vector.extract_strided_slice %322 {offsets = [0, 0], sizes = [16, 16], strides = [1, 1]} : vector<22x16xf32> to vector<16x16xf32>
      %330 = vector.broadcast %324 : f32 to vector<16x16xf32>
      %331 = arith.mulf %330, %329 : vector<16x16xf32>
      %332 = arith.addf %328, %331 : vector<16x16xf32>
      %c11 = arith.constant 11 : index
      %333 = memref.load %arg3[%c11] : memref<98xf32, #tpu.memory_space<smem>>
      %c60 = arith.constant 60 : index
      %334 = memref.load %arg3[%c60] : memref<98xf32, #tpu.memory_space<smem>>
      %335 = vector.extract_strided_slice %321 {offsets = [1, 0], sizes = [16, 16], strides = [1, 1]} : vector<22x16xf32> to vector<16x16xf32>
      %336 = vector.broadcast %333 : f32 to vector<16x16xf32>
      %337 = arith.mulf %336, %335 : vector<16x16xf32>
      %338 = arith.addf %332, %337 : vector<16x16xf32>
      %339 = vector.extract_strided_slice %322 {offsets = [1, 0], sizes = [16, 16], strides = [1, 1]} : vector<22x16xf32> to vector<16x16xf32>
      %340 = vector.broadcast %334 : f32 to vector<16x16xf32>
      %341 = arith.mulf %340, %339 : vector<16x16xf32>
      %342 = arith.addf %338, %341 : vector<16x16xf32>
      %c18 = arith.constant 18 : index
      %343 = memref.load %arg3[%c18] : memref<98xf32, #tpu.memory_space<smem>>
      %c67 = arith.constant 67 : index
      %344 = memref.load %arg3[%c67] : memref<98xf32, #tpu.memory_space<smem>>
      %345 = vector.extract_strided_slice %321 {offsets = [2, 0], sizes = [16, 16], strides = [1, 1]} : vector<22x16xf32> to vector<16x16xf32>
      %346 = vector.broadcast %343 : f32 to vector<16x16xf32>
      %347 = arith.mulf %346, %345 : vector<16x16xf32>
      %348 = arith.addf %342, %347 : vector<16x16xf32>
      %349 = vector.extract_strided_slice %322 {offsets = [2, 0], sizes = [16, 16], strides = [1, 1]} : vector<22x16xf32> to vector<16x16xf32>
      %350 = vector.broadcast %344 : f32 to vector<16x16xf32>
      %351 = arith.mulf %350, %349 : vector<16x16xf32>
      %352 = arith.addf %348, %351 : vector<16x16xf32>
      %c25 = arith.constant 25 : index
      %353 = memref.load %arg3[%c25] : memref<98xf32, #tpu.memory_space<smem>>
      %c74 = arith.constant 74 : index
      %354 = memref.load %arg3[%c74] : memref<98xf32, #tpu.memory_space<smem>>
      %355 = vector.extract_strided_slice %321 {offsets = [3, 0], sizes = [16, 16], strides = [1, 1]} : vector<22x16xf32> to vector<16x16xf32>
      %356 = vector.broadcast %353 : f32 to vector<16x16xf32>
      %357 = arith.mulf %356, %355 : vector<16x16xf32>
      %358 = arith.addf %352, %357 : vector<16x16xf32>
      %359 = vector.extract_strided_slice %322 {offsets = [3, 0], sizes = [16, 16], strides = [1, 1]} : vector<22x16xf32> to vector<16x16xf32>
      %360 = vector.broadcast %354 : f32 to vector<16x16xf32>
      %361 = arith.mulf %360, %359 : vector<16x16xf32>
      %362 = arith.addf %358, %361 : vector<16x16xf32>
      %c32 = arith.constant 32 : index
      %363 = memref.load %arg3[%c32] : memref<98xf32, #tpu.memory_space<smem>>
      %c81 = arith.constant 81 : index
      %364 = memref.load %arg3[%c81] : memref<98xf32, #tpu.memory_space<smem>>
      %365 = vector.extract_strided_slice %321 {offsets = [4, 0], sizes = [16, 16], strides = [1, 1]} : vector<22x16xf32> to vector<16x16xf32>
      %366 = vector.broadcast %363 : f32 to vector<16x16xf32>
      %367 = arith.mulf %366, %365 : vector<16x16xf32>
      %368 = arith.addf %362, %367 : vector<16x16xf32>
      %369 = vector.extract_strided_slice %322 {offsets = [4, 0], sizes = [16, 16], strides = [1, 1]} : vector<22x16xf32> to vector<16x16xf32>
      %370 = vector.broadcast %364 : f32 to vector<16x16xf32>
      %371 = arith.mulf %370, %369 : vector<16x16xf32>
      %372 = arith.addf %368, %371 : vector<16x16xf32>
      %c39 = arith.constant 39 : index
      %373 = memref.load %arg3[%c39] : memref<98xf32, #tpu.memory_space<smem>>
      %c88 = arith.constant 88 : index
      %374 = memref.load %arg3[%c88] : memref<98xf32, #tpu.memory_space<smem>>
      %375 = vector.extract_strided_slice %321 {offsets = [5, 0], sizes = [16, 16], strides = [1, 1]} : vector<22x16xf32> to vector<16x16xf32>
      %376 = vector.broadcast %373 : f32 to vector<16x16xf32>
      %377 = arith.mulf %376, %375 : vector<16x16xf32>
      %378 = arith.addf %372, %377 : vector<16x16xf32>
      %379 = vector.extract_strided_slice %322 {offsets = [5, 0], sizes = [16, 16], strides = [1, 1]} : vector<22x16xf32> to vector<16x16xf32>
      %380 = vector.broadcast %374 : f32 to vector<16x16xf32>
      %381 = arith.mulf %380, %379 : vector<16x16xf32>
      %382 = arith.addf %378, %381 : vector<16x16xf32>
      %c46 = arith.constant 46 : index
      %383 = memref.load %arg3[%c46] : memref<98xf32, #tpu.memory_space<smem>>
      %c95 = arith.constant 95 : index
      %384 = memref.load %arg3[%c95] : memref<98xf32, #tpu.memory_space<smem>>
      %385 = vector.extract_strided_slice %321 {offsets = [6, 0], sizes = [16, 16], strides = [1, 1]} : vector<22x16xf32> to vector<16x16xf32>
      %386 = vector.broadcast %383 : f32 to vector<16x16xf32>
      %387 = arith.mulf %386, %385 : vector<16x16xf32>
      %388 = arith.addf %382, %387 : vector<16x16xf32>
      %389 = vector.extract_strided_slice %322 {offsets = [6, 0], sizes = [16, 16], strides = [1, 1]} : vector<22x16xf32> to vector<16x16xf32>
      %390 = vector.broadcast %384 : f32 to vector<16x16xf32>
      %391 = arith.mulf %390, %389 : vector<16x16xf32>
      %392 = arith.addf %388, %391 : vector<16x16xf32>
      %393 = vector.extract_strided_slice %29 {offsets = [0, 5], sizes = [22, 16], strides = [1, 1]} : vector<22x22xf32> to vector<22x16xf32>
      %394 = vector.extract_strided_slice %31 {offsets = [0, 5], sizes = [22, 16], strides = [1, 1]} : vector<22x22xf32> to vector<22x16xf32>
      %c5 = arith.constant 5 : index
      %395 = memref.load %arg3[%c5] : memref<98xf32, #tpu.memory_space<smem>>
      %c54 = arith.constant 54 : index
      %396 = memref.load %arg3[%c54] : memref<98xf32, #tpu.memory_space<smem>>
      %397 = vector.extract_strided_slice %393 {offsets = [0, 0], sizes = [16, 16], strides = [1, 1]} : vector<22x16xf32> to vector<16x16xf32>
      %398 = vector.broadcast %395 : f32 to vector<16x16xf32>
      %399 = arith.mulf %398, %397 : vector<16x16xf32>
      %400 = arith.addf %392, %399 : vector<16x16xf32>
      %401 = vector.extract_strided_slice %394 {offsets = [0, 0], sizes = [16, 16], strides = [1, 1]} : vector<22x16xf32> to vector<16x16xf32>
      %402 = vector.broadcast %396 : f32 to vector<16x16xf32>
      %403 = arith.mulf %402, %401 : vector<16x16xf32>
      %404 = arith.addf %400, %403 : vector<16x16xf32>
      %c12 = arith.constant 12 : index
      %405 = memref.load %arg3[%c12] : memref<98xf32, #tpu.memory_space<smem>>
      %c61 = arith.constant 61 : index
      %406 = memref.load %arg3[%c61] : memref<98xf32, #tpu.memory_space<smem>>
      %407 = vector.extract_strided_slice %393 {offsets = [1, 0], sizes = [16, 16], strides = [1, 1]} : vector<22x16xf32> to vector<16x16xf32>
      %408 = vector.broadcast %405 : f32 to vector<16x16xf32>
      %409 = arith.mulf %408, %407 : vector<16x16xf32>
      %410 = arith.addf %404, %409 : vector<16x16xf32>
      %411 = vector.extract_strided_slice %394 {offsets = [1, 0], sizes = [16, 16], strides = [1, 1]} : vector<22x16xf32> to vector<16x16xf32>
      %412 = vector.broadcast %406 : f32 to vector<16x16xf32>
      %413 = arith.mulf %412, %411 : vector<16x16xf32>
      %414 = arith.addf %410, %413 : vector<16x16xf32>
      %c19 = arith.constant 19 : index
      %415 = memref.load %arg3[%c19] : memref<98xf32, #tpu.memory_space<smem>>
      %c68 = arith.constant 68 : index
      %416 = memref.load %arg3[%c68] : memref<98xf32, #tpu.memory_space<smem>>
      %417 = vector.extract_strided_slice %393 {offsets = [2, 0], sizes = [16, 16], strides = [1, 1]} : vector<22x16xf32> to vector<16x16xf32>
      %418 = vector.broadcast %415 : f32 to vector<16x16xf32>
      %419 = arith.mulf %418, %417 : vector<16x16xf32>
      %420 = arith.addf %414, %419 : vector<16x16xf32>
      %421 = vector.extract_strided_slice %394 {offsets = [2, 0], sizes = [16, 16], strides = [1, 1]} : vector<22x16xf32> to vector<16x16xf32>
      %422 = vector.broadcast %416 : f32 to vector<16x16xf32>
      %423 = arith.mulf %422, %421 : vector<16x16xf32>
      %424 = arith.addf %420, %423 : vector<16x16xf32>
      %c26 = arith.constant 26 : index
      %425 = memref.load %arg3[%c26] : memref<98xf32, #tpu.memory_space<smem>>
      %c75 = arith.constant 75 : index
      %426 = memref.load %arg3[%c75] : memref<98xf32, #tpu.memory_space<smem>>
      %427 = vector.extract_strided_slice %393 {offsets = [3, 0], sizes = [16, 16], strides = [1, 1]} : vector<22x16xf32> to vector<16x16xf32>
      %428 = vector.broadcast %425 : f32 to vector<16x16xf32>
      %429 = arith.mulf %428, %427 : vector<16x16xf32>
      %430 = arith.addf %424, %429 : vector<16x16xf32>
      %431 = vector.extract_strided_slice %394 {offsets = [3, 0], sizes = [16, 16], strides = [1, 1]} : vector<22x16xf32> to vector<16x16xf32>
      %432 = vector.broadcast %426 : f32 to vector<16x16xf32>
      %433 = arith.mulf %432, %431 : vector<16x16xf32>
      %434 = arith.addf %430, %433 : vector<16x16xf32>
      %c33 = arith.constant 33 : index
      %435 = memref.load %arg3[%c33] : memref<98xf32, #tpu.memory_space<smem>>
      %c82 = arith.constant 82 : index
      %436 = memref.load %arg3[%c82] : memref<98xf32, #tpu.memory_space<smem>>
      %437 = vector.extract_strided_slice %393 {offsets = [4, 0], sizes = [16, 16], strides = [1, 1]} : vector<22x16xf32> to vector<16x16xf32>
      %438 = vector.broadcast %435 : f32 to vector<16x16xf32>
      %439 = arith.mulf %438, %437 : vector<16x16xf32>
      %440 = arith.addf %434, %439 : vector<16x16xf32>
      %441 = vector.extract_strided_slice %394 {offsets = [4, 0], sizes = [16, 16], strides = [1, 1]} : vector<22x16xf32> to vector<16x16xf32>
      %442 = vector.broadcast %436 : f32 to vector<16x16xf32>
      %443 = arith.mulf %442, %441 : vector<16x16xf32>
      %444 = arith.addf %440, %443 : vector<16x16xf32>
      %c40 = arith.constant 40 : index
      %445 = memref.load %arg3[%c40] : memref<98xf32, #tpu.memory_space<smem>>
      %c89 = arith.constant 89 : index
      %446 = memref.load %arg3[%c89] : memref<98xf32, #tpu.memory_space<smem>>
      %447 = vector.extract_strided_slice %393 {offsets = [5, 0], sizes = [16, 16], strides = [1, 1]} : vector<22x16xf32> to vector<16x16xf32>
      %448 = vector.broadcast %445 : f32 to vector<16x16xf32>
      %449 = arith.mulf %448, %447 : vector<16x16xf32>
      %450 = arith.addf %444, %449 : vector<16x16xf32>
      %451 = vector.extract_strided_slice %394 {offsets = [5, 0], sizes = [16, 16], strides = [1, 1]} : vector<22x16xf32> to vector<16x16xf32>
      %452 = vector.broadcast %446 : f32 to vector<16x16xf32>
      %453 = arith.mulf %452, %451 : vector<16x16xf32>
      %454 = arith.addf %450, %453 : vector<16x16xf32>
      %c47 = arith.constant 47 : index
      %455 = memref.load %arg3[%c47] : memref<98xf32, #tpu.memory_space<smem>>
      %c96 = arith.constant 96 : index
      %456 = memref.load %arg3[%c96] : memref<98xf32, #tpu.memory_space<smem>>
      %457 = vector.extract_strided_slice %393 {offsets = [6, 0], sizes = [16, 16], strides = [1, 1]} : vector<22x16xf32> to vector<16x16xf32>
      %458 = vector.broadcast %455 : f32 to vector<16x16xf32>
      %459 = arith.mulf %458, %457 : vector<16x16xf32>
      %460 = arith.addf %454, %459 : vector<16x16xf32>
      %461 = vector.extract_strided_slice %394 {offsets = [6, 0], sizes = [16, 16], strides = [1, 1]} : vector<22x16xf32> to vector<16x16xf32>
      %462 = vector.broadcast %456 : f32 to vector<16x16xf32>
      %463 = arith.mulf %462, %461 : vector<16x16xf32>
      %464 = arith.addf %460, %463 : vector<16x16xf32>
      %465 = vector.extract_strided_slice %29 {offsets = [0, 6], sizes = [22, 16], strides = [1, 1]} : vector<22x22xf32> to vector<22x16xf32>
      %466 = vector.extract_strided_slice %31 {offsets = [0, 6], sizes = [22, 16], strides = [1, 1]} : vector<22x22xf32> to vector<22x16xf32>
      %c6 = arith.constant 6 : index
      %467 = memref.load %arg3[%c6] : memref<98xf32, #tpu.memory_space<smem>>
      %c55 = arith.constant 55 : index
      %468 = memref.load %arg3[%c55] : memref<98xf32, #tpu.memory_space<smem>>
      %469 = vector.extract_strided_slice %465 {offsets = [0, 0], sizes = [16, 16], strides = [1, 1]} : vector<22x16xf32> to vector<16x16xf32>
      %470 = vector.broadcast %467 : f32 to vector<16x16xf32>
      %471 = arith.mulf %470, %469 : vector<16x16xf32>
      %472 = arith.addf %464, %471 : vector<16x16xf32>
      %473 = vector.extract_strided_slice %466 {offsets = [0, 0], sizes = [16, 16], strides = [1, 1]} : vector<22x16xf32> to vector<16x16xf32>
      %474 = vector.broadcast %468 : f32 to vector<16x16xf32>
      %475 = arith.mulf %474, %473 : vector<16x16xf32>
      %476 = arith.addf %472, %475 : vector<16x16xf32>
      %c13 = arith.constant 13 : index
      %477 = memref.load %arg3[%c13] : memref<98xf32, #tpu.memory_space<smem>>
      %c62 = arith.constant 62 : index
      %478 = memref.load %arg3[%c62] : memref<98xf32, #tpu.memory_space<smem>>
      %479 = vector.extract_strided_slice %465 {offsets = [1, 0], sizes = [16, 16], strides = [1, 1]} : vector<22x16xf32> to vector<16x16xf32>
      %480 = vector.broadcast %477 : f32 to vector<16x16xf32>
      %481 = arith.mulf %480, %479 : vector<16x16xf32>
      %482 = arith.addf %476, %481 : vector<16x16xf32>
      %483 = vector.extract_strided_slice %466 {offsets = [1, 0], sizes = [16, 16], strides = [1, 1]} : vector<22x16xf32> to vector<16x16xf32>
      %484 = vector.broadcast %478 : f32 to vector<16x16xf32>
      %485 = arith.mulf %484, %483 : vector<16x16xf32>
      %486 = arith.addf %482, %485 : vector<16x16xf32>
      %c20 = arith.constant 20 : index
      %487 = memref.load %arg3[%c20] : memref<98xf32, #tpu.memory_space<smem>>
      %c69 = arith.constant 69 : index
      %488 = memref.load %arg3[%c69] : memref<98xf32, #tpu.memory_space<smem>>
      %489 = vector.extract_strided_slice %465 {offsets = [2, 0], sizes = [16, 16], strides = [1, 1]} : vector<22x16xf32> to vector<16x16xf32>
      %490 = vector.broadcast %487 : f32 to vector<16x16xf32>
      %491 = arith.mulf %490, %489 : vector<16x16xf32>
      %492 = arith.addf %486, %491 : vector<16x16xf32>
      %493 = vector.extract_strided_slice %466 {offsets = [2, 0], sizes = [16, 16], strides = [1, 1]} : vector<22x16xf32> to vector<16x16xf32>
      %494 = vector.broadcast %488 : f32 to vector<16x16xf32>
      %495 = arith.mulf %494, %493 : vector<16x16xf32>
      %496 = arith.addf %492, %495 : vector<16x16xf32>
      %c27 = arith.constant 27 : index
      %497 = memref.load %arg3[%c27] : memref<98xf32, #tpu.memory_space<smem>>
      %c76 = arith.constant 76 : index
      %498 = memref.load %arg3[%c76] : memref<98xf32, #tpu.memory_space<smem>>
      %499 = vector.extract_strided_slice %465 {offsets = [3, 0], sizes = [16, 16], strides = [1, 1]} : vector<22x16xf32> to vector<16x16xf32>
      %500 = vector.broadcast %497 : f32 to vector<16x16xf32>
      %501 = arith.mulf %500, %499 : vector<16x16xf32>
      %502 = arith.addf %496, %501 : vector<16x16xf32>
      %503 = vector.extract_strided_slice %466 {offsets = [3, 0], sizes = [16, 16], strides = [1, 1]} : vector<22x16xf32> to vector<16x16xf32>
      %504 = vector.broadcast %498 : f32 to vector<16x16xf32>
      %505 = arith.mulf %504, %503 : vector<16x16xf32>
      %506 = arith.addf %502, %505 : vector<16x16xf32>
      %c34 = arith.constant 34 : index
      %507 = memref.load %arg3[%c34] : memref<98xf32, #tpu.memory_space<smem>>
      %c83 = arith.constant 83 : index
      %508 = memref.load %arg3[%c83] : memref<98xf32, #tpu.memory_space<smem>>
      %509 = vector.extract_strided_slice %465 {offsets = [4, 0], sizes = [16, 16], strides = [1, 1]} : vector<22x16xf32> to vector<16x16xf32>
      %510 = vector.broadcast %507 : f32 to vector<16x16xf32>
      %511 = arith.mulf %510, %509 : vector<16x16xf32>
      %512 = arith.addf %506, %511 : vector<16x16xf32>
      %513 = vector.extract_strided_slice %466 {offsets = [4, 0], sizes = [16, 16], strides = [1, 1]} : vector<22x16xf32> to vector<16x16xf32>
      %514 = vector.broadcast %508 : f32 to vector<16x16xf32>
      %515 = arith.mulf %514, %513 : vector<16x16xf32>
      %516 = arith.addf %512, %515 : vector<16x16xf32>
      %c41 = arith.constant 41 : index
      %517 = memref.load %arg3[%c41] : memref<98xf32, #tpu.memory_space<smem>>
      %c90 = arith.constant 90 : index
      %518 = memref.load %arg3[%c90] : memref<98xf32, #tpu.memory_space<smem>>
      %519 = vector.extract_strided_slice %465 {offsets = [5, 0], sizes = [16, 16], strides = [1, 1]} : vector<22x16xf32> to vector<16x16xf32>
      %520 = vector.broadcast %517 : f32 to vector<16x16xf32>
      %521 = arith.mulf %520, %519 : vector<16x16xf32>
      %522 = arith.addf %516, %521 : vector<16x16xf32>
      %523 = vector.extract_strided_slice %466 {offsets = [5, 0], sizes = [16, 16], strides = [1, 1]} : vector<22x16xf32> to vector<16x16xf32>
      %524 = vector.broadcast %518 : f32 to vector<16x16xf32>
      %525 = arith.mulf %524, %523 : vector<16x16xf32>
      %526 = arith.addf %522, %525 : vector<16x16xf32>
      %c48 = arith.constant 48 : index
      %527 = memref.load %arg3[%c48] : memref<98xf32, #tpu.memory_space<smem>>
      %c97 = arith.constant 97 : index
      %528 = memref.load %arg3[%c97] : memref<98xf32, #tpu.memory_space<smem>>
      %529 = vector.extract_strided_slice %465 {offsets = [6, 0], sizes = [16, 16], strides = [1, 1]} : vector<22x16xf32> to vector<16x16xf32>
      %530 = vector.broadcast %527 : f32 to vector<16x16xf32>
      %531 = arith.mulf %530, %529 : vector<16x16xf32>
      %532 = arith.addf %526, %531 : vector<16x16xf32>
      %533 = vector.extract_strided_slice %466 {offsets = [6, 0], sizes = [16, 16], strides = [1, 1]} : vector<22x16xf32> to vector<16x16xf32>
      %534 = vector.broadcast %528 : f32 to vector<16x16xf32>
      %535 = arith.mulf %534, %533 : vector<16x16xf32>
      %536 = arith.addf %532, %535 : vector<16x16xf32>
      %537 = arith.negf %536 : vector<16x16xf32>
      %538 = math.exp %537 : vector<16x16xf32>
      %cst_38 = arith.constant 1.000000e+00 : f32
      %539 = vector.broadcast %cst_38 : f32 to vector<16x16xf32>
      %540 = arith.addf %539, %538 : vector<16x16xf32>
      %541 = arith.divf %539, %540 : vector<16x16xf32>
      %c0_39 = arith.constant 0 : index
      %c0_40 = arith.constant 0 : index
      %c0_41 = arith.constant 0 : index
      %c0_42 = arith.constant 0 : index
      %542 = vector.load %arg4[%c0_39, %c0_40, %c0_41, %c0_42] : memref<1x1x16x16xf32, #tpu.memory_space<vmem>>, vector<1x1x16x16xf32>
      %543 = vector.shape_cast %542 : vector<1x1x16x16xf32> to vector<16x16xf32>
      %544 = vector.shape_cast %541 : vector<16x16xf32> to vector<1x1x16x16xf32>
      tpu.vector_store %arg4[%c0_39, %c0_40, %c0_41, %c0_42], %544 {strides = array<i32>} : memref<1x1x16x16xf32, #tpu.memory_space<vmem>>, vector<1x1x16x16xf32>,
    } else {
    }
    return
  }
  func.func @transform_0(%arg0: i32, %arg1: i32) -> (i32, i32, i32, i32) {
    %c0_i32 = arith.constant 0 : i32
    %c0_i32_0 = arith.constant 0 : i32
    %c0_i32_1 = arith.constant 0 : i32
    return %arg0, %arg1, %c0_i32, %c0_i32_0 : i32, i32, i32, i32
  }
  func.func @transform_1(%arg0: i32, %arg1: i32) -> i32 {
    %c0_i32 = arith.constant 0 : i32
    %c0_i32_0 = arith.constant 0 : i32
    return %c0_i32 : i32
  }
  func.func @transform_2(%arg0: i32, %arg1: i32) -> (i32, i32, i32, i32) {
    %c0_i32 = arith.constant 0 : i32
    %c0_i32_0 = arith.constant 0 : i32
    %c0_i32_1 = arith.constant 0 : i32
    %c0_i32_2 = arith.constant 0 : i32
    return %arg0, %c0_i32, %c0_i32_0, %c0_i32_1 : i32, i32, i32, i32
  }
}

</mosaic_0001>

<bundles_post_ra>
// kernel: tpu_custom_call.1
= control target key start
LH: loop header
LB: loop body
LE: loop exit
PB: predicated region body
PF: predicated region fallthrough
CT: control target
= control target key end

     0   :  { %s4145_s0 = inlined_call_operand.hbm [shape: f32[2,4,16,16], index: 0, kind: input, shape index: {}]   ;;  %s4146_s1 = inlined_call_operand.vmem [shape: f32[98], index: 1, kind: input, shape index: {}]   ;;  %s4147_s2 = inlined_call_operand.hbm [shape: f32[2,1,16,16], index: 2, kind: output, shape index: {}]  }
   0x1   :  { %4161 = sst [smem:[#allocation29_spill]] %s4145_s0 }
   0x2   :  { %4162 = sst [smem:[#allocation30_spill]] %s4146_s1 }
   0x3   :  { %7 = vsyncpa [#allocation6], 0 }
   0x4   :  { %9 = vsyncpa [#allocation6 + $0x1], 0 }
   0x5   :  { %10 = vsyncpa [#allocation8], 0 }
   0x6   :  { %11 = vsyncpa [#allocation7], 0 }
   0x7   :  { %13 = vsyncpa [#allocation7 + $0x1], 0  ;;  %s2707_s9 = smov 0   ;;  %s2709_s10 = smov 0  }
   0x8   :  { %s2711_s11 = smov 0   ;;  %s2713_s12 = smov 0  }
   0x9   :  { %s2715_s13 = smov 0   ;;  %s2717_s14 = smov 0  }
   0xa LB: > { %4163 = sst [smem:[#allocation14_spill]] %s2662_s11  ;;  %s2323_s15 = sadd.s32 4294967295, %s2674_s14   ;;  %s2674_s14 = sphi %s2717_s14, %s19_s14   ;;  %s2670_s13 = sphi %s2715_s13, %s4221_s13   ;;  %s2666_s12 = sphi %s2713_s12, %s4220_s12   ;;  %s2662_s11 = sphi %s2711_s11, %s4219_s11   ;;  %s2658_s10 = sphi %s2709_s10, %s4223_s10   ;;  %s2654_s9 = sphi %s2707_s9, %s4222_s9  }
   0xb   : > { %4164 = sst [smem:[#allocation15_spill]] %s2670_s13  ;;  %s2324_s16 = sadd.s32 4294967294, %s2674_s14  }
   0xc   : > { %s40_s17 = sadd.s32 1, %s2662_s11  ;;  %p47_p0 = scmp.ne.s32.totalorder %s2662_s11, %s2658_s10 }
   0xd   : > { %p48_p1 = scmp.eq.s32.totalorder %s2674_s14, 0  ;;  %p53_p2 = scmp.ne.s32.totalorder %s2658_s10, %s2654_s9 }
   0xe   : > { %p2745_p3 = scmp.eq.s32.totalorder %s2323_s15, 0  ;;  %p98_p4 = scmp.eq.s32.totalorder %s2323_s15, 1 }
   0xf   : > { %p2749_p5 = por %p48_p1, %p47_p0  ;;  %p104_p6 = scmp.eq.s32.totalorder %s2324_s16, 1 }
  0x10   : > { %p2755_p7 = por %p2745_p3, %p53_p2  ;;  %p2759_p8 = por %p98_p4, %p47_p0 }
  0x11   : > { %p2763_p9 = por %p104_p6, %p53_p2  ;;  %p2325_p10 = scmp.ge.s32.totalorder %s2674_s14, 1 }
  0x12   : > { %s4168_s21 = scalar_select %p2759_p8, 1, 0 }
  0x13   : > { %s4169_s22 = scalar_select %p2763_p9, 1, 0 }
  0x14   : > { %p111_p11 = scmp.lt.s32.totalorder %s2674_s14, 3  ;;  %s4170_s1 = sld [smem:[#allocation30_spill]] }
  0x15   : > { %p2462_p0 = scmp.lt.s32.totalorder %s2674_s14, 2  ;;  %s31_s29 = sadd.s32 1, %s2670_s13 }
  0x16   : > { %p2772_p12 = pnand %p2325_p10, %p111_p11  ;;  %p2793_p6 = scmp.ge.s32.totalorder %s31_s29, 2 }
  0x17   : > { %p2782_p2 = pnand %p2462_p0, %p2749_p5  ;;  %s135_s3 = sand.u32 1, %s2662_s11  }
  0x18   : > { %p2449_p1 = pneg %p2772_p12 }
  0x1a   : > { %s124_s25 = sshll.u32 %s4170_s1, 4  ;;  %p2788_p4 = pnand %p2449_p1, %p2745_p3  ;;  %s125_s25 = int_to_ptr.vmem [resolvable:$true] %s124_s25 }
  0x1b   : > { %s2547_s4 = scalar_lea.vmem %s125_s25, 16  ;;  %p2555_p13 = scmp.lt.s32.totalorder %s125_s25, %s125_s25 }
  0x1c   : > { %p2548_p10 = scmp.ne.s32.totalorder %s125_s25, %s2547_s4  ;;  %p2549_p11 = pneg %p2788_p4 }
  0x1d   : > { %p2556_p9 = scmp.lt.s32.totalorder %s2547_s4, %s2547_s4 }
  0x1e   : > { %p2550_p5 = pnand %p2549_p11, %p2548_p10 }
  0x1f   : > { %p2557_p8 = por %p2556_p9, %p2555_p13 }
  0x20   : > { %p2551_p0 = pneg %p2550_p5 }
  0x22   : > { %p2558_p1 = pnand %p2557_p8, %p2551_p0 }
  0x24   : > { %2561 = shalt.err (!%p2558_p1)
}
  0x25   : > { %s2676_s5 = smov [#allocation9]   ;;  %s4225_s29 = smov (%p2793_p6, %s31_s29), 0 }
  0x26   : > { %2452 = dma.vmem_to_smem (!%p2788_p4), %s125_s25, 16, %s2676_s5, [#allocation8]  }
  0x27   : > { %4175 = sst [smem:[#allocation16_spill]] %s4225_s29  ;;  %s2328_s6 = sshll.u32 %s135_s3, 6 }
  0x28   : > { %s35_s7 = ssub.s32 %s2670_s13, %s4225_s29  ;;  %s2439_s8 = sshll.u32 %s2670_s13, 10 }
  0x29   : > { %p38_p10 = scmp.eq.s32.totalorder %s35_s7, 0  ;;  %s4176_s0 = sld [smem:[#allocation29_spill]] }
  0x2a   : > { %s139_s23 = scalar_lea.vmem [#allocation5], %s2328_s6  ;;  %s136_s4 = scalar_lea.sflag [#allocation6], %s135_s3 }
  0x2b   : > { %s149_s24 = sshll.u32 %s139_s23, 4  ;;  %p2564_p8 = pneg %p2782_p2  ;;  %s150_s24 = int_to_ptr.vmem [resolvable:$true] %s149_s24 }
  0x2c   : > { %s2815_s28 = scalar_select %p38_p10, %s2662_s11, %s40_s17  }
  0x2d   : > { %s2575_s25 = scalar_lea.vmem %s150_s24, 1024  ;;  %s2677_s30 = smov [#allocation5]  }
  0x2e   : > { %4177 = sst [smem:[#allocation17_spill]] %s2815_s28  ;;  %p2576_p9 = scmp.ne.s32.totalorder %s150_s24, %s2575_s25 }
  0x2f   : > { %s148_s19 = scalar_lea.hbm %s4176_s0, %s2439_s8  ;;  %s2580_s5 = sshll.u32 %s2677_s30, 4  ;;  %s2581_s5 = int_to_ptr.vmem [resolvable:$false] %s2580_s5 }
  0x30   : > { %p2578_p13 = pnand %p2576_p9, %p2564_p8  ;;  %s2582_s7 = scalar_lea.vmem %s2581_s5, 2048 }
  0x31   : > { %p2583_p6 = scmp.lt.s32.totalorder %s150_s24, %s2581_s5  ;;  %p2584_p11 = scmp.lt.s32.totalorder %s2582_s7, %s2575_s25 }
  0x32   : > { %p2579_p4 = pneg %p2578_p13 }
  0x33   : > { %p2585_p5 = por %p2584_p11, %p2583_p6 }
  0x35   : > { %p2586_p0 = pnand %p2585_p5, %p2579_p4 }
  0x37   : > { %2589 = shalt.err (!%p2586_p0)
}
  0x38   : > { %s2678_s6 = smov 128   ;;  %s2679_s17 = smov 8  }
  0x39   : > { %2456 = dma.hbm_to_vmem [thread:$0]  (!%p2782_p2), %s148_s19, 1024, %s150_s24, %s136_s4, %s2678_s6, %s2678_s6, %s2679_s17  }
  0x3a   : > { %161 = sbr.rel (%p2772_p12) target bundleno = 714 (0x2ca), region = 28 }
  0x3f   : > { %s2824_s3 = sand.u32 1, %s2658_s10  }
  0x40   : > { %s2332_s8 = sshll.u32 %s2824_s3, 6  ;;  %s164_s15 = scalar_lea.sflag [#allocation6], %s2824_s3 }
  0x41   : > { %s2828_s16 = scalar_lea.vmem [#allocation5], %s2332_s8 }
  0x42   : > { %2641 = dma.done.wait (%p2755_p7), %s164_s15, 1024  }
  0x43   : > { %2643 = vsyncadd (%p2755_p7), %s164_s15, 4294966272 }
  0x44   : > { %2645 = dma.done.wait (%p2745_p3), [#allocation8], 16  }
  0x45   : > { %2647 = vsyncadd (%p2745_p3), [#allocation8], 4294967280 }
  0x46   : > { %176 = sfence }
  0x47   : > { %vm198_vm0 = vcmask 130048   ;;  %v203_v0 = vld [vmem:[%s2828_s16] sm:$0xff]  ;;  %v205_v1 = vld [vmem:[%s2828_s16 + $0x10] sm:$0xff]  ;;  %v2680_v3 = vmov -inf   ;;  %v204_v9 = vld [vmem:[%s2828_s16 + $0x8] sm:$0xff]  ;;  %v2681_v17 = vmov 0.0  }
  0x48   : > { %v207_v2 = vld [vmem:[%s2828_s16 + $0x20] sm:$0xff]  ;;  %201 = vst.msk [vmem:[#allocation3] sm:$0xff] %vm198_vm0, %v2680_v3  ;;  %v209_v4 = vld [vmem:[%s2828_s16 + $0x30] sm:$0xff]  ;;  %v214_v5 = vsel %vm198_vm0, %v203_v0, 0.0  ;;  %v215_v6 = vsel %vm198_vm0, %v205_v1, 0.0  ;;  %v234_v7 = vsel %vm198_vm0, %v203_v0, -inf }
  0x49   : > { %v235_v8 = vsel %vm198_vm0, %v205_v1, -inf  ;;  %202 = vst.msk [vmem:[#allocation3 + $0x8] sm:$0xff] %vm198_vm0, %v2680_v3  ;;  %v236_v10 = vsel %vm198_vm0, %v207_v2, -inf  ;;  %v238_v11 = vsel %vm198_vm0, %v209_v4, -inf  ;;  %v216_v12 = vadd.f32 %v215_v6, %v214_v5  ;;  %v206_v13 = vld [vmem:[%s2828_s16 + $0x18] sm:$0xff]  ;;  %v208_v14 = vld [vmem:[%s2828_s16 + $0x28] sm:$0xff] }
  0x4a   : > { %v237_v15 = vmax.f32 %v234_v7, %v236_v10  ;;  %v239_v16 = vmax.f32 %v235_v8, %v238_v11  ;;  %199 = vst.msk [vmem:[#allocation2] sm:$0xff] %vm198_vm0, %v2681_v17  ;;  %v217_v18 = vsel %vm198_vm0, %v207_v2, 0.0  ;;  %v219_v19 = vsel %vm198_vm0, %v209_v4, 0.0  ;;  %200 = vst.msk [vmem:[#allocation2 + $0x8] sm:$0xff] %vm198_vm0, %v2681_v17  ;;  %v210_v20 = vld [vmem:[%s2828_s16 + $0x38] sm:$0xff]  ;;  %s2682_s18 = smov 3  }
  0x4b   : > { %v218_v21 = vadd.f32 %v217_v18, %v216_v12  ;;  %v221_v22 = vsel %vm198_vm0, %v204_v9, 0.0  ;;  %v222_v23 = vsel %vm198_vm0, %v206_v13, 0.0  ;;  %v224_v24 = vsel %vm198_vm0, %v208_v14, 0.0  ;;  %s2349_s20 = sld [smem:[#allocation9 + $0x32]]  ;;  %s2683_s23 = smov 127  }
  0x4c   : > { %v240_v25 = vmax.f32 %v237_v15, %v239_v16  ;;  %v223_v26 = vadd.f32 %v222_v23, %v221_v22  ;;  %v241_v27 = vsel %vm198_vm0, %v204_v9, -inf  ;;  %v242_v28 = vsel %vm198_vm0, %v206_v13, -inf  ;;  %s2363_s26 = sld [smem:[#allocation9 + $0x33]]  ;;  %s4152_s4 = smov 126  }
  0x4d   : > { %v220_v29 = vadd.f32 %v219_v19, %v218_v21  ;;  %v243_v30 = vsel %vm198_vm0, %v208_v14, -inf  ;;  %v245_v31 = vsel %vm198_vm0, %v210_v20, -inf  ;;  %v226_v32 = vsel %vm198_vm0, %v210_v20, 0.0  ;;  %s2377_s27 = sld [smem:[#allocation9 + $0x34]]  ;;  %s4149_s5 = smov 125  }
  0x4e   : > { %v244_v33 = vmax.f32 %v241_v27, %v243_v30  ;;  %v246_v34 = vmax.f32 %v242_v28, %v245_v31  ;;  %v225_v35 = vadd.f32 %v224_v24, %v223_v26  ;;  %vm255_vm1 = vcmask 179200   ;;  %s2872_s19 = sld [smem:[#allocation9 + $0x1]]  ;;  %s4178_s28 = smov 126  }
  0x4f   : > { %v232_v36 = vld [vmem:[#allocation3] sm:$0xff]  ;;  %260 = vst.msk [vmem:[#allocation4 + $0x18] sm:$0xff] %vm255_vm1, %v2681_v17  ;;  %261 = vst.msk [vmem:[#allocation4 + $0x20] sm:$0xff] %vm255_vm1, %v2681_v17  ;;  %vm258_vm2 = vcmask 177152   ;;  %vm275_vm3 = vcmask 154648   ;;  %s2880_s24 = sld [smem:[#allocation9 + $0x2]] }
  0x50   : > { %v233_v37 = vld [vmem:[#allocation3 + $0x8] sm:$0xff]  ;;  %256 = vst.msk [vmem:[#allocation4] sm:$0xff] %vm255_vm1, %v2681_v17  ;;  %257 = vst.msk [vmem:[#allocation4 + $0x8] sm:$0xff] %vm255_vm1, %v2681_v17  ;;  %v248_v38 = vmax.f32 %v232_v36, %v240_v25  ;;  %v247_v39 = vmax.f32 %v244_v33, %v246_v34  ;;  %v227_v40 = vadd.f32 %v226_v32, %v225_v35  ;;  %s2351_s25 = sld [smem:[#allocation9 + $0x39]]  ;;  %vm318_vm4 = vcmask 1046528   ;;  %p4215_p7 = scmp.ne.s32.totalorder %s4168_s21, 0 }
  0x51   : > { %v211_v41 = vld [vmem:[#allocation2] sm:$0xff]  ;;  %v212_v42 = vld [vmem:[#allocation2 + $0x8] sm:$0xff]  ;;  %262 = vst.msk [vmem:[#allocation4 + $0x28] sm:$0x3f] %vm258_vm2, %v2681_v17  ;;  %259 = vst.msk [vmem:[#allocation4 + $0x10] sm:$0x3f] %vm258_vm2, %v2681_v17  ;;  %v534_v55 = vstv %s2349_s20 }
  0x52   : > { %250 = vst.msk [vmem:[#allocation3] sm:$0xff] %vm198_vm0, %v248_v38  ;;  %v228_v43 = vadd.f32 %v220_v29, %v211_v41  ;;  %v249_v44 = vmax.f32 %v233_v37, %v247_v39  ;;  %v229_v45 = vadd.f32 %v227_v40, %v212_v42  ;;  %v814_v59 = vstv %s2363_s26  ;;  %s2889_s30 = sld [smem:[#allocation9 + $0x3]] }
  0x53   : > { %v1094_v63 = vstv %s2377_s27  ;;  %s2353_s7 = sld [smem:[#allocation9 + $0x40]]  ;;  %vm353_vm5 = vcmask 1045504   ;;  %vm388_vm6 = vcmask 1044480   ;;  %vm423_vm7 = vcmask 1043456  }
  0x54   : > { %230 = vst.msk [vmem:[#allocation2] sm:$0xff] %vm198_vm0, %v228_v43  ;;  %251 = vst.msk [vmem:[#allocation3 + $0x8] sm:$0xff] %vm198_vm0, %v249_v44  ;;  %v521_v0 = vstv %s2872_s19  ;;  %s2355_s6 = sld [smem:[#allocation9 + $0x47]]  ;;  %vm458_vm8 = vcmask 1042432   ;;  %vm493_vm9 = vcmask 1041408  }
  0x55   : > { %231 = vst.msk [vmem:[#allocation2 + $0x8] sm:$0xff] %vm198_vm0, %v229_v45  ;;  %v801_v6 = vstv %s2880_s24  ;;  %s2357_s17 = sld [smem:[#allocation9 + $0x4e]] }
  0x56   : > { %v569_v10 = vstv %s2351_s25  ;;  %s2359_s8 = sld [smem:[#allocation9 + $0x55]] }
  0x57   : > { %s2361_s15 = sld [smem:[#allocation9 + $0x5c]] }
  0x58   : > { %v1081_v11 = vstv %s2889_s30  ;;  %s2365_s16 = sld [smem:[#allocation9 + $0x3a]] }
  0x59   : > { %v278_v46 = vld [vmem:[#allocation3] sm:$0xff]  ;;  %v611_v17 = vstv %s2353_s7  ;;  %s2369_s20 = sld [smem:[#allocation9 + $0x48]] }
  0x5a   : > { %282 = vrot.lane.b32.xlu1 %v278_v46, %s2682_s18  ;;  %v653_v23 = vstv %s2355_s6  ;;  %s2371_s26 = sld [smem:[#allocation9 + $0x4f]] }
  0x5b   : > { %v263_v47 = vld [vmem:[#allocation2] sm:$0xff]  ;;  %v279_v48 = vld [vmem:[#allocation3 + $0x8] sm:$0xff]  ;;  %v695_v32 = vstv %s2357_s17  ;;  %s2373_s27 = sld [smem:[#allocation9 + $0x56]] }
  0x5c   : > { %v264_v49 = vld [vmem:[#allocation2 + $0x8] sm:$0xff]  ;;  %v265_v50 = vmul.f32 0.25, %v263_v47  ;;  %v737_v41 = vstv %s2359_s8  ;;  %s2375_s19 = sld [smem:[#allocation9 + $0x5d]] }
  0x5d   : > { %v266_v51 = vmul.f32 0.25, %v264_v49  ;;  %s2379_s24 = sld [smem:[#allocation9 + $0x3b]] }
  0x5e   : > { %269 = vrot.lane.b32.xlu0 %v265_v50, %s2682_s18  ;;  %284 = vrot.lane.b32.xlu1 %v279_v48, %s2682_s18  ;;  %s2381_s25 = sld [smem:[#allocation9 + $0x42]] }
  0x5f   : > { %s2383_s30 = sld [smem:[#allocation9 + $0x49]] }
  0x60   : > { %s2350_s7 = sld [smem:[#allocation9 + $0x8]] }
  0x61   : > { %s2352_s6 = sld [smem:[#allocation9 + $0xf]] }
  0x62   : > { %271 = vrot.lane.b32.xlu0 %v266_v51, %s2682_s18  ;;  %s2367_s18 = sld [smem:[#allocation9 + $0x41]] }
  0x63   : > { %s2354_s17 = sld [smem:[#allocation9 + $0x16]] }
  0x64   : > { %s2356_s8 = sld [smem:[#allocation9 + $0x1d]] }
  0x65   : > { %s3106_s0 = sld [smem:[#allocation9 + $0xa]] }
  0x66   : > { %s3113_s1 = sld [smem:[#allocation9 + $0x2a]] }
  0x67   : > { %s3121_s29 = sld [smem:[#allocation9 + $0x11]] }
  0x68   : > { %s3142_s13 = sld [smem:[#allocation9 + $0x57]] }
  0x69   : > { %s3150_s11 = sld [smem:[#allocation9 + $0x5e]] }
  0xcc   : > { %v283_v52 = vpop.permute.xlu1 %282 }
  0xcd   : > { %289 = vst.msk [vmem:[#allocation4 + $0x1b] sm:$0xff] %vm275_vm3, %v283_v52  ;;  %v779_v52 = vstv %s2361_s15  ;;  %s2358_s15 = sld [smem:[#allocation9 + $0x24]] }
  0xd0   : > { %v270_v53 = vpop.permute.xlu0 %269  ;;  %v285_v54 = vpop.permute.xlu1 %284 }
  0xd1   : > { %276 = vst.msk [vmem:[#allocation4 + $0x3] sm:$0xff] %vm275_vm3, %v270_v53  ;;  %290 = vst.msk [vmem:[#allocation4 + $0x23] sm:$0xff] %vm275_vm3, %v285_v54 }
  0xd4   : > { %v2870_v56 = vld [vmem:[#allocation4 + $0x18] sm:$0xff]  ;;  %v272_v57 = vpop.permute.xlu0 %271 }
  0xd5   : > { %277 = vst.msk [vmem:[#allocation4 + $0xb] sm:$0xff] %vm275_vm3, %v272_v57  ;;  %v535_v58 = vmul.f32 %v534_v55, %v2870_v56  ;;  %v815_v62 = vmul.f32 %v814_v59, %v2870_v56  ;;  %v1095_v2 = vmul.f32 %v1094_v63, %v2870_v56  ;;  %v570_v14 = vmul.f32 %v569_v10, %v2870_v56 }
  0xd6   : > { %v612_v22 = vmul.f32 %v611_v17, %v2870_v56  ;;  %v654_v31 = vmul.f32 %v653_v23, %v2870_v56  ;;  %v696_v39 = vmul.f32 %v695_v32, %v2870_v56  ;;  %v738_v49 = vmul.f32 %v737_v41, %v2870_v56 }
  0xd7   : > { %539 = vrot.lane.b32.xlu0 %v535_v58, %s2683_s23  ;;  %v576_v21 = vrot.slane %v570_v14, 1 }
  0xd8   : > { %v2876_v60 = vld [vmem:[#allocation4 + $0x20] sm:$0xff]  ;;  %v2904_v13 = vld [vmem:[#allocation4 + $0x28] sm:$0x3f]  ;;  %v618_v30 = vrot.slane %v612_v22, 2  ;;  %v660_v40 = vrot.slane %v654_v31, 3  ;;  %v702_v48 = vrot.slane %v696_v39, 4 }
  0xd9   : > { %v536_v61 = vmul.f32 %v534_v55, %v2876_v60  ;;  %v816_v1 = vmul.f32 %v814_v59, %v2876_v60  ;;  %v2887_v3 = vld [vmem:[#allocation4] sm:$0xff]  ;;  %v1096_v5 = vmul.f32 %v1094_v63, %v2876_v60  ;;  %v571_v12 = vmul.f32 %v569_v10, %v2876_v60 }
  0xda   : > { %v522_v4 = vmul.f32 %v521_v0, %v2887_v3  ;;  %v802_v8 = vmul.f32 %v801_v6, %v2887_v3  ;;  %v1082_v15 = vmul.f32 %v1081_v11, %v2887_v3  ;;  %v613_v19 = vmul.f32 %v611_v17, %v2876_v60 }
  0xdb   : > { %541 = vrot.lane.b32.xlu1 %v536_v61, %s2683_s23  ;;  %819 = vrot.lane.b32.xlu0 %v815_v62, %s4152_s4  ;;  %v577_v18 = vrot.slane %v571_v12, 1  ;;  %v572_v20 = vmul.f32 %v569_v10, %v2904_v13  ;;  %v655_v25 = vmul.f32 %v653_v23, %v2876_v60  ;;  %v614_v29 = vmul.f32 %v611_v17, %v2904_v13 }
  0xdc   : > { %v2898_v7 = vld [vmem:[#allocation4 + $0x8] sm:$0xff]  ;;  %v619_v27 = vrot.slane %v613_v19, 2  ;;  %v697_v33 = vmul.f32 %v695_v32, %v2876_v60  ;;  %v656_v34 = vmul.f32 %v653_v23, %v2904_v13  ;;  %v739_v43 = vmul.f32 %v737_v41, %v2876_v60 }
  0xdd   : > { %v523_v9 = vmul.f32 %v521_v0, %v2898_v7  ;;  %v803_v16 = vmul.f32 %v801_v6, %v2898_v7  ;;  %v1083_v24 = vmul.f32 %v1081_v11, %v2898_v7  ;;  %v578_v26 = vsel %vm318_vm4, %v576_v21, %v577_v18 }
  0xde   : > { %v579_v28 = vrot.slane %v572_v20, 1  ;;  %v620_v35 = vsel %vm353_vm5, %v618_v30, %v619_v27  ;;  %v661_v37 = vrot.slane %v655_v25, 3  ;;  %v621_v38 = vrot.slane %v614_v29, 2 }
  0xdf   : > { %821 = vrot.lane.b32.xlu1 %v816_v1, %s4152_s4  ;;  %1099 = vrot.lane.b32.xlu0 %v1095_v2, %s4149_s5  ;;  %v703_v42 = vrot.slane %v697_v33, 4  ;;  %v663_v46 = vrot.slane %v656_v34, 3  ;;  %v698_v47 = vmul.f32 %v695_v32, %v2904_v13  ;;  %v745_v51 = vrot.slane %v739_v43, 5 }
  0xe0   : > { %v580_v36 = vsel %vm318_vm4, %v577_v18, %v579_v28  ;;  %v662_v44 = vsel %vm388_vm6, %v660_v40, %v661_v37  ;;  %v622_v45 = vsel %vm353_vm5, %v619_v27, %v621_v38  ;;  %v781_v55 = vmul.f32 %v779_v52, %v2876_v60 }
  0xe1   : > { %v704_v50 = vsel %vm423_vm7, %v702_v48, %v703_v42  ;;  %v664_v53 = vsel %vm388_vm6, %v661_v37, %v663_v46  ;;  %v705_v54 = vrot.slane %v698_v47, 4  ;;  %v740_v57 = vmul.f32 %v737_v41, %v2904_v13 }
  0xe2   : > { %v744_v58 = vrot.slane %v738_v49, 5  ;;  %v780_v59 = vmul.f32 %v779_v52, %v2870_v56  ;;  %v849_v61 = vstv %s2365_s16  ;;  %v787_v1 = vrot.slane %v781_v55, 6  ;;  %s2360_s16 = sld [smem:[#allocation9 + $0x2b]] }
  0xe3   : > { %1101 = vrot.lane.b32.xlu1 %v1096_v5, %s4149_s5  ;;  %526 = vrot.lane.b32.xlu0 %v522_v4, %s2683_s23  ;;  %v851_v63 = vmul.f32 %v849_v61, %v2876_v60  ;;  %v706_v0 = vsel %vm423_vm7, %v703_v42, %v705_v54  ;;  %v747_v2 = vrot.slane %v740_v57, 5  ;;  %v782_v4 = vmul.f32 %v779_v52, %v2904_v13 }
  0xe4   : > { %v746_v62 = vsel %vm458_vm8, %v744_v58, %v745_v51  ;;  %v850_v5 = vmul.f32 %v849_v61, %v2870_v56  ;;  %v786_v6 = vrot.slane %v780_v59, 6  ;;  %v933_v20 = vstv %s2369_s20  ;;  %s2366_s20 = sld [smem:[#allocation9 + $0x10]] }
  0xe5   : > { %v748_v12 = vsel %vm458_vm8, %v745_v51, %v747_v2  ;;  %v789_v14 = vrot.slane %v782_v4, 6  ;;  %v935_v23 = vmul.f32 %v933_v20, %v2876_v60  ;;  %v975_v27 = vstv %s2371_s26  ;;  %s3044_s26 = sld [smem:[#allocation9 + $0x31]] }
  0xe6   : > { %v788_v11 = vsel %vm493_vm9, %v786_v6, %v787_v1  ;;  %v977_v29 = vmul.f32 %v975_v27, %v2876_v60  ;;  %v936_v33 = vmul.f32 %v933_v20, %v2904_v13  ;;  %v976_v34 = vmul.f32 %v975_v27, %v2870_v56 }
  0xe7   : > { %806 = vrot.lane.b32.xlu0 %v802_v8, %s4152_s4  ;;  %528 = vrot.lane.b32.xlu1 %v523_v9, %s2683_s23  ;;  %v891_v8 = vstv %s2367_s18  ;;  %v857_v9 = vrot.slane %v851_v63, 1  ;;  %v790_v21 = vsel %vm493_vm9, %v787_v1, %v789_v14  ;;  %v941_v31 = vrot.slane %v935_v23, 3  ;;  %s2364_s18 = sld [smem:[#allocation9 + $0x9]] }
  0xe8   : > { %v893_v10 = vmul.f32 %v891_v8, %v2876_v60  ;;  %v892_v17 = vmul.f32 %v891_v8, %v2870_v56  ;;  %v983_v37 = vrot.slane %v977_v29, 4  ;;  %v943_v41 = vrot.slane %v936_v33, 3  ;;  %v3014_v33 = vld [vmem:[#allocation4 + $0x10] sm:$0x3f] }
  0xe9   : > { %v978_v42 = vmul.f32 %v975_v27, %v2904_v13  ;;  %v982_v43 = vrot.slane %v976_v34, 4  ;;  %v1059_v47 = vstv %s2375_s19  ;;  %v1129_v54 = vstv %s2379_s24  ;;  %s3048_s19 = sld [smem:[#allocation9 + $0x1e]] }
  0xea   : > { %v899_v19 = vrot.slane %v893_v10, 2  ;;  %v898_v25 = vrot.slane %v892_v17, 2  ;;  %v944_v48 = vsel %vm388_vm6, %v941_v31, %v943_v41  ;;  %v1131_v57 = vmul.f32 %v1129_v54, %v2876_v60  ;;  %s3053_s24 = sld [smem:[#allocation9 + $0x25]] }
  0xeb   : > { %1086 = vrot.lane.b32.xlu0 %v1082_v15, %s4149_s5  ;;  %808 = vrot.lane.b32.xlu1 %v803_v16, %s4152_s4  ;;  %v852_v15 = vmul.f32 %v849_v61, %v2904_v13  ;;  %v856_v16 = vrot.slane %v850_v5, 1  ;;  %v985_v49 = vrot.slane %v978_v42, 4  ;;  %v1130_v63 = vmul.f32 %v1129_v54, %v2870_v56 }
  0xec   : > { %v900_v28 = vsel %vm353_vm5, %v898_v25, %v899_v19  ;;  %v1171_v1 = vstv %s2381_s25  ;;  %v1137_v2 = vrot.slane %v1131_v57, 1  ;;  %v675_v42 = vstv %s2356_s8  ;;  %s3057_s25 = sld [smem:[#allocation9]] }
  0xed   : > { %v858_v18 = vsel %vm318_vm4, %v856_v16, %v857_v9  ;;  %v859_v22 = vrot.slane %v852_v15, 1  ;;  %v986_v58 = vsel %vm423_vm7, %v983_v37, %v985_v49  ;;  %v1173_v4 = vmul.f32 %v1171_v1, %v2876_v60  ;;  %s3074_s8 = sld [smem:[#allocation9 + $0x4d]] }
  0xee   : > { %v1136_v10 = vrot.slane %v1130_v63, 1  ;;  %v1213_v15 = vstv %s2383_s30  ;;  %v549_v16 = vstv %s2350_s7  ;;  %s3059_s30 = sld [smem:[#allocation9 + $0x38]] }
  0xef   : > { %581 = vrot.lane.b32.xlu0 %v578_v26, %s2683_s23  ;;  %1088 = vrot.lane.b32.xlu1 %v1083_v24, %s4149_s5  ;;  %v894_v24 = vmul.f32 %v891_v8, %v2904_v13  ;;  %v934_v26 = vmul.f32 %v933_v20, %v2870_v56  ;;  %v860_v30 = vsel %vm318_vm4, %v857_v9, %v859_v22  ;;  %v1179_v14 = vrot.slane %v1173_v4, 2  ;;  %s3064_s7 = sld [smem:[#allocation9 + $0x3f]] }
  0xf0   : > { %v1132_v9 = vmul.f32 %v1129_v54, %v2904_v13  ;;  %v1174_v20 = vmul.f32 %v1171_v1, %v2904_v13  ;;  %v1214_v22 = vmul.f32 %v1213_v15, %v2870_v56  ;;  %v551_v25 = vmul.f32 %v549_v16, %v2898_v7 }
  0xf1   : > { %v901_v32 = vrot.slane %v894_v24, 2  ;;  %v550_v24 = vmul.f32 %v549_v16, %v2887_v3  ;;  %v552_v41 = vmul.f32 %v549_v16, %v3014_v33  ;;  %v676_v54 = vmul.f32 %v675_v42, %v2887_v3 }
  0xf2   : > { %v1181_v29 = vrot.slane %v1174_v20, 2 }
  0xf3   : > { %623 = vrot.lane.b32.xlu0 %v620_v35, %s2683_s23  ;;  %583 = vrot.lane.b32.xlu1 %v580_v36, %s2683_s23  ;;  %v940_v35 = vrot.slane %v934_v26, 3  ;;  %v1017_v36 = vstv %s2373_s27  ;;  %v902_v40 = vsel %vm353_vm5, %v899_v19, %v901_v32  ;;  %v1215_v19 = vmul.f32 %v1213_v15, %v2876_v60  ;;  %s2368_s27 = sld [smem:[#allocation9 + $0x17]] }
  0xf4   : > { %v1019_v38 = vmul.f32 %v1017_v36, %v2876_v60  ;;  %v1020_v51 = vmul.f32 %v1017_v36, %v2904_v13  ;;  %v591_v26 = vstv %s2352_s6  ;;  %v633_v32 = vstv %s2354_s17  ;;  %s3068_s6 = sld [smem:[#allocation9 + $0x46]] }
  0xf5   : > { %v942_v39 = vsel %vm388_vm6, %v940_v35, %v941_v31  ;;  %v1220_v31 = vrot.slane %v1214_v22, 3  ;;  %v556_v34 = vrot.slane %v550_v24, 1  ;;  %v557_v35 = vrot.slane %v551_v25, 1  ;;  %s3072_s17 = sld [smem:[#allocation9 + $0x7]] }
  0xf6   : > { %v1025_v46 = vrot.slane %v1019_v38, 5  ;;  %v1027_v61 = vrot.slane %v1020_v51, 5  ;;  %v635_v49 = vmul.f32 %v633_v32, %v2898_v7  ;;  %v717_v51 = vstv %s2358_s15  ;;  %s3078_s15 = sld [smem:[#allocation9 + $0x54]] }
  0xf7   : > { %665 = vrot.lane.b32.xlu0 %v662_v44, %s2683_s23  ;;  %625 = vrot.lane.b32.xlu1 %v622_v45, %s2683_s23  ;;  %v1018_v44 = vmul.f32 %v1017_v36, %v2870_v56  ;;  %v984_v45 = vsel %vm423_vm7, %v982_v43, %v983_v37  ;;  %v592_v36 = vmul.f32 %v591_v26, %v2887_v3  ;;  %v682_v63 = vrot.slane %v676_v54, 4 }
  0xf8   : > { %v1028_v6 = vsel %vm458_vm8, %v1025_v46, %v1027_v61  ;;  %v593_v37 = vmul.f32 %v591_v26, %v2898_v7  ;;  %v558_v43 = vsel %vm318_vm4, %v556_v34, %v557_v35  ;;  %v636_v61 = vmul.f32 %v633_v32, %v3014_v33 }
  0xf9   : > { %v1024_v52 = vrot.slane %v1018_v44, 5  ;;  %v598_v44 = vrot.slane %v592_v36, 2 }
  0xfb   : > { %707 = vrot.lane.b32.xlu0 %v704_v50, %s2683_s23  ;;  %667 = vrot.lane.b32.xlu1 %v664_v53, %s2683_s23  ;;  %v1061_v50 = vmul.f32 %v1059_v47, %v2876_v60  ;;  %v1060_v53 = vmul.f32 %v1059_v47, %v2870_v56  ;;  %v1026_v55 = vsel %vm458_vm8, %v1024_v52, %v1025_v46 }
  0xfc   : > { %v634_v46 = vmul.f32 %v633_v32, %v2887_v3 }
  0xfd   : > { %v1067_v59 = vrot.slane %v1061_v50, 6  ;;  %v594_v50 = vmul.f32 %v591_v26, %v3014_v33 }
  0xff   : > { %749 = vrot.lane.b32.xlu0 %v746_v62, %s2683_s23  ;;  %709 = vrot.lane.b32.xlu1 %v706_v0, %s2683_s23  ;;  %v1062_v62 = vmul.f32 %v1059_v47, %v2904_v13  ;;  %v1066_v0 = vrot.slane %v1060_v53, 6  ;;  %v640_v53 = vrot.slane %v634_v46, 3 }
 0x101   : > { %v1068_v5 = vsel %vm493_vm9, %v1066_v0, %v1067_v59  ;;  %v1069_v8 = vrot.slane %v1062_v62, 6  ;;  %v759_v62 = vstv %s2360_s16  ;;  %s3083_s16 = sld [smem:[#allocation9 + $0xe]] }
 0x103   : > { %791 = vrot.lane.b32.xlu0 %v788_v11, %s2683_s23  ;;  %751 = vrot.lane.b32.xlu1 %v748_v12, %s2683_s23  ;;  %v1172_v11 = vmul.f32 %v1171_v1, %v2870_v56  ;;  %v1138_v12 = vsel %vm318_vm4, %v1136_v10, %v1137_v2  ;;  %v1070_v17 = vsel %vm493_vm9, %v1067_v59, %v1069_v8  ;;  %v601_v59 = vrot.slane %v594_v50, 2 }
 0x104   : > { %v718_v1 = vmul.f32 %v717_v51, %v2887_v3  ;;  %v678_v8 = vmul.f32 %v675_v42, %v3014_v33 }
 0x106   : > { %v685_v16 = vrot.slane %v678_v8, 4  ;;  %v3147_v8 = vstv %s3064_s7  ;;  %s3170_s7 = sld [smem:[#allocation9 + $0x26]] }
 0x107   : > { %861 = vrot.lane.b32.xlu0 %v858_v18, %s4152_s4  ;;  %793 = vrot.lane.b32.xlu1 %v790_v21, %s2683_s23  ;;  %v1139_v18 = vrot.slane %v1132_v9, 1  ;;  %v1178_v21 = vrot.slane %v1172_v11, 2  ;;  %v829_v9 = vstv %s2364_s18  ;;  %v724_v11 = vrot.slane %v718_v1, 5  ;;  %s3087_s18 = sld [smem:[#allocation9 + $0x5b]] }
 0x108   : > { %v830_v22 = vmul.f32 %v829_v9, %v2887_v3 }
 0x109   : > { %v1180_v23 = vsel %vm353_vm5, %v1178_v21, %v1179_v14  ;;  %v1140_v27 = vsel %vm318_vm4, %v1137_v2, %v1139_v18  ;;  %v719_v2 = vmul.f32 %v717_v51, %v2898_v7  ;;  %v720_v18 = vmul.f32 %v717_v51, %v3014_v33 }
 0x10a   : > { %v997_v51 = vstv %s3053_s24  ;;  %s3125_s24 = sld [smem:[#allocation9 + $0x18]] }
 0x10b   : > { %903 = vrot.lane.b32.xlu0 %v900_v28, %s4152_s4  ;;  %863 = vrot.lane.b32.xlu1 %v860_v30, %s4152_s4  ;;  %v1221_v28 = vrot.slane %v1215_v19, 3  ;;  %v1216_v30 = vmul.f32 %v1213_v15, %v2904_v13  ;;  %v871_v19 = vstv %s2366_s20  ;;  %v727_v26 = vrot.slane %v720_v18, 5  ;;  %s3090_s20 = sld [smem:[#allocation9 + $0x15]] }
 0x10c   : > { %v873_v32 = vmul.f32 %v871_v19, %v2898_v7  ;;  %v874_v46 = vmul.f32 %v871_v19, %v3014_v33 }
 0x10d   : > { %v1222_v38 = vsel %vm388_vm6, %v1220_v31, %v1221_v28  ;;  %v872_v31 = vmul.f32 %v871_v19, %v2887_v3 }
 0x10e   : > { %v881_v54 = vrot.slane %v874_v46, 2 }
 0x10f   : > { %945 = vrot.lane.b32.xlu0 %v942_v39, %s4152_s4  ;;  %905 = vrot.lane.b32.xlu1 %v902_v40, %s4152_s4  ;;  %v1182_v39 = vsel %vm353_vm5, %v1179_v14, %v1181_v29  ;;  %v1223_v40 = vrot.slane %v1216_v30, 3  ;;  %v760_v14 = vmul.f32 %v759_v62, %v2887_v3  ;;  %v836_v29 = vrot.slane %v830_v22, 1 }
 0x111   : > { %v1224_v47 = vsel %vm388_vm6, %v1221_v28, %v1223_v40  ;;  %v766_v21 = vrot.slane %v760_v14, 6  ;;  %v913_v28 = vstv %s2368_s27  ;;  %v878_v40 = vrot.slane %v872_v31, 2  ;;  %s3094_s27 = sld [smem:[#allocation9 + $0x1c]] }
 0x112   : > { %v1109_v14 = vstv %s3106_s0  ;;  %s3176_s0 = sld [smem:[#allocation9 + $0x3c]] }
 0x113   : > { %987 = vrot.lane.b32.xlu0 %v984_v45, %s4152_s4  ;;  %947 = vrot.lane.b32.xlu1 %v944_v48, %s4152_s4  ;;  %v599_v45 = vrot.slane %v593_v37, 2  ;;  %v559_v48 = vrot.slane %v552_v41, 1  ;;  %v832_v37 = vmul.f32 %v829_v9, %v3014_v33  ;;  %v879_v41 = vrot.slane %v873_v32, 2 }
 0x115   : > { %v600_v52 = vsel %vm353_vm5, %v598_v44, %v599_v45  ;;  %v560_v57 = vsel %vm318_vm4, %v557_v35, %v559_v48  ;;  %v839_v44 = vrot.slane %v832_v37, 1  ;;  %v880_v48 = vsel %vm353_vm5, %v878_v40, %v879_v41 }
 0x116   : > { %v1111_v37 = vmul.f32 %v1109_v14, %v2898_v7 }
 0x117   : > { %1029 = vrot.lane.b32.xlu0 %v1026_v55, %s4152_s4  ;;  %989 = vrot.lane.b32.xlu1 %v986_v58, %s4152_s4  ;;  %v677_v55 = vmul.f32 %v675_v42, %v2898_v7  ;;  %v641_v58 = vrot.slane %v635_v49, 3  ;;  %v914_v42 = vmul.f32 %v913_v28, %v2887_v3 }
 0x119   : > { %v683_v0 = vrot.slane %v677_v55, 4  ;;  %v642_v4 = vsel %vm388_vm6, %v640_v53, %v641_v58  ;;  %v920_v49 = vrot.slane %v914_v42, 3  ;;  %v916_v55 = vmul.f32 %v913_v28, %v3014_v33 }
 0x11b   : > { %1071 = vrot.lane.b32.xlu0 %v1068_v5, %s4152_s4  ;;  %1031 = vrot.lane.b32.xlu1 %v1028_v6, %s4152_s4  ;;  %v602_v5 = vsel %vm353_vm5, %v599_v45, %v601_v59  ;;  %v643_v6 = vrot.slane %v636_v61, 3  ;;  %v684_v10 = vsel %vm423_vm7, %v682_v63, %v683_v0  ;;  %v686_v24 = vsel %vm423_vm7, %v683_v0, %v685_v16 }
 0x11c   : > { %v915_v45 = vmul.f32 %v913_v28, %v2898_v7  ;;  %v4157_v59 = vstv %s3044_s26  ;;  %v998_v63 = vmul.f32 %v997_v51, %v2887_v3  ;;  %v3132_v0 = vmul.f32 %v997_v51, %v2898_v7 }
 0x11d   : > { %v644_v15 = vsel %vm388_vm6, %v641_v58, %v643_v6  ;;  %v4156_v58 = vstv %s3057_s25  ;;  %v3140_v6 = vstv %s3059_s30  ;;  %s3162_s30 = sld [smem:[#allocation9 + $0x35]]  ;;  %v3192_v28 = vstv %s3094_s27 }
 0x11e   : > { %v921_v53 = vrot.slane %v915_v45, 3  ;;  %v1004_v18 = vrot.slane %v998_v63, 5  ;;  %v1005_v19 = vrot.slane %v3132_v0, 5  ;;  %v3245_v63 = vstv %s3150_s11  ;;  %s3413_s11 = sld [smem:[#allocation9 + $0x12]] }
 0x11f   : > { %1141 = vrot.lane.b32.xlu0 %v1138_v12, %s4149_s5  ;;  %1073 = vrot.lane.b32.xlu1 %v1070_v17, %s4152_s4  ;;  %v725_v12 = vrot.slane %v719_v2, 5  ;;  %v761_v17 = vmul.f32 %v759_v62, %v2898_v7  ;;  %s3773_s27 = sld [smem:[#allocation9 + $0xc]] }
 0x120   : > { %v922_v2 = vsel %vm388_vm6, %v920_v49, %v921_v53 }
 0x121   : > { %v726_v20 = vsel %vm458_vm8, %v724_v11, %v725_v12  ;;  %v767_v25 = vrot.slane %v761_v17, 6  ;;  %v728_v35 = vsel %vm458_vm8, %v725_v12, %v727_v26  ;;  %v3156_v11 = vstv %s3068_s6  ;;  %s3186_s6 = sld [smem:[#allocation9 + $0x43]] }
 0x122   : > { %v3159_v12 = vstv %s3074_s8  ;;  %v3184_v26 = vstv %s3078_s15  ;;  %s3219_s8 = sld [smem:[#allocation9 + $0x4]] }
 0x123   : > { %1183 = vrot.lane.b32.xlu0 %v1180_v23, %s4149_s5  ;;  %1143 = vrot.lane.b32.xlu1 %v1140_v27, %s4149_s5  ;;  %v831_v23 = vmul.f32 %v829_v9, %v2898_v7  ;;  %v762_v27 = vmul.f32 %v759_v62, %v3014_v33  ;;  %v768_v34 = vsel %vm493_vm9, %v766_v21, %v767_v25  ;;  %s3231_s15 = sld [smem:[#allocation9 + $0xb]] }
 0x125   : > { %v837_v30 = vrot.slane %v831_v23, 1  ;;  %v769_v36 = vrot.slane %v762_v27, 6  ;;  %v3189_v27 = vstv %s3090_s20  ;;  %s3770_s20 = sld [smem:[#allocation9 + $0x5]] }
 0x127   : > { %1225 = vrot.lane.b32.xlu0 %v1222_v38, %s4149_s5  ;;  %1185 = vrot.lane.b32.xlu1 %v1182_v39, %s4149_s5  ;;  %v955_v38 = vstv %s3048_s19  ;;  %v838_v39 = vsel %vm318_vm4, %v836_v29, %v837_v30  ;;  %s3103_s19 = sld [smem:[#allocation9 + $0x2c]]  ;;  %v3195_v29 = vstv %s3087_s18 }
 0x128   : > { %v3110_v50 = vmul.f32 %v955_v38, %v2898_v7  ;;  %v958_v1 = vmul.f32 %v955_v38, %v3014_v33  ;;  %s3745_s18 = sld [smem:[#allocation9 + $0x5f]] }
 0x12a   : > { %v963_v62 = vrot.slane %v3110_v50, 4 }
 0x12b   : > { %561 = vrot.lane.b32.xlu0 %v558_v43, %s2683_s23  ;;  %1227 = vrot.lane.b32.xlu1 %v1224_v47, %s4149_s5  ;;  %v770_v43 = vsel %vm493_vm9, %v767_v25, %v769_v36  ;;  %s3099_s5 = sld [smem:[#allocation9 + $0x23]]  ;;  %v956_v47 = vmul.f32 %v955_v38, %v2887_v3  ;;  %v3181_v25 = vstv %s3083_s16  ;;  %v1110_v36 = vmul.f32 %v1109_v14, %v2887_v3 }
 0x12c   : > { %s3717_s16 = sld [smem:[#allocation9 + $0x2e]] }
 0x12d   : > { %v1039_v9 = vstv %s3103_s19  ;;  %v1116_v50 = vrot.slane %v1110_v36, 1  ;;  %s3784_s19 = sld [smem:[#allocation9 + $0x36]] }
 0x12e   : > { %v1040_v22 = vmul.f32 %v1039_v9, %v2887_v3  ;;  %v1041_v23 = vmul.f32 %v1039_v9, %v2898_v7 }
 0x12f   : > { %603 = vrot.lane.b32.xlu0 %v600_v52, %s2683_s23  ;;  %563 = vrot.lane.b32.xlu1 %v560_v57, %s2683_s23  ;;  %v840_v52 = vsel %vm318_vm4, %v837_v30, %v839_v44  ;;  %v962_v57 = vrot.slane %v956_v47, 4  ;;  %v1151_v30 = vstv %s3121_s29  ;;  %s3209_s29 = sld [smem:[#allocation9 + $0x4a]]  ;;  %v1193_v44 = vstv %s3125_s24 }
 0x130   : > { %v1046_v38 = vrot.slane %v1040_v22, 6  ;;  %v3229_v47 = vstv %s3142_s13  ;;  %s3476_s13 = sld [smem:[#allocation9 + $0x19]] }
 0x131   : > { %v964_v17 = vsel %vm423_vm7, %v962_v57, %v963_v62  ;;  %v3214_v42 = vstv %s3099_s5  ;;  %s3674_s5 = sld [smem:[#allocation9 + $0x51]] }
 0x132   : > { %s3796_s24 = sld [smem:[#allocation9 + $0x13]] }
 0x133   : > { %645 = vrot.lane.b32.xlu0 %v642_v4, %s2683_s23  ;;  %605 = vrot.lane.b32.xlu1 %v602_v5, %s2683_s23  ;;  %v882_v4 = vsel %vm353_vm5, %v879_v41, %v881_v54  ;;  %v923_v5 = vrot.slane %v916_v55, 3  ;;  %v1042_v41 = vmul.f32 %v1039_v9, %v3014_v33 }
 0x135   : > { %v924_v21 = vsel %vm388_vm6, %v921_v53, %v923_v5  ;;  %v1153_v53 = vmul.f32 %v1151_v30, %v2898_v7  ;;  %v1049_v57 = vrot.slane %v1042_v41, 6  ;;  %v3258_v5 = vstv %s3186_s6  ;;  %s3838_s6 = sld [smem:[#allocation9 + $0x4b]] }
 0x137   : > { %687 = vrot.lane.b32.xlu0 %v684_v10, %s2683_s23  ;;  %647 = vrot.lane.b32.xlu1 %v644_v15, %s2683_s23  ;;  %v3153_v10 = vstv %s3072_s17  ;;  %s3198_s17 = sld [smem:[#allocation9 + $0x2d]] }
 0x138   : > { %v3276_v36 = vmul.f32 %v3153_v10, %v2898_v7 }
 0x13b   : > { %729 = vrot.lane.b32.xlu0 %v726_v20, %s2683_s23  ;;  %689 = vrot.lane.b32.xlu1 %v686_v24, %s2683_s23  ;;  %v965_v20 = vrot.slane %v958_v1, 4  ;;  %v1000_v24 = vmul.f32 %v997_v51, %v3014_v33  ;;  %v1117_v51 = vrot.slane %v1111_v37, 1  ;;  %v3249_v1 = vstv %s3170_s7  ;;  %s3815_s7 = sld [smem:[#allocation9 + $0x44]] }
 0x13c   : > { %v3281_v37 = vstv %s3209_s29  ;;  %s3865_s29 = sld [smem:[#allocation9 + $0x52]] }
 0x13d   : > { %v1007_v40 = vrot.slane %v1000_v24, 5  ;;  %v1154_v24 = vmul.f32 %v1151_v30, %v3014_v33 }
 0x13f   : > { %771 = vrot.lane.b32.xlu0 %v768_v34, %s2683_s23  ;;  %731 = vrot.lane.b32.xlu1 %v728_v35, %s2683_s23  ;;  %v1006_v34 = vsel %vm458_vm8, %v1004_v18, %v1005_v19  ;;  %v966_v35 = vsel %vm423_vm7, %v963_v62, %v965_v20  ;;  %v1008_v55 = vsel %vm458_vm8, %v1005_v19, %v1007_v40  ;;  %v1159_v19 = vrot.slane %v1153_v53, 2 }
 0x140   : > { %v1112_v62 = vmul.f32 %v1109_v14, %v3014_v33  ;;  %v1194_v20 = vmul.f32 %v1193_v44, %v2887_v3  ;;  %v3290_v40 = vstv %s3231_s15  ;;  %s3889_s15 = sld [smem:[#allocation9 + $0x59]] }
 0x142   : > { %v1119_v22 = vrot.slane %v1112_v62, 1  ;;  %v1200_v53 = vrot.slane %v1194_v20, 3 }
 0x143   : > { %841 = vrot.lane.b32.xlu0 %v838_v39, %s4152_s4  ;;  %773 = vrot.lane.b32.xlu1 %v770_v43, %s2683_s23  ;;  %s3117_s23 = sld [smem:[#allocation9 + $0x50]]  ;;  %v1047_v39 = vrot.slane %v1041_v23, 6  ;;  %v3217_v43 = vstv %s3113_s1  ;;  %v1195_v23 = vmul.f32 %v1193_v44, %v2898_v7  ;;  %s4184_s1 = smov 125  }
 0x145   : > { %v1048_v54 = vsel %vm493_vm9, %v1046_v38, %v1047_v39  ;;  %v305_v38 = vmul.f32 %v4157_v59, %v2870_v56  ;;  %v1201_v62 = vrot.slane %v1195_v23, 3  ;;  %v314_v23 = vmul.f32 %v3153_v10, %v3014_v33 }
 0x147   : > { %883 = vrot.lane.b32.xlu0 %v880_v48, %s4152_s4  ;;  %843 = vrot.lane.b32.xlu1 %v840_v52, %s4152_s4  ;;  %s3135_s4 = sld [smem:[#allocation9 + $0x1f]]  ;;  %v1152_v52 = vmul.f32 %v1151_v30, %v2887_v3  ;;  %v329_v30 = vmul.f32 %v3140_v6, %v2870_v56 }
 0x149   : > { %v3127_v61 = vpop.permute.xlu0 %539  ;;  %v3226_v46 = vstv %s3117_s23  ;;  %v1158_v18 = vrot.slane %v1152_v52, 2  ;;  %v335_v20 = vrot.slane %v329_v30, 1  ;;  %v1202_v30 = vsel %vm388_vm6, %v1200_v53, %v1201_v62  ;;  %s3791_s23 = sld [smem:[#allocation9 + $0x3d]] }
 0x14a   : > { %v1256_v53 = vmul.f32 %v3226_v46, %v2870_v56 }
 0x14b   : > { %925 = vrot.lane.b32.xlu0 %v922_v2, %s4178_s28  ;;  %885 = vrot.lane.b32.xlu1 %v882_v4, %s4178_s28  ;;  %v3252_v2 = vstv %s3198_s17  ;;  %v3255_v4 = vstv %s3176_s0  ;;  %v1160_v52 = vsel %vm353_vm5, %v1158_v18, %v1159_v19  ;;  %v3308_v18 = vmul.f32 %v3140_v6, %v2876_v60  ;;  %s3820_s0 = sld [smem:[#allocation9 + $0x1a]] }
 0x14c   : > { %s3844_s17 = sld [smem:[#allocation9 + $0x21]] }
 0x14d   : > { %v3164_v15 = vpop.permute.xlu1 %541  ;;  %v3166_v16 = vpop.permute.xlu0 %819  ;;  %v3223_v45 = vstv %s3135_s4  ;;  %s2686_s4 = smov 124  }
 0x14e   : > { %4179 = vst [vmem:[#allocation18_spill] sm:$0xff] %v3166_v16 }
 0x14f   : > { %967 = vrot.lane.b32.xlu0 %v964_v17, %s4178_s28  ;;  %927 = vrot.lane.b32.xlu1 %v924_v21, %s4178_s28  ;;  %v1118_v17 = vsel %vm318_vm4, %v1116_v50, %v1117_v51  ;;  %v1050_v21 = vsel %vm493_vm9, %v1047_v39, %v1049_v57  ;;  %v1120_v57 = vsel %vm318_vm4, %v1117_v51, %v1119_v22 }
 0x150   : > { %v3314_v51 = vmul.f32 %v3181_v25, %v2887_v3  ;;  %v3322_v22 = vmul.f32 %v3147_v8, %v2870_v56 }
 0x151   : > { %v3200_v31 = vpop.permute.xlu1 %821  ;;  %v3202_v32 = vpop.permute.xlu0 %1099 }
 0x152   : > { %4180 = vst [vmem:[#allocation19_spill] sm:$0xff] %v3200_v31  ;;  %4181 = vst [vmem:[#allocation20_spill] sm:$0xff] %v3202_v32 }
 0x153   : > { %1009 = vrot.lane.b32.xlu0 %v1006_v34, %s4178_s28  ;;  %969 = vrot.lane.b32.xlu1 %v966_v35, %s4178_s28  ;;  %v300_v34 = vmul.f32 %v4156_v58, %v2887_v3  ;;  %v312_v35 = vmul.f32 %v3153_v10, %v2887_v3  ;;  %v320_v58 = vrot.slane %v3276_v36, 1  ;;  %v1238_v10 = vmul.f32 %v3223_v45, %v3014_v33 }
 0x155   : > { %v3233_v48 = vpop.permute.xlu1 %1101  ;;  %v3235_v49 = vpop.permute.xlu0 %526  ;;  %v307_v0 = vadd.f32 %v305_v38, %v300_v34  ;;  %v319_v39 = vrot.slane %v312_v35, 1  ;;  %v3333_v38 = vmul.f32 %v3226_v46, %v2876_v60 }
 0x156   : > { %4182 = vst [vmem:[#allocation21_spill] sm:$0xff] %v3233_v48  ;;  %v322_v48 = vrot.slane %v314_v23, 1  ;;  %v1258_v23 = vmul.f32 %v3226_v46, %v2904_v13  ;;  %v349_v46 = vmul.f32 %v3181_v25, %v3014_v33 }
 0x157   : > { %1051 = vrot.lane.b32.xlu0 %v1048_v54, %s4178_s28  ;;  %1011 = vrot.lane.b32.xlu1 %v1008_v55, %s4178_s28  ;;  %v1236_v54 = vmul.f32 %v3223_v45, %v2887_v3  ;;  %v3301_v55 = vmul.f32 %v3223_v45, %v2898_v7  ;;  %v321_v59 = vsel %vm318_vm4, %v319_v39, %v320_v58  ;;  %v4188_v39 = vstv %s3044_s26  ;;  %s3679_s26 = sld [smem:[#allocation9 + $0x27]] }
 0x158   : > { %v3352_v45 = vmul.f32 %v3189_v27, %v2887_v3  ;;  %v1263_v56 = vrot.slane %v3333_v38, 4 }
 0x159   : > { %v3260_v9 = vpop.permute.xlu1 %528  ;;  %v3262_v14 = vpop.permute.xlu0 %806  ;;  %v1242_v35 = vrot.slane %v1236_v54, 4  ;;  %v1243_v36 = vrot.slane %v3301_v55, 4  ;;  %v3343_v54 = vmul.f32 %v3147_v8, %v2876_v60  ;;  %v306_v55 = vmul.f32 %v4188_v39, %v2876_v60 }
 0x15a   : > { %4183 = vst [vmem:[#allocation22_spill] sm:$0xff] %v3262_v14  ;;  %v3371_v60 = vmul.f32 %v3249_v1, %v2898_v7  ;;  %v326_v39 = vadd.f32 %v321_v59, %v307_v0  ;;  %v323_v0 = vsel %vm318_vm4, %v320_v58, %v322_v48  ;;  %v1280_v58 = vmul.f32 %v3249_v1, %v3014_v33 }
 0x15b   : > { %1121 = vrot.lane.b32.xlu0 %v1118_v17, %s4184_s1  ;;  %1053 = vrot.lane.b32.xlu1 %v1050_v21, %s4178_s28  ;;  %v1161_v17 = vrot.slane %v1154_v24, 2  ;;  %v1196_v21 = vmul.f32 %v1193_v44, %v3014_v33  ;;  %v3318_v44 = vmul.f32 %v3181_v25, %v2898_v7  ;;  %v1265_v25 = vrot.slane %v1258_v23, 4  ;;  %s3486_s28 = sld [smem:[#allocation9 + $0x20]] }
 0x15d   : > { %v3292_v41 = vpop.permute.xlu1 %808  ;;  %v3294_v50 = vpop.permute.xlu0 %1086 }
 0x15e   : > { %4185 = vst [vmem:[#allocation23_spill] sm:$0xff] %v3292_v41  ;;  %4186 = vst [vmem:[#allocation24_spill] sm:$0xff] %v3294_v50  ;;  %v1245_v50 = vrot.slane %v1238_v10, 4 }
 0x15f   : > { %1163 = vrot.lane.b32.xlu0 %v1160_v52, %s4184_s1  ;;  %1123 = vrot.lane.b32.xlu1 %v1120_v57, %s4184_s1  ;;  %v1162_v52 = vsel %vm353_vm5, %v1159_v19, %v1161_v17  ;;  %v1203_v57 = vrot.slane %v1196_v21, 3  ;;  %v354_v19 = vrot.slane %v3314_v51, 2  ;;  %v4189_v17 = vstv %s3057_s25  ;;  %s3712_s25 = sld [smem:[#allocation9 + $0x58]] }
 0x160   : > { %v301_v21 = vmul.f32 %v4189_v17, %v2898_v7  ;;  %v1278_v51 = vmul.f32 %v3249_v1, %v2887_v3  ;;  %v355_v17 = vrot.slane %v3318_v44, 2  ;;  %v1262_v3 = vrot.slane %v1256_v53, 4  ;;  %v3392_v53 = vld [vmem:[#allocation4 + $0x20] sm:$0xff] }
 0x161   : > { %v3326_v24 = vpop.permute.xlu1 %1088  ;;  %v3328_v34 = vpop.permute.xlu0 %581  ;;  %v1204_v32 = vsel %vm388_vm6, %v1201_v62, %v1203_v57  ;;  %v4190_v62 = vrot.slane %v3308_v18, 1  ;;  %v331_v57 = vmul.f32 %v3140_v6, %v2904_v13  ;;  %v1246_v13 = vsel %vm423_vm7, %v1243_v36, %v1245_v50 }
 0x162   : > { %4187 = vst [vmem:[#allocation25_spill] sm:$0xff] %v3326_v24  ;;  %v308_v59 = vadd.f32 %v306_v55, %v301_v21  ;;  %v1284_v10 = vrot.slane %v1278_v51, 5  ;;  %v1285_v6 = vrot.slane %v3371_v60, 5  ;;  %v4158_v55 = vrot.slane %v3343_v54, 2 }
 0x163   : > { %1205 = vrot.lane.b32.xlu0 %v1202_v30, %s4184_s1  ;;  %1165 = vrot.lane.b32.xlu1 %v1162_v52, %s4184_s1  ;;  %v1244_v52 = vsel %vm423_vm7, %v1242_v35, %v1243_v36  ;;  %v370_v35 = vrot.slane %v3322_v22, 2  ;;  %v337_v38 = vsel %vm318_vm4, %v335_v20, %v4190_v62  ;;  %v3396_v20 = vmul.f32 %v3392_v53, %v3229_v47  ;;  %v3422_v62 = vld [vmem:[#allocation4] sm:$0xff] }
 0x164   : > { %v342_v48 = vadd.f32 %v337_v38, %v326_v39  ;;  %v3405_v21 = vmul.f32 %v3189_v27, %v2898_v7  ;;  %v356_v1 = vsel %vm353_vm5, %v354_v19, %v355_v17  ;;  %v389_v36 = vrot.slane %v3352_v45, 3 }
 0x165   : > { %v3360_v24 = vpop.permute.xlu1 %583  ;;  %v3362_v30 = vpop.permute.xlu0 %623  ;;  %v338_v51 = vrot.slane %v331_v57, 1  ;;  %v357_v60 = vrot.slane %v349_v46, 2  ;;  %v327_v23 = vadd.f32 %v323_v0, %v308_v59  ;;  %v1320_v38 = vmul.f32 %v3422_v62, %v3252_v2  ;;  %v3434_v59 = vld [vmem:[#allocation4 + $0x28] sm:$0x3f] }
 0x166   : > { %v1286_v45 = vsel %vm458_vm8, %v1284_v10, %v1285_v6  ;;  %v1266_v57 = vsel %vm423_vm7, %v1263_v56, %v1265_v25  ;;  %v1287_v46 = vrot.slane %v1280_v58, 5  ;;  %v1300_v0 = vmul.f32 %v3434_v59, %v3229_v47 }
 0x167   : > { %1247 = vrot.lane.b32.xlu0 %v1244_v52, %s4184_s1  ;;  %1207 = vrot.lane.b32.xlu1 %v1204_v32, %s4184_s1  ;;  %v1264_v32 = vsel %vm423_vm7, %v1262_v3, %v1263_v56  ;;  %v3409_v52 = vld [vmem:[#allocation4 + $0x18] sm:$0xff]  ;;  %v1305_v3 = vrot.slane %v3396_v20, 5  ;;  %v361_v20 = vadd.f32 %v356_v1, %v342_v48  ;;  %v3443_v31 = vmul.f32 %v3392_v53, %v3156_v11 }
 0x168   : > { %v1298_v50 = vmul.f32 %v3409_v52, %v3229_v47  ;;  %v4191_v25 = vrot.slane %v3308_v18, 1  ;;  %v366_v58 = vmul.f32 %v3434_v59, %v3147_v8  ;;  %v1288_v18 = vsel %vm458_vm8, %v1285_v6, %v1287_v46 }
 0x169   : > { %v3387_v44 = vpop.permute.xlu1 %625  ;;  %v3389_v22 = vpop.permute.xlu0 %665  ;;  %v1307_v10 = vrot.slane %v1300_v0, 5  ;;  %v1322_v8 = vmul.f32 %v3252_v2, %v3014_v33  ;;  %v3474_v6 = vstv %s3413_s11  ;;  %v1340_v46 = vmul.f32 %v3409_v52, %v3245_v63  ;;  %s3915_s11 = sld [smem:[#allocation9 + $0x60]] }
 0x16a   : > { %v1304_v56 = vrot.slane %v1298_v50, 5  ;;  %v339_v47 = vsel %vm318_vm4, %v4191_v25, %v338_v51  ;;  %v1326_v50 = vrot.slane %v1320_v38, 6  ;;  %v3463_v51 = vmul.f32 %v3392_v53, %v3245_v63 }
 0x16b   : > { %1267 = vrot.lane.b32.xlu0 %v1264_v32, %s4184_s1  ;;  %1249 = vrot.lane.b32.xlu1 %v1246_v13, %s4184_s1  ;;  %v3426_v32 = vld [vmem:[#allocation4 + $0x8] sm:$0xff]  ;;  %v372_v13 = vsel %vm353_vm5, %v370_v35, %v4158_v55  ;;  %v358_v35 = vsel %vm353_vm5, %v355_v17, %v357_v60  ;;  %v343_v48 = vadd.f32 %v339_v47, %v327_v23  ;;  %v4192_v0 = vrot.slane %v3405_v21, 3 }
 0x16c   : > { %v3430_v19 = vmul.f32 %v3426_v32, %v3252_v2  ;;  %v377_v17 = vadd.f32 %v372_v13, %v361_v20  ;;  %v399_v60 = vmul.f32 %v3409_v52, %v3156_v11  ;;  %v417_v23 = vmul.f32 %v3422_v62, %v3192_v28 }
 0x16d   : > { %v3417_v7 = vpop.permute.xlu1 %667  ;;  %v3419_v39 = vpop.permute.xlu0 %707  ;;  %v3480_v38 = vmul.f32 %v3426_v32, %v3192_v28  ;;  %v373_v2 = vrot.slane %v366_v58, 2  ;;  %v391_v20 = vsel %vm388_vm6, %v389_v36, %v4192_v0  ;;  %v406_v13 = vrot.slane %v3443_v31, 3 }
 0x16e   : > { %v1342_v41 = vmul.f32 %v3434_v59, %v3245_v63  ;;  %v396_v16 = vadd.f32 %v391_v20, %v377_v17  ;;  %v405_v14 = vrot.slane %v399_v60, 3  ;;  %v434_v31 = vmul.f32 %v3409_v52, %v3159_v12 }
 0x16f   : > { %1289 = vrot.lane.b32.xlu0 %v1286_v45, %s4184_s1  ;;  %1269 = vrot.lane.b32.xlu1 %v1266_v57, %s4184_s1  ;;  %v1306_v45 = vsel %vm458_vm8, %v1304_v56, %v1305_v3  ;;  %v1327_v57 = vrot.slane %v3430_v19, 6  ;;  %v384_v19 = vmul.f32 %v3189_v27, %v3014_v33  ;;  %v362_v56 = vadd.f32 %v358_v35, %v343_v48 }
 0x170   : > { %v1308_v27 = vsel %vm458_vm8, %v1305_v3, %v1307_v10  ;;  %v3505_v36 = vmul.f32 %v3392_v53, %v3159_v12  ;;  %v4193_v3 = vrot.slane %v3343_v54, 2  ;;  %v401_v63 = vmul.f32 %v3434_v59, %v3156_v11 }
 0x171   : > { %v3454_v1 = vpop.permute.xlu1 %709  ;;  %v3456_v55 = vpop.permute.xlu0 %749  ;;  %v1328_v58 = vsel %vm493_vm9, %v1326_v50, %v1327_v57  ;;  %v392_v35 = vrot.slane %v384_v19, 3  ;;  %v1346_v48 = vrot.slane %v1340_v46, 6  ;;  %v424_v50 = vrot.slane %v417_v23, 4 }
 0x172   : > { %v374_v10 = vsel %vm353_vm5, %v4193_v3, %v373_v2  ;;  %v407_v54 = vsel %vm388_vm6, %v405_v14, %v406_v13  ;;  %v1349_v19 = vrot.slane %v1342_v41, 6  ;;  %v3527_v46 = vmul.f32 %v3426_v32, %v3214_v42 }
 0x173   : > { %1309 = vrot.lane.b32.xlu0 %v1306_v45, %s4184_s1  ;;  %1291 = vrot.lane.b32.xlu1 %v1288_v18, %s4184_s1  ;;  %v1347_v45 = vrot.slane %v3463_v51, 6  ;;  %v1329_v18 = vrot.slane %v1322_v8, 6  ;;  %v425_v51 = vrot.slane %v3480_v38, 4  ;;  %v452_v8 = vmul.f32 %v3422_v62, %v3214_v42 }
 0x174   : > { %v378_v17 = vadd.f32 %v374_v10, %v362_v56  ;;  %v412_v23 = vadd.f32 %v407_v54, %v396_v16  ;;  %v4159_v38 = vrot.slane %v3505_v36, 4  ;;  %v3532_v20 = vstv %s3476_s13  ;;  %s3946_s13 = sld [smem:[#allocation9 + $0x6]] }
 0x175   : > { %v3492_v25 = vpop.permute.xlu1 %751  ;;  %v3494_v47 = vpop.permute.xlu0 %791  ;;  %v1348_v2 = vsel %vm493_vm9, %v1346_v48, %v1347_v45  ;;  %v1330_v11 = vsel %vm493_vm9, %v1327_v57, %v1329_v18  ;;  %v408_v14 = vrot.slane %v401_v63, 3  ;;  %v419_v56 = vmul.f32 %v3192_v28, %v3014_v33 }
 0x176   : > { %v4194_v41 = vrot.slane %v3405_v21, 3  ;;  %v3540_v57 = vstv %s3486_s28  ;;  %v4195_v48 = vstv %s3219_s8  ;;  %v459_v54 = vrot.slane %v452_v8, 5  ;;  %s3949_s28 = sld [smem:[#allocation9 + $0xd]] }
 0x177   : > { %1331 = vrot.lane.b32.xlu0 %v1328_v58, %s4184_s1  ;;  %1311 = vrot.lane.b32.xlu1 %v1308_v27, %s4184_s1  ;;  %v426_v58 = vsel %vm423_vm7, %v424_v50, %v425_v51  ;;  %v440_v27 = vrot.slane %v434_v31, 4  ;;  %v1362_v63 = vmul.f32 %v3422_v62, %v4195_v48  ;;  %v1350_v28 = vsel %vm493_vm9, %v1347_v45, %v1349_v19 }
 0x178   : > { %v393_v16 = vsel %vm388_vm6, %v4194_v41, %v392_v35  ;;  %v1390_v21 = vmul.f32 %v3422_v62, %v3290_v40  ;;  %v1391_v35 = vmul.f32 %v3426_v32, %v3290_v40  ;;  %v431_v50 = vadd.f32 %v426_v58, %v412_v23 }
 0x179   : > { %v3517_v60 = vpop.permute.xlu1 %793  ;;  %v3519_v0 = vpop.permute.xlu0 %861  ;;  %v397_v18 = vadd.f32 %v393_v16, %v378_v17  ;;  %v442_v31 = vsel %vm423_vm7, %v440_v27, %v4159_v38  ;;  %v4160_v17 = vrot.slane %v3527_v46, 5  ;;  %v469_v8 = vmul.f32 %v3409_v52, %v3184_v26 }
 0x17a   : > { %v3565_v45 = vmul.f32 %v3392_v53, %v3184_v26  ;;  %v436_v19 = vmul.f32 %v3434_v59, %v3159_v12  ;;  %v3572_v23 = vmul.f32 %v3422_v62, %v3217_v43  ;;  %v4197_v27 = vstv %s3162_s30 }
 0x17b   : > { %1351 = vrot.lane.b32.xlu0 %v1348_v2, %s4184_s1  ;;  %1333 = vrot.lane.b32.xlu1 %v1330_v11, %s4184_s1  ;;  %v409_v2 = vsel %vm388_vm6, %v406_v13, %v408_v14  ;;  %v427_v11 = vrot.slane %v419_v56, 4  ;;  %v1375_v48 = vmul.f32 %v3409_v52, %v4197_v27  ;;  %v1396_v13 = vrot.slane %v1390_v21, 1 }
 0x17c   : > { %v413_v41 = vadd.f32 %v409_v2, %v397_v18  ;;  %v1397_v14 = vrot.slane %v1391_v35, 1  ;;  %v1411_v12 = vmul.f32 %v3392_v53, %v3255_v4  ;;  %v1392_v56 = vmul.f32 %v3290_v40, %v3014_v33 }
 0x17d   : > { %v3543_v3 = vpop.permute.xlu1 %863  ;;  %v3545_v10 = vpop.permute.xlu0 %903  ;;  %v447_v18 = vadd.f32 %v442_v31, %v431_v50  ;;  %v461_v2 = vsel %vm458_vm8, %v459_v54, %v4160_v17  ;;  %v475_v38 = vrot.slane %v469_v8, 5  ;;  %v3593_v27 = vmul.f32 %v3426_v32, %v3217_v43 }
 0x17e   : > { %v443_v21 = vrot.slane %v436_v19, 4  ;;  %v454_v35 = vmul.f32 %v3214_v42, %v3014_v33  ;;  %v428_v40 = vsel %vm423_vm7, %v425_v51, %v427_v11  ;;  %v1410_v50 = vmul.f32 %v3409_v52, %v3255_v4 }
 0x17f   : > { %1366 = vrot.lane.b32.xlu0 %v1362_v63, %s2686_s4  ;;  %1353 = vrot.lane.b32.xlu1 %v1350_v28, %s4184_s1  ;;  %v4198_v63 = vstv %s3219_s8  ;;  %v432_v31 = vadd.f32 %v428_v40, %v413_v41  ;;  %v3613_v19 = vmul.f32 %v3426_v32, %v3474_v6  ;;  %v1398_v42 = vsel %vm318_vm4, %v1396_v13, %v1397_v14  ;;  %s3870_s8 = sld [smem:[#allocation9 + $0x28]] }
 0x180   : > { %v1363_v28 = vmul.f32 %v3426_v32, %v4198_v63  ;;  %v4201_v63 = vstv %s3162_s30  ;;  %v1417_v51 = vrot.slane %v1411_v12, 1  ;;  %v1399_v11 = vrot.slane %v1392_v56, 1  ;;  %s2687_s30 = smov 123   ;;  %s3895_s1 = sld [smem:[#allocation9 + $0x2f]] }
 0x181   : > { %v3574_v16 = vpop.permute.xlu1 %905  ;;  %v3576_v58 = vpop.permute.xlu0 %945  ;;  %v1376_v17 = vmul.f32 %v3392_v53, %v4201_v63  ;;  %v1412_v41 = vmul.f32 %v3434_v59, %v3255_v4  ;;  %v476_v40 = vrot.slane %v3565_v45, 5  ;;  %v504_v63 = vmul.f32 %v3409_v52, %v3195_v29 }
 0x182   : > { %4196 = vst [vmem:[#allocation26_spill] sm:$0xff] %v3576_v58  ;;  %v462_v12 = vrot.slane %v454_v35, 5  ;;  %v471_v4 = vmul.f32 %v3434_v59, %v3184_v26  ;;  %v1416_v56 = vrot.slane %v1410_v50, 1  ;;  %v1439_v58 = vrot.slane %v3613_v19, 2 }
 0x183   : > { %1379 = vrot.lane.b32.xlu0 %v1375_v48, %s2686_s4  ;;  %1368 = vrot.lane.b32.xlu1 %v1363_v28, %s2686_s4  ;;  %v1432_v48 = vmul.f32 %v3422_v62, %v3474_v6  ;;  %v466_v28 = vadd.f32 %v461_v2, %v447_v18  ;;  %v1419_v35 = vrot.slane %v1412_v41, 1  ;;  %v1434_v26 = vmul.f32 %v3474_v6, %v3014_v33 }
 0x184   : > { %v477_v50 = vsel %vm458_vm8, %v475_v38, %v476_v40  ;;  %v478_v19 = vrot.slane %v471_v4, 5  ;;  %v489_v6 = vmul.f32 %v3217_v43, %v3014_v33  ;;  %v4203_v38 = vrot.slane %v3527_v46, 5 }
 0x185   : > { %v3602_v54 = vpop.permute.xlu1 %947  ;;  %v3604_v8 = vpop.permute.xlu0 %987  ;;  %v1438_v2 = vrot.slane %v1432_v48, 2  ;;  %v1452_v48 = vmul.f32 %v3409_v52, %v3258_v5  ;;  %v1420_v4 = vsel %vm318_vm4, %v1417_v51, %v1419_v35  ;;  %v1475_v43 = vmul.f32 %v3426_v32, %v3532_v20 }
 0x186   : > { %4199 = vst [vmem:[#allocation27_spill] sm:$0xff] %v3602_v54  ;;  %4200 = vst [vmem:[#allocation28_spill] sm:$0xff] %v3604_v8  ;;  %v494_v8 = vrot.slane %v3572_v23, 6  ;;  %v4202_v54 = vrot.slane %v3505_v36, 4  ;;  %v1418_v36 = vsel %vm318_vm4, %v1416_v56, %v1417_v51  ;;  %v1454_v46 = vmul.f32 %v3434_v59, %v3258_v5 }
 0x187   : > { %1401 = vrot.lane.b32.xlu0 %v1398_v42, %s2686_s4  ;;  %1381 = vrot.lane.b32.xlu1 %v1376_v17, %s2686_s4  ;;  %v3636_v17 = vmul.f32 %v3392_v53, %v3258_v5  ;;  %v497_v35 = vrot.slane %v489_v6, 6 }
 0x188   : > { %v444_v13 = vsel %vm423_vm7, %v4202_v54, %v443_v21  ;;  %v1400_v21 = vsel %vm318_vm4, %v1397_v14, %v1399_v11  ;;  %v3646_v54 = vmul.f32 %v3392_v53, %v3195_v29  ;;  %v482_v14 = vadd.f32 %v477_v50, %v466_v28 }
 0x189   : > { %v448_v18 = vadd.f32 %v444_v13, %v432_v31  ;;  %v3629_v45 = vpop.permute.xlu1 %989  ;;  %v3631_v23 = vpop.permute.xlu0 %1029  ;;  %v495_v31 = vrot.slane %v3593_v27, 6  ;;  %v463_v27 = vsel %vm458_vm8, %v4203_v38, %v462_v12  ;;  %v1440_v13 = vsel %vm353_vm5, %v1438_v2, %v1439_v58 }
 0x18a   : > { %v1459_v56 = vrot.slane %v3636_v17, 2  ;;  %v1474_v28 = vmul.f32 %v3422_v62, %v3532_v20  ;;  %v1458_v2 = vrot.slane %v1452_v48, 2  ;;  %v479_v17 = vsel %vm458_vm8, %v476_v40, %v478_v19 }
 0x18b   : > { %1421 = vrot.lane.b32.xlu0 %v1418_v36, %s2686_s4  ;;  %1403 = vrot.lane.b32.xlu1 %v1400_v21, %s2686_s4  ;;  %v467_v42 = vadd.f32 %v463_v27, %v448_v18  ;;  %v1441_v36 = vrot.slane %v1434_v26, 2  ;;  %v496_v12 = vsel %vm493_vm9, %v494_v8, %v495_v31  ;;  %v510_v18 = vrot.slane %v504_v63, 6 }
 0x18c   : > { %v511_v21 = vrot.slane %v3646_v54, 6  ;;  %v501_v51 = vadd.f32 %v496_v12, %v482_v14  ;;  %v506_v26 = vmul.f32 %v3434_v59, %v3195_v29  ;;  %v1460_v50 = vsel %vm353_vm5, %v1458_v2, %v1459_v56 }
 0x18d   : > { %v3657_v11 = vpop.permute.xlu1 %1031  ;;  %v3659_v41 = vpop.permute.xlu0 %1071  ;;  %v483_v5 = vadd.f32 %v479_v17, %v467_v42  ;;  %v1480_v54 = vrot.slane %v1474_v28, 3  ;;  %v1476_v48 = vmul.f32 %v3532_v20, %v3014_v33  ;;  %v1442_v14 = vsel %vm353_vm5, %v1439_v58, %v1441_v36 }
 0x18e   : > { %v1481_v40 = vrot.slane %v1475_v43, 3  ;;  %v1461_v19 = vrot.slane %v1454_v46, 2  ;;  %v1495_v29 = vmul.f32 %v3392_v53, %v3281_v37  ;;  %v512_v6 = vsel %vm493_vm9, %v510_v18, %v511_v21 }
 0x18f   : > { %1443 = vrot.lane.b32.xlu0 %v1440_v13, %s2686_s4  ;;  %1423 = vrot.lane.b32.xlu1 %v1420_v4, %s2686_s4  ;;  %v517_v38 = vadd.f32 %v512_v6, %v501_v51  ;;  %v513_v27 = vrot.slane %v506_v26, 6  ;;  %v498_v42 = vsel %vm493_vm9, %v495_v31, %v497_v35  ;;  %v1494_v33 = vmul.f32 %v3409_v52, %v3281_v37 }
 0x190   : > { %v502_v20 = vadd.f32 %v498_v42, %v483_v5  ;;  %v1483_v28 = vrot.slane %v1476_v48, 3  ;;  %v1496_v4 = vmul.f32 %v3434_v59, %v3281_v37  ;;  %v1516_v36 = vmul.f32 %v3422_v62, %v3540_v57 }
 0x191   : > { %v3681_v8 = vpop.permute.xlu1 %1073  ;;  %v3683_v63 = vpop.permute.xlu0 %1141  ;;  %v1482_v43 = vsel %vm388_vm6, %v1480_v54, %v1481_v40  ;;  %v1462_v31 = vsel %vm353_vm5, %v1459_v56, %v1461_v19  ;;  %v1501_v46 = vrot.slane %v1495_v29, 3  ;;  %v1517_v12 = vmul.f32 %v3426_v32, %v3540_v57 }
 0x192   : > { %v1535_v18 = vstv %s3674_s5  ;;  %v532_v37 = vadd.f32 %v3235_v49, %v517_v38  ;;  %v514_v2 = vsel %vm493_vm9, %v511_v21, %v513_v27  ;;  %v1500_v51 = vrot.slane %v1494_v33, 3  ;;  %s2421_s5 = sld [smem:[#allocation9 + $0x3e]] }
 0x193   : > { %1463 = vrot.lane.b32.xlu0 %v1460_v50, %s2686_s4  ;;  %1445 = vrot.lane.b32.xlu1 %v1442_v14, %s2686_s4  ;;  %v1557_v17 = vstv %s3679_s26  ;;  %v518_v56 = vadd.f32 %v514_v2, %v502_v20  ;;  %v1484_v5 = vsel %vm388_vm6, %v1481_v40, %v1483_v28  ;;  %v3724_v50 = vld [vmem:[#allocation4 + $0x10] sm:$0x3f]  ;;  %v1537_v49 = vmul.f32 %v3392_v53, %v1535_v18  ;;  %s2422_s26 = sld [smem:[#allocation9 + $0x14]] }
 0x194   : > { %v1518_v54 = vmul.f32 %v3724_v50, %v3540_v57  ;;  %v1502_v21 = vsel %vm388_vm6, %v1500_v51, %v1501_v46  ;;  %v1503_v48 = vrot.slane %v1496_v4, 3  ;;  %v1522_v14 = vrot.slane %v1516_v36, 4 }
 0x195   : > { %v3697_v58 = vpop.permute.xlu1 %1143  ;;  %v3699_v13 = vpop.permute.xlu0 %1183  ;;  %v1523_v19 = vrot.slane %v1517_v12, 4  ;;  %v1536_v29 = vmul.f32 %v3409_v52, %v1535_v18  ;;  %v545_v40 = vadd.f32 %v3127_v61, %v532_v37  ;;  %v533_v6 = vadd.f32 %v3260_v9, %v518_v56 }
 0x196   : > { %v1538_v57 = vmul.f32 %v3434_v59, %v1535_v18  ;;  %v1525_v42 = vrot.slane %v1518_v54, 4  ;;  %v1543_v33 = vrot.slane %v1537_v49, 4  ;;  %v1558_v20 = vmul.f32 %v3422_v62, %v1557_v17 }
 0x197   : > { %1485 = vrot.lane.b32.xlu0 %v1482_v43, %s2686_s4  ;;  %1465 = vrot.lane.b32.xlu1 %v1462_v31, %s2686_s4  ;;  %v1504_v4 = vsel %vm388_vm6, %v1501_v46, %v1503_v48  ;;  %v1524_v36 = vsel %vm423_vm7, %v1522_v14, %v1523_v19  ;;  %v1559_v43 = vmul.f32 %v3426_v32, %v1557_v17  ;;  %v1542_v61 = vrot.slane %v1536_v29, 4 }
 0x198   : > { %v1577_v9 = vstv %s3712_s25  ;;  %v546_v31 = vadd.f32 %v3164_v15, %v533_v6  ;;  %v1545_v18 = vrot.slane %v1538_v57, 4  ;;  %v1599_v37 = vstv %s3717_s16  ;;  %s2688_s25 = smov 122   ;;  %s3977_s16 = sld [smem:[#allocation9 + $0x45]] }
 0x199   : > { %v3719_v35 = vpop.permute.xlu1 %1185  ;;  %v3721_v26 = vpop.permute.xlu0 %1225  ;;  %v1526_v51 = vsel %vm423_vm7, %v1523_v19, %v1525_v42  ;;  %v1544_v56 = vsel %vm423_vm7, %v1542_v61, %v1543_v33  ;;  %v1560_v54 = vmul.f32 %v3724_v50, %v1557_v17  ;;  %v1565_v48 = vrot.slane %v1559_v43, 5 }
 0x19a   : > { %v1579_v14 = vmul.f32 %v3392_v53, %v1577_v9  ;;  %v1546_v19 = vsel %vm423_vm7, %v1543_v33, %v1545_v18  ;;  %v1578_v29 = vmul.f32 %v3409_v52, %v1577_v9  ;;  %v1580_v57 = vmul.f32 %v3434_v59, %v1577_v9 }
 0x19b   : > { %1487 = vrot.lane.b32.xlu1 %v1484_v5, %s2686_s4  ;;  %1505 = vrot.lane.b32.xlu0 %v1502_v21, %s2686_s4  ;;  %v1564_v5 = vrot.slane %v1558_v20, 5  ;;  %v1567_v6 = vrot.slane %v1560_v54, 5  ;;  %v1601_v42 = vmul.f32 %v3426_v32, %v1599_v37  ;;  %v1602_v61 = vmul.f32 %v3724_v50, %v1599_v37 }
 0x19c   : > { %v1584_v43 = vrot.slane %v1578_v29, 5  ;;  %v1587_v18 = vrot.slane %v1580_v57, 5 }
 0x19d   : > { %v3736_v38 = vpop.permute.xlu1 %1227  ;;  %v562_v27 = vpop.permute.xlu0 %561 }
 0x19e   : > { %v567_v28 = vadd.f32 %v562_v27, %v545_v40  ;;  %v1600_v27 = vmul.f32 %v3422_v62, %v1599_v37 }
 0x19f   : > { %1507 = vrot.lane.b32.xlu1 %v1504_v4, %s2686_s4  ;;  %1527 = vrot.lane.b32.xlu0 %v1524_v36, %s2686_s4  ;;  %v1585_v4 = vrot.slane %v1579_v14, 5 }
 0x1a0   : > { %v587_v12 = vadd.f32 %v3328_v34, %v567_v28 }
 0x1a1   : > { %v564_v2 = vpop.permute.xlu1 %563  ;;  %v604_v46 = vpop.permute.xlu0 %603 }
 0x1a2   : > { %v568_v49 = vadd.f32 %v564_v2, %v546_v31  ;;  %v609_v21 = vadd.f32 %v604_v46, %v587_v12  ;;  %v1568_v12 = vsel %vm458_vm8, %v1565_v48, %v1567_v6  ;;  %v1606_v2 = vrot.slane %v1600_v27, 6 }
 0x1a3   : > { %1529 = vrot.lane.b32.xlu1 %v1526_v51, %s2686_s4  ;;  %1547 = vrot.lane.b32.xlu0 %v1544_v56, %s2686_s4  ;;  %v1607_v46 = vrot.slane %v1601_v42, 6  ;;  %v1641_v42 = vstv %s3770_s20  ;;  %s3998_s20 = sld [smem:[#allocation9 + $0x4c]] }
 0x1a4   : > { %v588_v15 = vadd.f32 %v3360_v24, %v568_v49  ;;  %v629_v34 = vadd.f32 %v3362_v30, %v609_v21  ;;  %v1566_v24 = vsel %vm458_vm8, %v1564_v5, %v1565_v48  ;;  %v1619_v30 = vstv %s3745_s18  ;;  %s3981_s18 = sld [smem:[#allocation9 + $0x1b]] }
 0x1a5   : > { %v606_v40 = vpop.permute.xlu1 %605  ;;  %v646_v17 = vpop.permute.xlu0 %645  ;;  %v1620_v54 = vmul.f32 %v3409_v52, %v1619_v30  ;;  %v1588_v48 = vsel %vm458_vm8, %v1585_v4, %v1587_v18  ;;  %v1608_v14 = vsel %vm493_vm9, %v1606_v2, %v1607_v46 }
 0x1a6   : > { %v610_v20 = vadd.f32 %v606_v40, %v588_v15  ;;  %v651_v28 = vadd.f32 %v646_v17, %v629_v34  ;;  %v1609_v15 = vrot.slane %v1602_v61, 6  ;;  %v1654_v61 = vstv %s3784_s19  ;;  %s4020_s19 = sld [smem:[#allocation9 + $0x53]] }
 0x1a7   : > { %1549 = vrot.lane.b32.xlu1 %v1546_v19, %s2686_s4  ;;  %1569 = vrot.lane.b32.xlu0 %v1566_v24, %s2686_s4  ;;  %v1626_v17 = vrot.slane %v1620_v54, 6 }
 0x1a8   : > { %v630_v33 = vadd.f32 %v3387_v44, %v610_v20  ;;  %v671_v36 = vadd.f32 %v3389_v22, %v651_v28  ;;  %v1586_v44 = vsel %vm458_vm8, %v1584_v43, %v1585_v4  ;;  %v1621_v22 = vmul.f32 %v3392_v53, %v1619_v30 }
 0x1a9   : > { %v648_v9 = vpop.permute.xlu1 %647  ;;  %v688_v31 = vpop.permute.xlu0 %687  ;;  %v1610_v27 = vsel %vm493_vm9, %v1607_v46, %v1609_v15  ;;  %v1669_v20 = vstv %s3773_s27  ;;  %v1642_v43 = vmul.f32 %v3422_v62, %v1641_v42  ;;  %s4003_s27 = sld [smem:[#allocation9 + $0x22]] }
 0x1aa   : > { %v652_v51 = vadd.f32 %v648_v9, %v630_v33  ;;  %v693_v56 = vadd.f32 %v688_v31, %v671_v36  ;;  %v1627_v29 = vrot.slane %v1621_v22, 6  ;;  %v1670_v9 = vmul.f32 %v3422_v62, %v1669_v20  ;;  %v4204_v31 = vld [vmem:[#allocation22_spill] sm:$0xff] }
 0x1ab   : > { %1571 = vrot.lane.b32.xlu1 %v1568_v12, %s2686_s4  ;;  %1589 = vrot.lane.b32.xlu0 %v1586_v44, %s2686_s4  ;;  %v1671_v46 = vmul.f32 %v3426_v32, %v1669_v20  ;;  %v1643_v44 = vmul.f32 %v3426_v32, %v1641_v42 }
 0x1ac   : > { %v672_v37 = vadd.f32 %v3417_v7, %v652_v51  ;;  %v713_v5 = vadd.f32 %v3419_v39, %v693_v56  ;;  %v1622_v7 = vmul.f32 %v3434_v59, %v1619_v30  ;;  %v1628_v4 = vsel %vm493_vm9, %v1626_v17, %v1627_v29 }
 0x1ad   : > { %v690_v49 = vpop.permute.xlu1 %689  ;;  %v730_v21 = vpop.permute.xlu0 %729  ;;  %v1676_v54 = vrot.slane %v1670_v9, 1 }
 0x1ae   : > { %v694_v34 = vadd.f32 %v690_v49, %v672_v37  ;;  %v735_v19 = vadd.f32 %v730_v21, %v713_v5  ;;  %v1629_v30 = vrot.slane %v1622_v7, 6  ;;  %v1655_v5 = vmul.f32 %v3409_v52, %v1654_v61 }
 0x1af   : > { %1591 = vrot.lane.b32.xlu1 %v1588_v48, %s2686_s4  ;;  %1611 = vrot.lane.b32.xlu0 %v1608_v14, %s2686_s4  ;;  %v1689_v49 = vstv %s3791_s23  ;;  %v1711_v21 = vstv %s3796_s24  ;;  %v4206_v48 = vld [vmem:[#allocation23_spill] sm:$0xff]  ;;  %s4023_s23 = sld [smem:[#allocation9 + $0x29]] }
 0x1b0   : > { %v714_v39 = vadd.f32 %v3454_v1, %v694_v34  ;;  %v755_v40 = vadd.f32 %v3456_v55, %v735_v19  ;;  %v1630_v2 = vsel %vm493_vm9, %v1627_v29, %v1629_v30  ;;  %v1677_v34 = vrot.slane %v1671_v46, 1  ;;  %v4207_v29 = vld [vmem:[#allocation19_spill] sm:$0xff]  ;;  %s2429_s24 = sld [smem:[#allocation9 + $0x5a]] }
 0x1b1   : > { %v732_v6 = vpop.permute.xlu1 %731  ;;  %v772_v57 = vpop.permute.xlu0 %771  ;;  %v1691_v19 = vmul.f32 %v3392_v53, %v1689_v49  ;;  %v1692_v17 = vmul.f32 %v3434_v59, %v1689_v49  ;;  %v1712_v42 = vmul.f32 %v3422_v62, %v1711_v21 }
 0x1b2   : > { %v736_v28 = vadd.f32 %v732_v6, %v714_v39  ;;  %v777_v24 = vadd.f32 %v772_v57, %v755_v40  ;;  %v1690_v40 = vmul.f32 %v3409_v52, %v1689_v49 }
 0x1b3   : > { %1613 = vrot.lane.b32.xlu1 %v1610_v27, %s2686_s4  ;;  %1631 = vrot.lane.b32.xlu0 %v1628_v4, %s2686_s4  ;;  %v1656_v27 = vmul.f32 %v3392_v53, %v1654_v61  ;;  %v1678_v4 = vsel %vm318_vm4, %v1676_v54, %v1677_v34  ;;  %v1697_v30 = vrot.slane %v1691_v19, 1 }
 0x1b4   : > { %v756_v55 = vadd.f32 %v3492_v25, %v736_v28  ;;  %v797_v1 = vadd.f32 %v3494_v47, %v777_v24  ;;  %v1672_v25 = vmul.f32 %v3724_v50, %v1669_v20  ;;  %v4205_v47 = vld [vmem:[#allocation18_spill] sm:$0xff]  ;;  %v1713_v20 = vmul.f32 %v3426_v32, %v1711_v21 }
 0x1b5   : > { %v774_v33 = vpop.permute.xlu1 %773  ;;  %v842_v36 = vpop.permute.xlu0 %841 }
 0x1b6   : > { %v812_v12 = vadd.f32 %v4204_v31, %v797_v1  ;;  %v778_v18 = vadd.f32 %v774_v33, %v756_v55  ;;  %v1714_v55 = vmul.f32 %v3724_v50, %v1711_v21  ;;  %v1718_v31 = vrot.slane %v1712_v42, 2 }
 0x1b7   : > { %1633 = vrot.lane.b32.xlu1 %v1630_v2, %s2686_s4  ;;  %1646 = vrot.lane.b32.xlu0 %v1642_v43, %s2687_s30  ;;  %v1699_v43 = vrot.slane %v1692_v17, 1  ;;  %v1753_v2 = vstv %s3820_s0  ;;  %s3960_s4 = sld [smem:[#allocation9 + $0x37]]  ;;  %s2334_s0 = sshll.u32 %s2824_s3, 4 }
 0x1b8   : > { %v825_v51 = vadd.f32 %v4205_v47, %v812_v12  ;;  %v798_v56 = vadd.f32 %v3517_v60, %v778_v18  ;;  %v1679_v60 = vrot.slane %v1672_v25, 1  ;;  %v1719_v12 = vrot.slane %v1713_v20, 2 }
 0x1b9   : > { %v844_v22 = vpop.permute.xlu1 %843  ;;  %v884_v37 = vpop.permute.xlu0 %883  ;;  %v1731_v18 = vstv %s3815_s7  ;;  %v1700_v54 = vsel %vm318_vm4, %v1697_v30, %v1699_v43  ;;  %s2431_s7 = sld [smem:[#allocation9 + $0x61]] }
 0x1ba   : > { %v813_v14 = vadd.f32 %v4206_v48, %v798_v56  ;;  %v847_v15 = vadd.f32 %v842_v36, %v825_v51  ;;  %v1696_v36 = vrot.slane %v1690_v40, 1  ;;  %v1733_v51 = vmul.f32 %v3392_v53, %v1731_v18  ;;  %v4208_v56 = vld [vmem:[#allocation26_spill] sm:$0xff] }
 0x1bb   : > { %1648 = vrot.lane.b32.xlu1 %v1643_v44, %s2687_s30  ;;  %1659 = vrot.lane.b32.xlu0 %v1655_v5, %s2687_s30  ;;  %v1720_v49 = vsel %vm353_vm5, %v1718_v31, %v1719_v12  ;;  %v1734_v21 = vmul.f32 %v3434_v59, %v1731_v18  ;;  %v1754_v48 = vmul.f32 %v3422_v62, %v1753_v2 }
 0x1bc   : > { %v826_v7 = vadd.f32 %v4207_v29, %v813_v14  ;;  %v867_v39 = vadd.f32 %v3519_v0, %v847_v15  ;;  %v1680_v0 = vsel %vm318_vm4, %v1677_v34, %v1679_v60  ;;  %v1698_v47 = vsel %vm318_vm4, %v1696_v36, %v1697_v30  ;;  %v4209_v29 = vld [vmem:[#allocation27_spill] sm:$0xff] }
 0x1bd   : > { %v886_v6 = vpop.permute.xlu1 %885  ;;  %v926_v57 = vpop.permute.xlu0 %925  ;;  %v1739_v34 = vrot.slane %v1733_v51, 2  ;;  %v1773_v60 = vstv %s3838_s6  ;;  %v1741_v42 = vrot.slane %v1734_v21, 2  ;;  %v1760_v20 = vrot.slane %v1754_v48, 3  ;;  %v4211_v48 = vld [vmem:[#allocation24_spill] sm:$0xff]  ;;  %s2440_s6 = sshll.u32 %s2666_s12, 8 }
 0x1be   : > { %v848_v28 = vadd.f32 %v844_v22, %v826_v7  ;;  %v889_v24 = vadd.f32 %v884_v37, %v867_v39  ;;  %v1732_v22 = vmul.f32 %v3409_v52, %v1731_v18  ;;  %v4210_v39 = vld [vmem:[#allocation28_spill] sm:$0xff]  ;;  %v1776_v18 = vmul.f32 %v3434_v59, %v1773_v60 }
 0x1bf   : > { %1661 = vrot.lane.b32.xlu1 %v1656_v27, %s2687_s30  ;;  %1681 = vrot.lane.b32.xlu0 %v1678_v4, %s2687_s30  ;;  %v1742_v31 = vsel %vm353_vm5, %v1739_v34, %v1741_v42 }
 0x1c0   : > { %v868_v1 = vadd.f32 %v3543_v3, %v848_v28  ;;  %v909_v33 = vadd.f32 %v3545_v10, %v889_v24  ;;  %v1721_v3 = vrot.slane %v1714_v55, 2  ;;  %v1738_v17 = vrot.slane %v1732_v22, 2 }
 0x1c1   : > { %v928_v61 = vpop.permute.xlu1 %927  ;;  %v968_v9 = vpop.permute.xlu0 %967  ;;  %v1775_v28 = vmul.f32 %v3392_v53, %v1773_v60  ;;  %v1795_v24 = vstv %s3844_s17  ;;  %s192_s17 = scalar_lea.vmem [#allocation10], %s2334_s0 }
 0x1c2   : > { %v890_v46 = vadd.f32 %v886_v6, %v868_v1  ;;  %v931_v25 = vadd.f32 %v926_v57, %v909_v33  ;;  %v1722_v19 = vsel %vm353_vm5, %v1719_v12, %v1721_v3  ;;  %v1756_v6 = vmul.f32 %v3724_v50, %v1753_v2 }
 0x1c3   : > { %1683 = vrot.lane.b32.xlu1 %v1680_v0, %s2687_s30  ;;  %1701 = vrot.lane.b32.xlu0 %v1698_v47, %s2687_s30  ;;  %v1740_v0 = vsel %vm353_vm5, %v1738_v17, %v1739_v34  ;;  %v1774_v1 = vmul.f32 %v3409_v52, %v1773_v60  ;;  %v1781_v12 = vrot.slane %v1775_v28, 3  ;;  %v1797_v51 = vmul.f32 %v3426_v32, %v1795_v24 }
 0x1c4   : > { %v910_v10 = vadd.f32 %v3574_v16, %v890_v46  ;;  %v951_v44 = vadd.f32 %v4208_v56, %v931_v25  ;;  %v1755_v16 = vmul.f32 %v3426_v32, %v1753_v2  ;;  %v1763_v43 = vrot.slane %v1756_v6, 3 }
 0x1c5   : > { %v970_v37 = vpop.permute.xlu1 %969  ;;  %v1010_v5 = vpop.permute.xlu0 %1009  ;;  %v1796_v2 = vmul.f32 %v3422_v62, %v1795_v24  ;;  %v1803_v34 = vrot.slane %v1797_v51, 4 }
 0x1c6   : > { %v932_v14 = vadd.f32 %v928_v61, %v910_v10  ;;  %v973_v15 = vadd.f32 %v968_v9, %v951_v44  ;;  %v1761_v55 = vrot.slane %v1755_v16, 3  ;;  %v1815_v44 = vstv %s3865_s29  ;;  %s2227_s29 = sshll.u32 %s192_s17, 4  ;;  %s4096_s29 = int_to_ptr.vmem [resolvable:$true] %s2227_s29 }
 0x1c7   : > { %1703 = vrot.lane.b32.xlu1 %v1700_v54, %s2687_s30  ;;  %1723 = vrot.lane.b32.xlu0 %v1720_v49, %s2687_s30  ;;  %v1783_v54 = vrot.slane %v1776_v18, 3  ;;  %v1802_v49 = vrot.slane %v1796_v2, 4  ;;  %v1817_v21 = vmul.f32 %v3392_v53, %v1815_v44  ;;  %v1816_v16 = vmul.f32 %v3409_v52, %v1815_v44  ;;  %s2590_s12 = scalar_lea.vmem %s4096_s29, 256 }
 0x1c8   : > { %v952_v7 = vadd.f32 %v4209_v29, %v932_v14  ;;  %v993_v40 = vadd.f32 %v4210_v39, %v973_v15  ;;  %v1762_v47 = vsel %vm388_vm6, %v1760_v20, %v1761_v55  ;;  %v1764_v56 = vsel %vm388_vm6, %v1761_v55, %v1763_v43  ;;  %v3918_v43 = vld [vmem:[#allocation4 + $0x20] sm:$0xff]  ;;  %p2591_p3 = scmp.ne.s32.totalorder %s4096_s29, %s2590_s12 }
 0x1c9   : > { %v1012_v57 = vpop.permute.xlu1 %1011  ;;  %v1052_v27 = vpop.permute.xlu0 %1051  ;;  %v1784_v39 = vsel %vm388_vm6, %v1781_v12, %v1783_v54  ;;  %v1818_v17 = vmul.f32 %v3434_v59, %v1815_v44  ;;  %v1804_v20 = vsel %vm423_vm7, %v1802_v49, %v1803_v34  ;;  %v1822_v28 = vrot.slane %v1816_v16, 4 }
 0x1ca   : > { %v974_v4 = vadd.f32 %v970_v37, %v952_v7  ;;  %v1015_v30 = vadd.f32 %v1010_v5, %v993_v40  ;;  %v1823_v40 = vrot.slane %v1817_v21, 4  ;;  %v1879_v18 = vstv %s3895_s1  ;;  %s4094_s1 = scalar_lea.hbm %s4147_s2, %s2440_s6  ;;  %p2592_p12 = pnand %p2591_p3, %p4215_p7 }
 0x1cb   : > { %1725 = vrot.lane.b32.xlu1 %v1722_v19, %s2687_s30  ;;  %1743 = vrot.lane.b32.xlu0 %v1740_v0, %s2687_s30  ;;  %v4212_v19 = vld [vmem:[#allocation20_spill] sm:$0xff]  ;;  %v1857_v0 = vstv %s3889_s15  ;;  %v1882_v16 = vmul.f32 %v3724_v50, %v1879_v18 }
 0x1cc   : > { %v994_v33 = vadd.f32 %v3629_v45, %v974_v4  ;;  %v1035_v36 = vadd.f32 %v3631_v23, %v1015_v30  ;;  %v1780_v45 = vrot.slane %v1774_v1, 3  ;;  %v1798_v23 = vmul.f32 %v3724_v50, %v1795_v24  ;;  %v4214_v24 = vld [vmem:[#allocation21_spill] sm:$0xff]  ;;  %p2593_p2 = pneg %p2592_p12 }
 0x1cd   : > { %v1054_v61 = vpop.permute.xlu1 %1053  ;;  %v1122_v9 = vpop.permute.xlu0 %1121 }
 0x1ce   : > { %v1016_v46 = vadd.f32 %v1012_v57, %v994_v33  ;;  %v1057_v25 = vadd.f32 %v1052_v27, %v1035_v36  ;;  %v1782_v5 = vsel %vm388_vm6, %v1780_v45, %v1781_v12  ;;  %v4213_v57 = vld [vmem:[#allocation25_spill] sm:$0xff]  ;;  %v1825_v33 = vrot.slane %v1818_v17, 4 }
 0x1cf   : > { %1745 = vrot.lane.b32.xlu1 %v1742_v31, %s2687_s30  ;;  %1765 = vrot.lane.b32.xlu0 %v1762_v47, %s2687_s30 }
 0x1d0   : > { %v1036_v3 = vadd.f32 %v3657_v11, %v1016_v46  ;;  %v1077_v10 = vadd.f32 %v3659_v41, %v1057_v25  ;;  %v1837_v11 = vstv %s3870_s8  ;;  %v1805_v41 = vrot.slane %v1798_v23, 4 }
 0x1d1   : > { %v1124_v22 = vpop.permute.xlu1 %1123  ;;  %v1164_v37 = vpop.permute.xlu0 %1163  ;;  %v1838_v6 = vmul.f32 %v3422_v62, %v1837_v11  ;;  %v1839_v52 = vmul.f32 %v3426_v32, %v1837_v11  ;;  %v1840_v62 = vmul.f32 %v3724_v50, %v1837_v11  ;;  %v1824_v32 = vsel %vm423_vm7, %v1822_v28, %v1823_v40 }
 0x1d2   : > { %v1092_v14 = vadd.f32 %v4211_v48, %v1077_v10  ;;  %v1058_v15 = vadd.f32 %v1054_v61, %v1036_v3  ;;  %v1859_v61 = vmul.f32 %v3918_v43, %v1857_v0  ;;  %v1826_v23 = vsel %vm423_vm7, %v1823_v40, %v1825_v33 }
 0x1d3   : > { %1767 = vrot.lane.b32.xlu1 %v1764_v56, %s2687_s30  ;;  %1785 = vrot.lane.b32.xlu0 %v1782_v5, %s2687_s30  ;;  %v1844_v36 = vrot.slane %v1838_v6, 5  ;;  %v1845_v12 = vrot.slane %v1839_v52, 5  ;;  %v1847_v47 = vrot.slane %v1840_v62, 5  ;;  %v1860_v10 = vmul.f32 %v3434_v59, %v1857_v0  ;;  %v3931_v56 = vld [vmem:[#allocation4] sm:$0xff] }
 0x1d4   : > { %v1105_v60 = vadd.f32 %v4212_v19, %v1092_v14  ;;  %v1078_v29 = vadd.f32 %v3681_v8, %v1058_v15  ;;  %v1806_v8 = vsel %vm423_vm7, %v1803_v34, %v1805_v41  ;;  %v1865_v3 = vrot.slane %v1859_v61, 5 }
 0x1d5   : > { %v1166_v7 = vpop.permute.xlu1 %1165  ;;  %v1206_v53 = vpop.permute.xlu0 %1205  ;;  %v1880_v44 = vmul.f32 %v3931_v56, %v1879_v18  ;;  %v1846_v5 = vsel %vm458_vm8, %v1844_v36, %v1845_v12  ;;  %v1848_v21 = vsel %vm458_vm8, %v1845_v12, %v1847_v47  ;;  %v1899_v48 = vstv %s3915_s11  ;;  %s2214_s11 = scalar_lea.sflag [#allocation7], %s2824_s3 }
 0x1d6   : > { %v1093_v27 = vadd.f32 %v4213_v57, %v1078_v29  ;;  %v1127_v42 = vadd.f32 %v1122_v9, %v1105_v60  ;;  %v1867_v11 = vrot.slane %v1860_v10, 5  ;;  %v1889_v6 = vrot.slane %v1882_v16, 6  ;;  %v3956_v57 = vld [vmem:[#allocation4 + $0x28] sm:$0x3f] }
 0x1d7   : > { %1787 = vrot.lane.b32.xlu1 %v1784_v39, %s2687_s30  ;;  %1807 = vrot.lane.b32.xlu0 %v1804_v20, %s2687_s30  ;;  %v1886_v41 = vrot.slane %v1880_v44, 6  ;;  %v1949_v36 = vstv %s3949_s28 }
 0x1d8   : > { %v1106_v4 = vadd.f32 %v4214_v24, %v1093_v27  ;;  %v1147_v30 = vadd.f32 %v3683_v63, %v1127_v42  ;;  %v3924_v63 = vld [vmem:[#allocation4 + $0x18] sm:$0xff]  ;;  %v1868_v17 = vsel %vm458_vm8, %v1865_v3, %v1867_v11  ;;  %v1902_v27 = vmul.f32 %v3956_v57, %v1899_v48 }
 0x1d9   : > { %v1208_v55 = vpop.permute.xlu1 %1207  ;;  %v1248_v1 = vpop.permute.xlu0 %1247  ;;  %v1858_v2 = vmul.f32 %v3924_v63, %v1857_v0 }
 0x1da   : > { %v1128_v9 = vadd.f32 %v1124_v22, %v1106_v4  ;;  %v1169_v31 = vadd.f32 %v1164_v37, %v1147_v30  ;;  %v1909_v0 = vrot.slane %v1902_v27, 6 }
 0x1db   : > { %1809 = vrot.lane.b32.xlu1 %v1806_v8, %s2687_s30  ;;  %1827 = vrot.lane.b32.xlu0 %v1824_v32, %s2687_s30  ;;  %v1864_v54 = vrot.slane %v1858_v2, 5 }
 0x1dc   : > { %v1148_v46 = vadd.f32 %v3697_v58, %v1128_v9  ;;  %v1189_v25 = vadd.f32 %v3699_v13, %v1169_v31  ;;  %v3935_v58 = vld [vmem:[#allocation4 + $0x8] sm:$0xff] }
 0x1dd   : > { %v1250_v51 = vpop.permute.xlu1 %1249  ;;  %v1268_v45 = vpop.permute.xlu0 %1267  ;;  %v1881_v13 = vmul.f32 %v3935_v58, %v1879_v18  ;;  %v1866_v34 = vsel %vm458_vm8, %v1864_v54, %v1865_v3  ;;  %v1950_v18 = vmul.f32 %v3931_v56, %v1949_v36  ;;  %v1951_v2 = vmul.f32 %v3935_v58, %v1949_v36 }
 0x1de   : > { %v1170_v22 = vadd.f32 %v1166_v7, %v1148_v46  ;;  %v1211_v37 = vadd.f32 %v1206_v53, %v1189_v25  ;;  %v1900_v53 = vmul.f32 %v3924_v63, %v1899_v48 }
 0x1df   : > { %1829 = vrot.lane.b32.xlu1 %v1826_v23, %s2687_s30  ;;  %1849 = vrot.lane.b32.xlu0 %v1846_v5, %s2687_s30  ;;  %v1887_v29 = vrot.slane %v1881_v13, 6  ;;  %v1952_v23 = vmul.f32 %v3724_v50, %v1949_v36  ;;  %v1969_v5 = vstv %s2421_s5 }
 0x1e0   : > { %v1190_v49 = vadd.f32 %v3719_v35, %v1170_v22  ;;  %v1231_v59 = vadd.f32 %v3721_v26, %v1211_v37  ;;  %v1901_v35 = vmul.f32 %v3918_v43, %v1899_v48  ;;  %v1906_v24 = vrot.slane %v1900_v53, 6 }
 0x1e1   : > { %v1270_v14 = vpop.permute.xlu1 %1269  ;;  %v1290_v15 = vpop.permute.xlu0 %1289  ;;  %v1888_v52 = vsel %vm493_vm9, %v1886_v41, %v1887_v29  ;;  %v1890_v62 = vsel %vm493_vm9, %v1887_v29, %v1889_v6  ;;  %v1956_v22 = vrot.slane %v1950_v18, 1  ;;  %v1957_v37 = vrot.slane %v1951_v2, 1 }
 0x1e2   : > { %v1212_v19 = vadd.f32 %v1208_v55, %v1190_v49  ;;  %v1253_v60 = vadd.f32 %v1248_v1, %v1231_v59  ;;  %v1907_v8 = vrot.slane %v1901_v35, 6  ;;  %v1921_v55 = vstv %s3946_s13  ;;  %s2689_s13 = smov [#allocation10]  }
 0x1e3   : > { %1851 = vrot.lane.b32.xlu1 %v1848_v21, %s2687_s30  ;;  %1869 = vrot.lane.b32.xlu0 %v1866_v34, %s2687_s30  ;;  %v1922_v12 = vmul.f32 %v3931_v56, %v1921_v55  ;;  %v1971_v49 = vmul.f32 %v3918_v43, %v1969_v5  ;;  %v1991_v59 = vstv %s2422_s26  ;;  %v1959_v21 = vrot.slane %v1952_v23, 1  ;;  %s2594_s28 = sshll.u32 %s2689_s13, 4  ;;  %s2595_s28 = int_to_ptr.vmem [resolvable:$false] %s2594_s28 }
 0x1e4   : > { %v1232_v26 = vadd.f32 %v3736_v38, %v1212_v19  ;;  %v1273_v7 = vadd.f32 %v1268_v45, %v1253_v60  ;;  %v1908_v33 = vsel %vm493_vm9, %v1906_v24, %v1907_v8  ;;  %v1910_v47 = vsel %vm493_vm9, %v1907_v8, %v1909_v0  ;;  %p2597_p1 = scmp.lt.s32.totalorder %s4096_s29, %s2595_s28 }
 0x1e5   : > { %v1292_v39 = vpop.permute.xlu1 %1291  ;;  %v1310_v40 = vpop.permute.xlu0 %1309  ;;  %v1923_v45 = vmul.f32 %v3935_v58, %v1921_v55  ;;  %v1970_v48 = vmul.f32 %v3924_v63, %v1969_v5  ;;  %v1958_v11 = vsel %vm318_vm4, %v1956_v22, %v1957_v37  ;;  %v1972_v41 = vmul.f32 %v3956_v57, %v1969_v5 }
 0x1e6   : > { %v1254_v42 = vadd.f32 %v1250_v51, %v1232_v26  ;;  %v1295_v20 = vadd.f32 %v1290_v15, %v1273_v7  ;;  %v1934_v51 = vstv %s3960_s4  ;;  %v1992_v16 = vmul.f32 %v3931_v56, %v1991_v59  ;;  %s2596_s4 = scalar_lea.vmem %s2595_s28, 512 }
 0x1e7   : > { %1871 = vrot.lane.b32.xlu1 %v1868_v17, %s2687_s30  ;;  %1891 = vrot.lane.b32.xlu0 %v1888_v52, %s2687_s30  ;;  %v1935_v44 = vmul.f32 %v3924_v63, %v1934_v51  ;;  %v1936_v34 = vmul.f32 %v3918_v43, %v1934_v51  ;;  %v1977_v29 = vrot.slane %v1971_v49, 1  ;;  %v1993_v35 = vmul.f32 %v3935_v58, %v1991_v59  ;;  %p2598_p10 = scmp.lt.s32.totalorder %s2596_s4, %s2590_s12 }
 0x1e8   : > { %v1274_v38 = vadd.f32 %v1270_v14, %v1254_v42  ;;  %v1315_v28 = vadd.f32 %v1310_v40, %v1295_v20  ;;  %v1960_v26 = vsel %vm318_vm4, %v1957_v37, %v1959_v21  ;;  %v1976_v7 = vrot.slane %v1970_v48, 1 }
 0x1e9   : > { %v1312_v4 = vpop.permute.xlu1 %1311  ;;  %v1332_v30 = vpop.permute.xlu0 %1331  ;;  %v2011_v53 = vstv %s3977_s16  ;;  %v1979_v6 = vrot.slane %v1972_v41, 1  ;;  %v1998_v27 = vrot.slane %v1992_v16, 2  ;;  %v1994_v42 = vmul.f32 %v3724_v50, %v1991_v59  ;;  %p2599_p8 = por %p2598_p10, %p2597_p1 }
 0x1ea   : > { %v1296_v1 = vadd.f32 %v1292_v39, %v1274_v38  ;;  %v1337_v32 = vadd.f32 %v1332_v30, %v1315_v28  ;;  %v2033_v39 = vstv %s3981_s18  ;;  %v2013_v20 = vmul.f32 %v3918_v43, %v2011_v53 }
 0x1eb   : > { %1893 = vrot.lane.b32.xlu1 %v1890_v62, %s2687_s30  ;;  %1911 = vrot.lane.b32.xlu0 %v1908_v33, %s2687_s30  ;;  %v1978_v38 = vsel %vm318_vm4, %v1976_v7, %v1977_v29  ;;  %v1999_v28 = vrot.slane %v1993_v35, 2  ;;  %v2012_v24 = vmul.f32 %v3924_v63, %v2011_v53  ;;  %v1980_v0 = vsel %vm318_vm4, %v1977_v29, %v1979_v6  ;;  %p2600_p9 = pnand %p2599_p8, %p2593_p2 }
 0x1ec   : > { %v1316_v61 = vadd.f32 %v1312_v4, %v1296_v1  ;;  %v2014_v4 = vmul.f32 %v3956_v57, %v2011_v53  ;;  %v2001_v55 = vrot.slane %v1994_v42, 2  ;;  %v2019_v1 = vrot.slane %v2013_v20, 2 }
 0x1ed   : > { %v1334_v9 = vpop.permute.xlu1 %1333  ;;  %v1352_v31 = vpop.permute.xlu0 %1351  ;;  %v2036_v18 = vmul.f32 %v3724_v50, %v2033_v39  ;;  %v2053_v2 = vstv %s3998_s20  ;;  %v2075_v22 = vstv %s4003_s27 }
 0x1ee   : > { %v1338_v46 = vadd.f32 %v1334_v9, %v1316_v61  ;;  %v1357_v25 = vadd.f32 %v1352_v31, %v1337_v32  ;;  %v2034_v32 = vmul.f32 %v3931_v56, %v2033_v39  ;;  %v2000_v61 = vsel %vm353_vm5, %v1998_v27, %v1999_v28 }
 0x1ef   : > { %1913 = vrot.lane.b32.xlu1 %v1910_v47, %s2687_s30  ;;  %1926 = vrot.lane.b32.xlu0 %v1922_v12, %s2688_s25  ;;  %v2035_v9 = vmul.f32 %v3935_v58, %v2033_v39  ;;  %v2018_v31 = vrot.slane %v2012_v24, 2  ;;  %v2021_v12 = vrot.slane %v2014_v4, 2  ;;  %v2002_v47 = vsel %vm353_vm5, %v1999_v28, %v2001_v55  ;;  %s4043_s30 = sld [smem:[#allocation9 + $0x30]] }
 0x1f0   : > { %v2055_v23 = vmul.f32 %v3918_v43, %v2053_v2  ;;  %v2054_v37 = vmul.f32 %v3924_v63, %v2053_v2  ;;  %v2043_v5 = vrot.slane %v2036_v18, 3  ;;  %v2076_v21 = vmul.f32 %v3931_v56, %v2075_v22 }
 0x1f1   : > { %v1354_v3 = vpop.permute.xlu1 %1353  ;;  %v1367_v10 = vpop.permute.xlu0 %1366  ;;  %v2020_v51 = vsel %vm353_vm5, %v2018_v31, %v2019_v1  ;;  %v2077_v48 = vmul.f32 %v3935_v58, %v2075_v22  ;;  %v2095_v39 = vstv %s4020_s19  ;;  %v2117_v27 = vstv %s4023_s23 }
 0x1f2   : > { %v1358_v13 = vadd.f32 %v1354_v3, %v1338_v46  ;;  %v1372_v54 = vadd.f32 %v1367_v10, %v1357_v25  ;;  %v2061_v59 = vrot.slane %v2055_v23, 3  ;;  %v2060_v41 = vrot.slane %v2054_v37, 3 }
 0x1f3   : > { %1928 = vrot.lane.b32.xlu1 %v1923_v45, %s2688_s25  ;;  %1939 = vrot.lane.b32.xlu0 %v1935_v44, %s2688_s25  ;;  %v2040_v45 = vrot.slane %v2034_v32, 3  ;;  %v2041_v44 = vrot.slane %v2035_v9, 3  ;;  %v2082_v7 = vrot.slane %v2076_v21, 4  ;;  %v2083_v53 = vrot.slane %v2077_v48, 4 }
 0x1f4   : > { %v2097_v6 = vmul.f32 %v3918_v43, %v2095_v39  ;;  %v2096_v42 = vmul.f32 %v3924_v63, %v2095_v39  ;;  %v2098_v20 = vmul.f32 %v3956_v57, %v2095_v39  ;;  %v2118_v24 = vmul.f32 %v3931_v56, %v2117_v27 }
 0x1f5   : > { %v1369_v14 = vpop.permute.xlu1 %1368  ;;  %v1380_v15 = vpop.permute.xlu0 %1379  ;;  %v2044_v16 = vsel %vm388_vm6, %v2041_v44, %v2043_v5  ;;  %v2119_v4 = vmul.f32 %v3935_v58, %v2117_v27 }
 0x1f6   : > { %v1373_v19 = vadd.f32 %v1369_v14, %v1358_v13  ;;  %v1385_v60 = vadd.f32 %v1380_v15, %v1372_v54  ;;  %v2056_v13 = vmul.f32 %v3956_v57, %v2053_v2  ;;  %v2103_v55 = vrot.slane %v2097_v6, 4 }
 0x1f7   : > { %1941 = vrot.lane.b32.xlu1 %v1936_v34, %s2688_s25  ;;  %1961 = vrot.lane.b32.xlu0 %v1958_v11, %s2688_s25  ;;  %v2022_v34 = vsel %vm353_vm5, %v2019_v1, %v2021_v12  ;;  %v2042_v11 = vsel %vm388_vm6, %v2040_v45, %v2041_v44  ;;  %v2102_v1 = vrot.slane %v2096_v42, 4  ;;  %v2105_v32 = vrot.slane %v2098_v20, 4 }
 0x1f8   : > { %v2124_v9 = vrot.slane %v2118_v24, 5  ;;  %v2125_v31 = vrot.slane %v2119_v4, 5  ;;  %v2120_v12 = vmul.f32 %v3724_v50, %v2117_v27  ;;  %v2159_v45 = vstv %s4043_s30 }
 0x1f9   : > { %v1382_v40 = vpop.permute.xlu1 %1381  ;;  %v1402_v17 = vpop.permute.xlu0 %1401 }
 0x1fa   : > { %v1386_v52 = vadd.f32 %v1382_v40, %v1373_v19  ;;  %v1407_v8 = vadd.f32 %v1402_v17, %v1385_v60  ;;  %v2063_v19 = vrot.slane %v2056_v13, 3  ;;  %v2078_v60 = vmul.f32 %v3724_v50, %v2075_v22 }
 0x1fb   : > { %1963 = vrot.lane.b32.xlu1 %v1960_v26, %s2688_s25  ;;  %1981 = vrot.lane.b32.xlu0 %v1978_v38, %s2688_s25  ;;  %v2062_v26 = vsel %vm388_vm6, %v2060_v41, %v2061_v59  ;;  %v2126_v44 = vsel %vm458_vm8, %v2124_v9, %v2125_v31  ;;  %v2127_v22 = vrot.slane %v2120_v12, 5 }
 0x1fc   : > { %v2064_v38 = vsel %vm388_vm6, %v2061_v59, %v2063_v19  ;;  %v2085_v28 = vrot.slane %v2078_v60, 4 }
 0x1fd   : > { %v1404_v30 = vpop.permute.xlu1 %1403  ;;  %v1422_v62 = vpop.permute.xlu0 %1421 }
 0x1fe   : > { %v1408_v33 = vadd.f32 %v1404_v30, %v1386_v52  ;;  %v1427_v36 = vadd.f32 %v1422_v62, %v1407_v8 }
 0x1ff   : > { %1983 = vrot.lane.b32.xlu1 %v1980_v0, %s2688_s25  ;;  %2003 = vrot.lane.b32.xlu0 %v2000_v61, %s2688_s25  ;;  %v2084_v0 = vsel %vm423_vm7, %v2082_v7, %v2083_v53 }
 0x201   : > { %v1424_v46 = vpop.permute.xlu1 %1423  ;;  %v1444_v25 = vpop.permute.xlu0 %1443 }
 0x202   : > { %v1428_v3 = vadd.f32 %v1424_v46, %v1408_v33  ;;  %v1449_v10 = vadd.f32 %v1444_v25, %v1427_v36  ;;  %v2137_v33 = vstv %s2429_s24  ;;  %v2086_v25 = vsel %vm423_vm7, %v2083_v53, %v2085_v28 }
 0x203   : > { %2005 = vrot.lane.b32.xlu1 %v2002_v47, %s2688_s25  ;;  %2023 = vrot.lane.b32.xlu0 %v2020_v51, %s2688_s25  ;;  %v2139_v18 = vmul.f32 %v3918_v43, %v2137_v33  ;;  %v2104_v47 = vsel %vm423_vm7, %v2102_v1, %v2103_v55  ;;  %v2138_v51 = vmul.f32 %v3924_v63, %v2137_v33 }
 0x204   : > { %v2140_v23 = vmul.f32 %v3956_v57, %v2137_v33 }
 0x205   : > { %v1446_v54 = vpop.permute.xlu1 %1445  ;;  %v1464_v49 = vpop.permute.xlu0 %1463  ;;  %v2145_v37 = vrot.slane %v2139_v18, 5  ;;  %v2144_v59 = vrot.slane %v2138_v51, 5 }
 0x206   : > { %v1450_v14 = vadd.f32 %v1446_v54, %v1428_v3  ;;  %v1469_v15 = vadd.f32 %v1464_v49, %v1449_v10  ;;  %v2106_v10 = vsel %vm423_vm7, %v2103_v55, %v2105_v32  ;;  %v2160_v54 = vmul.f32 %v3931_v56, %v2159_v45 }
 0x207   : > { %2025 = vrot.lane.b32.xlu1 %v2022_v34, %s2688_s25  ;;  %2045 = vrot.lane.b32.xlu0 %v2042_v11, %s2688_s25  ;;  %v2161_v49 = vmul.f32 %v3935_v58, %v2159_v45  ;;  %v2147_v21 = vrot.slane %v2140_v23, 5  ;;  %v2146_v34 = vsel %vm458_vm8, %v2144_v59, %v2145_v37  ;;  %v2546_v11 = vld [vmem:[#allocation4 + $0x10] sm:$0x3f] }
 0x208   : > { %v2162_v41 = vmul.f32 %v2546_v11, %v2159_v45  ;;  %v2166_v60 = vrot.slane %v2160_v54, 6 }
 0x209   : > { %v1466_v29 = vpop.permute.xlu1 %1465  ;;  %v1486_v35 = vpop.permute.xlu0 %1485  ;;  %v2167_v56 = vrot.slane %v2161_v49, 6  ;;  %v2148_v7 = vsel %vm458_vm8, %v2145_v37, %v2147_v21 }
 0x20a   : > { %v1470_v40 = vadd.f32 %v1466_v29, %v1450_v14  ;;  %v1491_v17 = vadd.f32 %v1486_v35, %v1469_v15  ;;  %v2128_v15 = vsel %vm458_vm8, %v2125_v31, %v2127_v22  ;;  %v2169_v39 = vrot.slane %v2162_v41, 6 }
 0x20b   : > { %2047 = vrot.lane.b32.xlu1 %v2044_v16, %s2688_s25  ;;  %2065 = vrot.lane.b32.xlu0 %v2062_v26, %s2688_s25  ;;  %v2179_v16 = vstv %s2431_s7  ;;  %v2168_v53 = vsel %vm493_vm9, %v2166_v60, %v2167_v56 }
 0x20c   : > { %v2181_v58 = vmul.f32 %v3918_v43, %v2179_v16  ;;  %v2180_v29 = vmul.f32 %v3924_v63, %v2179_v16  ;;  %v2170_v42 = vsel %vm493_vm9, %v2167_v56, %v2169_v39 }
 0x20d   : > { %v1488_v52 = vpop.permute.xlu1 %1487  ;;  %v1506_v8 = vpop.permute.xlu0 %1505 }
 0x20e   : > { %v1492_v30 = vadd.f32 %v1488_v52, %v1470_v40  ;;  %v1511_v62 = vadd.f32 %v1506_v8, %v1491_v17  ;;  %v2187_v40 = vrot.slane %v2181_v58, 6  ;;  %v2182_v17 = vmul.f32 %v3956_v57, %v2179_v16 }
 0x20f   : > { %2067 = vrot.lane.b32.xlu1 %v2064_v38, %s2688_s25  ;;  %2087 = vrot.lane.b32.xlu0 %v2084_v0, %s2688_s25  ;;  %v2186_v43 = vrot.slane %v2180_v29, 6 }
 0x210   : > { %v2189_v20 = vrot.slane %v2182_v17, 6 }
 0x211   : > { %v1508_v36 = vpop.permute.xlu1 %1507  ;;  %v1528_v61 = vpop.permute.xlu0 %1527  ;;  %v2188_v63 = vsel %vm493_vm9, %v2186_v43, %v2187_v40 }
 0x212   : > { %v1512_v2 = vadd.f32 %v1508_v36, %v1492_v30  ;;  %v1533_v46 = vadd.f32 %v1528_v61, %v1511_v62  ;;  %v2190_v57 = vsel %vm493_vm9, %v2187_v40, %v2189_v20 }
 0x213   : > { %2089 = vrot.lane.b32.xlu1 %v2086_v25, %s2688_s25  ;;  %2107 = vrot.lane.b32.xlu0 %v2104_v47, %s2688_s25 }
 0x215   : > { %v1530_v3 = vpop.permute.xlu1 %1529  ;;  %v1548_v50 = vpop.permute.xlu0 %1547 }
 0x216   : > { %v1534_v5 = vadd.f32 %v1530_v3, %v1512_v2  ;;  %v4064_v13 = vadd.f32 %v1548_v50, %v1533_v46 }
 0x217   : > { %2109 = vrot.lane.b32.xlu1 %v2106_v10, %s2688_s25  ;;  %2129 = vrot.lane.b32.xlu0 %v2126_v44, %s2688_s25 }
 0x219   : > { %v1550_v48 = vpop.permute.xlu1 %1549  ;;  %v1570_v14 = vpop.permute.xlu0 %1569 }
 0x21a   : > { %v1554_v19 = vadd.f32 %v1550_v48, %v1534_v5  ;;  %v1575_v3 = vadd.f32 %v1570_v14, %v4064_v13 }
 0x21b   : > { %2131 = vrot.lane.b32.xlu1 %v2128_v15, %s2688_s25  ;;  %2149 = vrot.lane.b32.xlu0 %v2146_v34, %s2688_s25 }
 0x21d   : > { %v1572_v35 = vpop.permute.xlu1 %1571  ;;  %v1590_v26 = vpop.permute.xlu0 %1589 }
 0x21e   : > { %v1595_v44 = vadd.f32 %v1590_v26, %v1575_v3  ;;  %v1576_v22 = vadd.f32 %v1572_v35, %v1554_v19 }
 0x21f   : > { %2151 = vrot.lane.b32.xlu1 %v2148_v7, %s2688_s25  ;;  %2171 = vrot.lane.b32.xlu0 %v2168_v53, %s2688_s25 }
 0x221   : > { %v1592_v6 = vpop.permute.xlu1 %1591  ;;  %v1612_v27 = vpop.permute.xlu0 %1611 }
 0x222   : > { %v1617_v37 = vadd.f32 %v1612_v27, %v1595_v44  ;;  %v1596_v49 = vadd.f32 %v1592_v6, %v1576_v22 }
 0x223   : > { %2173 = vrot.lane.b32.xlu1 %v2170_v42, %s2688_s25  ;;  %2191 = vrot.lane.b32.xlu0 %v2188_v63, %s2688_s25 }
 0x225   : > { %v1614_v52 = vpop.permute.xlu1 %1613  ;;  %v1632_v8 = vpop.permute.xlu0 %1631 }
 0x226   : > { %v1637_v59 = vadd.f32 %v1632_v8, %v1617_v37  ;;  %v1618_v21 = vadd.f32 %v1614_v52, %v1596_v49 }
 0x227   : > { %2193 = vrot.lane.b32.xlu1 %v2190_v57, %s2688_s25 }
 0x229   : > { %v1634_v38 = vpop.permute.xlu1 %1633  ;;  %v1647_v28 = vpop.permute.xlu0 %1646 }
 0x22a   : > { %v1652_v48 = vadd.f32 %v1647_v28, %v1637_v59  ;;  %v1638_v11 = vadd.f32 %v1634_v38, %v1618_v21 }
 0x22d   : > { %v1649_v24 = vpop.permute.xlu1 %1648  ;;  %v1660_v4 = vpop.permute.xlu0 %1659 }
 0x22e   : > { %v1665_v41 = vadd.f32 %v1660_v4, %v1652_v48  ;;  %v1653_v16 = vadd.f32 %v1649_v24, %v1638_v11 }
 0x231   : > { %v1662_v30 = vpop.permute.xlu1 %1661  ;;  %v1682_v62 = vpop.permute.xlu0 %1681 }
 0x232   : > { %v1687_v60 = vadd.f32 %v1682_v62, %v1665_v41  ;;  %v1666_v13 = vadd.f32 %v1662_v30, %v1653_v16 }
 0x235   : > { %v1684_v0 = vpop.permute.xlu1 %1683  ;;  %v1702_v55 = vpop.permute.xlu0 %1701 }
 0x236   : > { %v1707_v14 = vadd.f32 %v1702_v55, %v1687_v60  ;;  %v1688_v29 = vadd.f32 %v1684_v0, %v1666_v13 }
 0x239   : > { %v1704_v1 = vpop.permute.xlu1 %1703  ;;  %v1724_v32 = vpop.permute.xlu0 %1723 }
 0x23a   : > { %v1729_v26 = vadd.f32 %v1724_v32, %v1707_v14  ;;  %v1708_v7 = vadd.f32 %v1704_v1, %v1688_v29 }
 0x23d   : > { %v1726_v33 = vpop.permute.xlu1 %1725  ;;  %v1744_v36 = vpop.permute.xlu0 %1743 }
 0x23e   : > { %v1749_v53 = vadd.f32 %v1744_v36, %v1729_v26  ;;  %v1730_v39 = vadd.f32 %v1726_v33, %v1708_v7 }
 0x241   : > { %v1746_v61 = vpop.permute.xlu1 %1745  ;;  %v1766_v9 = vpop.permute.xlu0 %1765 }
 0x242   : > { %v1771_v40 = vadd.f32 %v1766_v9, %v1749_v53  ;;  %v1750_v6 = vadd.f32 %v1746_v61, %v1730_v39 }
 0x245   : > { %v1768_v31 = vpop.permute.xlu1 %1767  ;;  %v1786_v12 = vpop.permute.xlu0 %1785 }
 0x246   : > { %v1791_v27 = vadd.f32 %v1786_v12, %v1771_v40  ;;  %v1772_v42 = vadd.f32 %v1768_v31, %v1750_v6 }
 0x249   : > { %v1788_v18 = vpop.permute.xlu1 %1787  ;;  %v1808_v2 = vpop.permute.xlu0 %1807 }
 0x24a   : > { %v1813_v63 = vadd.f32 %v1808_v2, %v1791_v27  ;;  %v1792_v8 = vadd.f32 %v1788_v18, %v1772_v42 }
 0x24d   : > { %v1810_v46 = vpop.permute.xlu1 %1809  ;;  %v1828_v25 = vpop.permute.xlu0 %1827 }
 0x24e   : > { %v1833_v57 = vadd.f32 %v1828_v25, %v1813_v63  ;;  %v1814_v38 = vadd.f32 %v1810_v46, %v1792_v8 }
 0x251   : > { %v1830_v47 = vpop.permute.xlu1 %1829  ;;  %v1850_v51 = vpop.permute.xlu0 %1849 }
 0x252   : > { %v1855_v28 = vadd.f32 %v1850_v51, %v1833_v57  ;;  %v1834_v30 = vadd.f32 %v1830_v47, %v1814_v38 }
 0x255   : > { %v1852_v45 = vpop.permute.xlu1 %1851  ;;  %v1870_v23 = vpop.permute.xlu0 %1869 }
 0x256   : > { %v1875_v62 = vadd.f32 %v1870_v23, %v1855_v28  ;;  %v1856_v0 = vadd.f32 %v1852_v45, %v1834_v30 }
 0x259   : > { %v1872_v50 = vpop.permute.xlu1 %1871  ;;  %v1892_v10 = vpop.permute.xlu0 %1891 }
 0x25a   : > { %v1897_v55 = vadd.f32 %v1892_v10, %v1875_v62  ;;  %v1876_v33 = vadd.f32 %v1872_v50, %v1856_v0 }
 0x25d   : > { %v1894_v5 = vpop.permute.xlu1 %1893  ;;  %v1912_v54 = vpop.permute.xlu0 %1911 }
 0x25e   : > { %v1917_v36 = vadd.f32 %v1912_v54, %v1897_v55  ;;  %v1898_v61 = vadd.f32 %v1894_v5, %v1876_v33 }
 0x261   : > { %v1914_v15 = vpop.permute.xlu1 %1913  ;;  %v1927_v34 = vpop.permute.xlu0 %1926 }
 0x262   : > { %v1932_v9 = vadd.f32 %v1927_v34, %v1917_v36  ;;  %v1918_v2 = vadd.f32 %v1914_v15, %v1898_v61 }
 0x265   : > { %v1929_v56 = vpop.permute.xlu1 %1928  ;;  %v1940_v58 = vpop.permute.xlu0 %1939 }
 0x266   : > { %v1945_v3 = vadd.f32 %v1940_v58, %v1932_v9  ;;  %v1933_v18 = vadd.f32 %v1929_v56, %v1918_v2 }
 0x269   : > { %v1942_v19 = vpop.permute.xlu1 %1941  ;;  %v1962_v35 = vpop.permute.xlu0 %1961 }
 0x26a   : > { %v1967_v25 = vadd.f32 %v1962_v35, %v1945_v3  ;;  %v1946_v44 = vadd.f32 %v1942_v19, %v1933_v18 }
 0x26d   : > { %v1964_v17 = vpop.permute.xlu1 %1963  ;;  %v1982_v43 = vpop.permute.xlu0 %1981 }
 0x26e   : > { %v1987_v22 = vadd.f32 %v1982_v43, %v1967_v25  ;;  %v1968_v47 = vadd.f32 %v1964_v17, %v1946_v44 }
 0x271   : > { %v1984_v20 = vpop.permute.xlu1 %1983  ;;  %v2004_v52 = vpop.permute.xlu0 %2003 }
 0x272   : > { %v2009_v23 = vadd.f32 %v2004_v52, %v1987_v22  ;;  %v1988_v37 = vadd.f32 %v1984_v20, %v1968_v47 }
 0x275   : > { %v2006_v24 = vpop.permute.xlu1 %2005  ;;  %v2024_v4 = vpop.permute.xlu0 %2023 }
 0x276   : > { %v2029_v49 = vadd.f32 %v2024_v4, %v2009_v23  ;;  %v2010_v50 = vadd.f32 %v2006_v24, %v1988_v37 }
 0x279   : > { %v2026_v1 = vpop.permute.xlu1 %2025  ;;  %v2046_v32 = vpop.permute.xlu0 %2045 }
 0x27a   : > { %v2051_v54 = vadd.f32 %v2046_v32, %v2029_v49  ;;  %v2030_v21 = vadd.f32 %v2026_v1, %v2010_v50 }
 0x27d   : > { %v2048_v31 = vpop.permute.xlu1 %2047  ;;  %v2066_v12 = vpop.permute.xlu0 %2065 }
 0x27e   : > { %v2071_v48 = vadd.f32 %v2066_v12, %v2051_v54  ;;  %v2052_v15 = vadd.f32 %v2048_v31, %v2030_v21 }
 0x281   : > { %v2068_v46 = vpop.permute.xlu1 %2067  ;;  %v2088_v51 = vpop.permute.xlu0 %2087 }
 0x282   : > { %v2093_v34 = vadd.f32 %v2088_v51, %v2071_v48  ;;  %v2072_v16 = vadd.f32 %v2068_v46, %v2052_v15 }
 0x285   : > { %v2090_v45 = vpop.permute.xlu1 %2089  ;;  %v2108_v10 = vpop.permute.xlu0 %2107 }
 0x286   : > { %v2113_v60 = vadd.f32 %v2108_v10, %v2093_v34  ;;  %v2094_v56 = vadd.f32 %v2090_v45, %v2072_v16 }
 0x289   : > { %v2110_v5 = vpop.permute.xlu1 %2109  ;;  %v2130_v59 = vpop.permute.xlu0 %2129 }
 0x28a   : > { %v2135_v58 = vadd.f32 %v2130_v59, %v2113_v60  ;;  %v2114_v29 = vadd.f32 %v2110_v5, %v2094_v56 }
 0x28d   : > { %v2132_v11 = vpop.permute.xlu1 %2131  ;;  %v2150_v41 = vpop.permute.xlu0 %2149 }
 0x28e   : > { %v2155_v26 = vadd.f32 %v2150_v41, %v2135_v58  ;;  %v2136_v19 = vadd.f32 %v2132_v11, %v2114_v29 }
 0x291   : > { %v2152_v13 = vpop.permute.xlu1 %2151  ;;  %v2172_v14 = vpop.permute.xlu0 %2171 }
 0x292   : > { %v2177_v35 = vadd.f32 %v2172_v14, %v2155_v26  ;;  %v2156_v39 = vadd.f32 %v2152_v13, %v2136_v19 }
 0x295   : > { %v2174_v7 = vpop.permute.xlu1 %2173  ;;  %v2192_v53 = vpop.permute.xlu0 %2191 }
 0x296   : > { %v2197_v40 = vadd.f32 %v2192_v53, %v2177_v35  ;;  %v2178_v17 = vadd.f32 %v2174_v7, %v2156_v39 }
 0x298   : > { %v2432_v43 = vmul.f32 -1.442695, %v2197_v40 }
 0x299   : > { %v2194_v6 = vpop.permute.xlu1 %2193 }
 0x29a   : > { %2527 = vpow2.f32 %v2432_v43  ;;  %v2198_v27 = vadd.f32 %v2194_v6, %v2178_v17 }
 0x29c   : > { %v2433_v42 = vmul.f32 -1.442695, %v2198_v27 }
 0x29e   : > { %2529 = vpow2.f32 %v2433_v42 }
 0x2a7   : > { %v2528_v63 = vpop.eup %2527 }
 0x2a8   : > { %v2205_v20 = vadd.f32 1.0, %v2528_v63 }
 0x2aa   : > { %2531 = vrcp.f32 %v2205_v20 }
 0x2ab   : > { %v2530_v52 = vpop.eup %2529 }
 0x2ac   : > { %v2206_v8 = vadd.f32 1.0, %v2530_v52 }
 0x2ae   : > { %2533 = vrcp.f32 %v2206_v8 }
 0x2b7   : > { %v2532_v57 = vpop.eup %2531 }
 0x2b8   : > { %2211 = vst.msk [vmem:[%s192_s17] sm:$0xff] %vm198_vm0, %v2532_v57 }
 0x2bb   : > { %v2534_v38 = vpop.eup %2533 }
 0x2bc   : > { %2212 = vst.msk [vmem:[%s192_s17 + $0x8] sm:$0xff] %vm198_vm0, %v2534_v38 }
 0x2bd   : > { %2603 = shalt.err (!%p2600_p9)
}
 0x2be   : > { %s2604_s5 = scalar_lea.hbm %s4094_s1, 256  ;;  %s2608_s16 = scalar_lea.hbm %s4147_s2, 512 }
 0x2bf   : > { %p2605_p13 = scmp.ne.s32.totalorder %s4094_s1, %s2604_s5  ;;  %p2609_p11 = scmp.lt.s32.totalorder %s4094_s1, %s4147_s2 }
 0x2c0   : > { %p2610_p5 = scmp.lt.s32.totalorder %s2608_s16, %s2604_s5 }
 0x2c1   : > { %p2606_p4 = pnand %p2605_p13, %p4215_p7 }
 0x2c2   : > { %p2611_p0 = por %p2610_p5, %p2609_p11 }
 0x2c3   : > { %p2607_p6 = pneg %p2606_p4 }
 0x2c5   : > { %p2612_p3 = pnand %p2611_p0, %p2607_p6 }
 0x2c7   : > { %2615 = shalt.err (!%p2612_p3)
}
 0x2c8   : > { %s2690_s27 = smov 128   ;;  %s2691_s19 = smov 8  }
 0x2c9   : > { %2447 = dma.vmem_to_hbm [thread:$0]  (%p4215_p7), %s4096_s29, 256, %s4094_s1, %s2214_s11, %s2690_s27, %s2690_s27, %s2691_s19  }
 0x2ca PF: > { %s2242_s23 = sand.u32 1, %s2654_s9   ;;  %p4216_p12 = scmp.ne.s32.totalorder %s4169_s22, 0 }
 0x2cb   : > { %p4217_p2 = scmp.ge.s32.totalorder %s2674_s14, 2  ;;  %s2243_s24 = scalar_lea.sflag [#allocation7], %s2242_s23 }
 0x2cd   : > { %p2458_p1 = pnand %p4217_p2, %p4216_p12 }
 0x2cf   : > { %p2459_p10 = pneg %p2458_p1 }
 0x2d1   : > { %2649 = dma.done.wait (%p2459_p10), %s2243_s24, 256  }
 0x2d2   : > { %2651 = vsyncadd (%p2459_p10), %s2243_s24, 4294967040  ;;  %s19_s14 = sadd.s32 1, %s2674_s14   ;;  %s4218_s30 = sld [smem:[#allocation14_spill]] }
 0x2d3   : > { %p16_p8 = scmp.ge.s32.totalorder %s19_s14, 4   ;;  %s4219_s11 = sld [smem:[#allocation17_spill]] }
 0x2d4   : > { %s4220_s12 = sld [smem:[#allocation15_spill]]  ;;  %s4222_s9 = smov %s2658_s10 }
 0x2d5   : > { %s4221_s13 = sld [smem:[#allocation16_spill]]  ;;  %18 = sbr.rel (!%p16_p8) target bundleno = 10 (0xa), region = 87 }
 0x2d8   : > { %s4223_s10 = smov %s4218_s30 }
 0x2da   :  { %2248 = vsyncpa [#allocation6], 1 }
 0x2db   :  { %2250 = vsyncpa [#allocation6 + $0x1], 1 }
 0x2dc   :  { %2251 = vsyncpa [#allocation7], 1 }
 0x2dd   :  { %2253 = vsyncpa [#allocation7 + $0x1], 1 }
 0x2de   :  { %2254 = vsyncpa [#allocation8], 1 }
 0x2df   :  { %2256 = vsyncpa [#allocation8 + $0x1], 1 }

</bundles_post_ra>
